<compile_context>
chip_gen: v7x
topology: tpu7x:2x2x1
jax: 0.10.0
libtpu: 0.0.40
codegen_flags: <defaults>
</compile_context>

<pallas_src>
import jax
import jax.numpy as jnp
from jax.experimental import pallas as pl
from jax.experimental.pallas import tpu as pltpu


def _make_conv_bn_relu_kernel(KH, KW, th, Wo, Cin, Coutp, stride, n_h_tiles,
                              has_relu):
    """Builds the fused kernel body (all sizes are Python ints, closed over)."""

    def kernel(x_ref, w_ref, bias_ref, o_ref):
        # x_ref:    (1, Hp, Wp, Cin)      whole padded image (bf16), resident
        #                                 across the h-tile axis (fetched once).
        # w_ref:    (KH*KW, Cin, Coutp)   BN-scale-folded weight (bf16),
        #                                 zero-padded output channels.
        # bias_ref: (1, Coutp)            folded BN bias (f32).
        # o_ref:    (1, th, Wo, Coutp)    lane-dense output tile.
        if n_h_tiles == 1:
            row_base = 0                                   # static path
        else:
            row_base = pl.multiple_of(
                pl.program_id(1) * (th * stride), th * stride)

        acc = jnp.zeros((th * Wo, Coutp), jnp.float32)
        # In-kernel im2col: accumulate KH*KW shifted-slice matmuls on the MXU.
        for kh in range(KH):
            for kw in range(KW):
                if stride == 1:
                    xt = x_ref[0, pl.ds(row_base + kh, th), pl.ds(kw, Wo), :]
                else:
                    xt = x_ref[0,
                               pl.ds(row_base + kh, th, stride=stride),
                               pl.ds(kw, Wo, stride=stride), :]
                xt = xt.reshape(th * Wo, Cin)              # layout-trivial merge
                acc = acc + jnp.dot(xt, w_ref[kh * KW + kw],
                                    preferred_element_type=jnp.float32)

        y = acc + bias_ref[...]                            # folded BN bias
        if has_relu:
            y = jnp.maximum(y, 0.0)
        o_ref[...] = y.reshape(1, th, Wo, Coutp).astype(o_ref.dtype)

    return kernel


def conv_bn_relu_forward(x_nchw, w_oihw, conv_bias, gamma, beta,
                         running_mean, running_var, *,
                         stride=1, padding=1, eps=1e-5,
                         has_bn=True, has_relu=True,
                         compute_dtype=jnp.bfloat16,
                         target_rows_per_step=1024):
    N, Cin, H, W = x_nchw.shape
    Cout, Cin_w, KH, KW = w_oihw.shape
    assert Cin == Cin_w  # TODO(synk): grouped convolution (groups > 1) unsupported

    H_out = (H + 2 * padding - KH) // stride + 1
    W_out = (W + 2 * padding - KW) // stride + 1

    LANES = 128
    Coutp = ((Cout + LANES - 1) // LANES) * LANES          # lane-dense output

    # --- glue: NCHW -> NHWC, spatial zero-pad, bf16 cast for the MXU feed ----
    # TODO(synk): drop these transposes if the surrounding graph is channels-last.
    x = jnp.transpose(x_nchw, (0, 2, 3, 1))
    xp = jnp.pad(x, ((0, 0), (padding, padding), (padding, padding), (0, 0)))
    xp = xp.astype(compute_dtype)
    Hp, Wp = xp.shape[1], xp.shape[2]

    # --- fold eval-mode BN (+ conv bias) into per-channel scale / bias -------
    if has_bn:
        inv_std = 1.0 / jnp.sqrt(running_var.astype(jnp.float32) + eps)
        scale = gamma.astype(jnp.float32) * inv_std
        bias = beta.astype(jnp.float32) + (
            conv_bias.astype(jnp.float32) - running_mean.astype(jnp.float32)) * scale
    else:
        scale = jnp.ones((Cout,), jnp.float32)
        bias = conv_bias.astype(jnp.float32)

    # Weight (Cout,Cin,KH,KW) -> (KH*KW, Cin, Cout); fold BN scale; pad Cout to
    # 128 lanes with zeros (padded channels stay inert: acc=0, bias=0, relu=0).
    w_taps = jnp.transpose(w_oihw.astype(jnp.float32), (2, 3, 1, 0))
    w_taps = w_taps.reshape(KH * KW, Cin, Cout) * scale[None, None, :]
    w_taps = jnp.pad(w_taps.astype(compute_dtype),
                     ((0, 0), (0, 0), (0, Coutp - Cout)))
    bias_p = jnp.pad(bias, (0, Coutp - Cout)).reshape(1, Coutp)

    # --- choose output-row tile: largest divisor of H_out with th*W_out rows
    # near the target (big M tile per step, bounded VMEM). ---------------------
    th = 1
    for cand in range(1, H_out + 1):
        if H_out % cand == 0 and cand * W_out <= target_rows_per_step:
            th = cand
    n_h_tiles = H_out // th

    # TODO(synk): for very large Cin/Cout or huge images, add Cin/Cout tiling
    # and row-tiled manual DMA of the input (bounded VMEM on v7x's 64 MiB).

    kernel = _make_conv_bn_relu_kernel(KH, KW, th, W_out, Cin, Coutp, stride,
                                       n_h_tiles, has_relu)

    out = pl.pallas_call(
        kernel,
        out_shape=jax.ShapeDtypeStruct((N, H_out, W_out, Coutp), x_nchw.dtype),
        grid=(N, n_h_tiles),
        in_specs=[
            # Whole padded image; block index constant along the h-tile axis so
            # each image is DMA'd from HBM exactly once (no im2col amplification).
            pl.BlockSpec((1, Hp, Wp, Cin), lambda n, i: (n, 0, 0, 0)),
            pl.BlockSpec((KH * KW, Cin, Coutp), lambda n, i: (0, 0, 0)),
            pl.BlockSpec((1, Coutp), lambda n, i: (0, 0)),
        ],
        out_specs=pl.BlockSpec((1, th, W_out, Coutp), lambda n, i: (n, i, 0, 0)),
        compiler_params=pltpu.CompilerParams(
            dimension_semantics=("parallel", "arbitrary"),
            vmem_limit_bytes=32 * 1024 * 1024,
        ),
    )(xp, w_taps, bias_p)

    out = out[..., :Cout]                         # drop padded output channels
    return jnp.transpose(out, (0, 3, 1, 2))       # back to NCHW


def _reference(x_nchw, w_oihw, conv_bias, gamma, beta, rmean, rvar,
               stride=1, padding=1, eps=1e-5):
    y = jax.lax.conv_general_dilated(
        x_nchw, w_oihw, window_strides=(stride, stride),
        padding=[(padding, padding), (padding, padding)],
        dimension_numbers=("NCHW", "OIHW", "NCHW"))
    y = y + conv_bias[None, :, None, None]
    y = (y - rmean[None, :, None, None]) / jnp.sqrt(rvar[None, :, None, None] + eps)
    y = y * gamma[None, :, None, None] + beta[None, :, None, None]
    return jnp.maximum(y, 0.0)


if __name__ == "__main__":
    # conv_bn_relu(in_planes=4, out_planes=8, kernel_size=3, stride=1, padding=1)
    N, Cin, H, W = 2, 4, 16, 16
    Cout, KH, KW = 8, 3, 3
    stride, padding = 1, 1

    key = jax.random.PRNGKey(0)
    k_x, k_w, k_b, k_g, k_beta = jax.random.split(key, 5)

    x = jax.random.normal(k_x, (N, Cin, H, W), dtype=jnp.float32)
    w = 0.1 * jax.random.normal(k_w, (Cout, Cin, KH, KW), dtype=jnp.float32)
    conv_bias = 0.1 * jax.random.normal(k_b, (Cout,), dtype=jnp.float32)
    gamma = 1.0 + 0.1 * jax.random.normal(k_g, (Cout,), dtype=jnp.float32)
    beta = 0.1 * jax.random.normal(k_beta, (Cout,), dtype=jnp.float32)
    running_mean = jnp.zeros((Cout,), jnp.float32)   # fresh BatchNorm2d defaults
    running_var = jnp.ones((Cout,), jnp.float32)

    out = conv_bn_relu_forward(x, w, conv_bias, gamma, beta,
                               running_mean, running_var,
                               stride=stride, padding=padding)
    out = jax.block_until_ready(out)

    ref = _reference(x, w, conv_bias, gamma, beta, running_mean, running_var,
                     stride=stride, padding=padding)
    assert out.shape == (N, Cout, H, W), out.shape
    # Inputs/weights are fed to the MXU in bf16 (f32 accumulation), so compare
    # against the f32 reference at bf16-level tolerance.
    max_err = float(jnp.max(jnp.abs(out - ref)))
    assert jnp.allclose(out, ref, atol=3e-2, rtol=3e-2), max_err

    print("KERNEL_OK")
</pallas_src>

<mosaic_0001>
module attributes {stable_mosaic.version = 11 : i64} {
  func.func @kernel(%arg0: i32, %arg1: i32, %arg2: memref<1x18x18x4xbf16, #tpu.memory_space<vmem>>, %arg3: memref<9x4x128xbf16, #tpu.memory_space<vmem>>, %arg4: memref<1x128xf32, #tpu.memory_space<vmem>>, %arg5: memref<1x16x16x128xf32, #tpu.memory_space<vmem>>) attributes {dimension_semantics = [#tpu.dimension_semantics<parallel>, #tpu.dimension_semantics<arbitrary>], iteration_bounds = array<i64: 2, 1>, scalar_prefetch = 0 : i64, scratch_operands = 0 : i64, tpu.core_type = #tpu.core_type<tc>, window_params = [{transform_indices = @transform_0, window_bounds = array<i64: 1, 18, 18, 4>}, {pipeline_mode = #tpu.pipeline_mode<synchronous>, transform_indices = @transform_1, window_bounds = array<i64: 9, 4, 128>}, {pipeline_mode = #tpu.pipeline_mode<synchronous>, transform_indices = @transform_2, window_bounds = array<i64: 1, 128>}, {transform_indices = @transform_3, window_bounds = array<i64: 1, 16, 16, 128>}]} {
    %cst = arith.constant 0.000000e+00 : f32
    %0 = vector.broadcast %cst : f32 to vector<256x128xf32>
    %c0 = arith.constant 0 : index
    %c0_0 = arith.constant 0 : index
    %c0_1 = arith.constant 0 : index
    %c0_2 = arith.constant 0 : index
    %1 = vector.load %arg2[%c0, %c0_0, %c0_1, %c0_2] : memref<1x18x18x4xbf16, #tpu.memory_space<vmem>>, vector<1x16x16x4xbf16>
    %2 = vector.shape_cast %1 : vector<1x16x16x4xbf16> to vector<16x16x4xbf16>
    %3 = vector.shape_cast %2 : vector<16x16x4xbf16> to vector<256x4xbf16>
    %c0_3 = arith.constant 0 : index
    %c0_4 = arith.constant 0 : index
    %c0_5 = arith.constant 0 : index
    %4 = vector.load %arg3[%c0_3, %c0_4, %c0_5] : memref<9x4x128xbf16, #tpu.memory_space<vmem>>, vector<1x4x128xbf16>
    %5 = vector.shape_cast %4 : vector<1x4x128xbf16> to vector<4x128xbf16>
    %cst_6 = arith.constant dense<0.000000e+00> : vector<256x128xf32>
    %6 = tpu.matmul %3, %5, %cst_6 {dimension_numbers = #tpu.dot_dimension_numbers<[1], [0], [0], [1], [0, 0, 1, 1], [], []>} : vector<256x4xbf16>, vector<4x128xbf16>, vector<256x128xf32> -> vector<256x128xf32>
    %7 = arith.addf %0, %6 : vector<256x128xf32>
    %c0_7 = arith.constant 0 : index
    %c0_8 = arith.constant 0 : index
    %c1 = arith.constant 1 : index
    %c0_9 = arith.constant 0 : index
    %8 = vector.load %arg2[%c0_7, %c0_8, %c1, %c0_9] : memref<1x18x18x4xbf16, #tpu.memory_space<vmem>>, vector<1x16x16x4xbf16>
    %9 = vector.shape_cast %8 : vector<1x16x16x4xbf16> to vector<16x16x4xbf16>
    %10 = vector.shape_cast %9 : vector<16x16x4xbf16> to vector<256x4xbf16>
    %c1_10 = arith.constant 1 : index
    %c0_11 = arith.constant 0 : index
    %c0_12 = arith.constant 0 : index
    %11 = vector.load %arg3[%c1_10, %c0_11, %c0_12] : memref<9x4x128xbf16, #tpu.memory_space<vmem>>, vector<1x4x128xbf16>
    %12 = vector.shape_cast %11 : vector<1x4x128xbf16> to vector<4x128xbf16>
    %cst_13 = arith.constant dense<0.000000e+00> : vector<256x128xf32>
    %13 = tpu.matmul %10, %12, %cst_13 {dimension_numbers = #tpu.dot_dimension_numbers<[1], [0], [0], [1], [0, 0, 1, 1], [], []>} : vector<256x4xbf16>, vector<4x128xbf16>, vector<256x128xf32> -> vector<256x128xf32>
    %14 = arith.addf %7, %13 : vector<256x128xf32>
    %c0_14 = arith.constant 0 : index
    %c0_15 = arith.constant 0 : index
    %c2 = arith.constant 2 : index
    %c0_16 = arith.constant 0 : index
    %15 = vector.load %arg2[%c0_14, %c0_15, %c2, %c0_16] : memref<1x18x18x4xbf16, #tpu.memory_space<vmem>>, vector<1x16x16x4xbf16>
    %16 = vector.shape_cast %15 : vector<1x16x16x4xbf16> to vector<16x16x4xbf16>
    %17 = vector.shape_cast %16 : vector<16x16x4xbf16> to vector<256x4xbf16>
    %c2_17 = arith.constant 2 : index
    %c0_18 = arith.constant 0 : index
    %c0_19 = arith.constant 0 : index
    %18 = vector.load %arg3[%c2_17, %c0_18, %c0_19] : memref<9x4x128xbf16, #tpu.memory_space<vmem>>, vector<1x4x128xbf16>
    %19 = vector.shape_cast %18 : vector<1x4x128xbf16> to vector<4x128xbf16>
    %cst_20 = arith.constant dense<0.000000e+00> : vector<256x128xf32>
    %20 = tpu.matmul %17, %19, %cst_20 {dimension_numbers = #tpu.dot_dimension_numbers<[1], [0], [0], [1], [0, 0, 1, 1], [], []>} : vector<256x4xbf16>, vector<4x128xbf16>, vector<256x128xf32> -> vector<256x128xf32>
    %21 = arith.addf %14, %20 : vector<256x128xf32>
    %c0_21 = arith.constant 0 : index
    %c1_22 = arith.constant 1 : index
    %c0_23 = arith.constant 0 : index
    %c0_24 = arith.constant 0 : index
    %22 = vector.load %arg2[%c0_21, %c1_22, %c0_23, %c0_24] : memref<1x18x18x4xbf16, #tpu.memory_space<vmem>>, vector<1x16x16x4xbf16>
    %23 = vector.shape_cast %22 : vector<1x16x16x4xbf16> to vector<16x16x4xbf16>
    %24 = vector.shape_cast %23 : vector<16x16x4xbf16> to vector<256x4xbf16>
    %c3 = arith.constant 3 : index
    %c0_25 = arith.constant 0 : index
    %c0_26 = arith.constant 0 : index
    %25 = vector.load %arg3[%c3, %c0_25, %c0_26] : memref<9x4x128xbf16, #tpu.memory_space<vmem>>, vector<1x4x128xbf16>
    %26 = vector.shape_cast %25 : vector<1x4x128xbf16> to vector<4x128xbf16>
    %cst_27 = arith.constant dense<0.000000e+00> : vector<256x128xf32>
    %27 = tpu.matmul %24, %26, %cst_27 {dimension_numbers = #tpu.dot_dimension_numbers<[1], [0], [0], [1], [0, 0, 1, 1], [], []>} : vector<256x4xbf16>, vector<4x128xbf16>, vector<256x128xf32> -> vector<256x128xf32>
    %28 = arith.addf %21, %27 : vector<256x128xf32>
    %c0_28 = arith.constant 0 : index
    %c1_29 = arith.constant 1 : index
    %c1_30 = arith.constant 1 : index
    %c0_31 = arith.constant 0 : index
    %29 = vector.load %arg2[%c0_28, %c1_29, %c1_30, %c0_31] : memref<1x18x18x4xbf16, #tpu.memory_space<vmem>>, vector<1x16x16x4xbf16>
    %30 = vector.shape_cast %29 : vector<1x16x16x4xbf16> to vector<16x16x4xbf16>
    %31 = vector.shape_cast %30 : vector<16x16x4xbf16> to vector<256x4xbf16>
    %c4 = arith.constant 4 : index
    %c0_32 = arith.constant 0 : index
    %c0_33 = arith.constant 0 : index
    %32 = vector.load %arg3[%c4, %c0_32, %c0_33] : memref<9x4x128xbf16, #tpu.memory_space<vmem>>, vector<1x4x128xbf16>
    %33 = vector.shape_cast %32 : vector<1x4x128xbf16> to vector<4x128xbf16>
    %cst_34 = arith.constant dense<0.000000e+00> : vector<256x128xf32>
    %34 = tpu.matmul %31, %33, %cst_34 {dimension_numbers = #tpu.dot_dimension_numbers<[1], [0], [0], [1], [0, 0, 1, 1], [], []>} : vector<256x4xbf16>, vector<4x128xbf16>, vector<256x128xf32> -> vector<256x128xf32>
    %35 = arith.addf %28, %34 : vector<256x128xf32>
    %c0_35 = arith.constant 0 : index
    %c1_36 = arith.constant 1 : index
    %c2_37 = arith.constant 2 : index
    %c0_38 = arith.constant 0 : index
    %36 = vector.load %arg2[%c0_35, %c1_36, %c2_37, %c0_38] : memref<1x18x18x4xbf16, #tpu.memory_space<vmem>>, vector<1x16x16x4xbf16>
    %37 = vector.shape_cast %36 : vector<1x16x16x4xbf16> to vector<16x16x4xbf16>
    %38 = vector.shape_cast %37 : vector<16x16x4xbf16> to vector<256x4xbf16>
    %c5 = arith.constant 5 : index
    %c0_39 = arith.constant 0 : index
    %c0_40 = arith.constant 0 : index
    %39 = vector.load %arg3[%c5, %c0_39, %c0_40] : memref<9x4x128xbf16, #tpu.memory_space<vmem>>, vector<1x4x128xbf16>
    %40 = vector.shape_cast %39 : vector<1x4x128xbf16> to vector<4x128xbf16>
    %cst_41 = arith.constant dense<0.000000e+00> : vector<256x128xf32>
    %41 = tpu.matmul %38, %40, %cst_41 {dimension_numbers = #tpu.dot_dimension_numbers<[1], [0], [0], [1], [0, 0, 1, 1], [], []>} : vector<256x4xbf16>, vector<4x128xbf16>, vector<256x128xf32> -> vector<256x128xf32>
    %42 = arith.addf %35, %41 : vector<256x128xf32>
    %c0_42 = arith.constant 0 : index
    %c2_43 = arith.constant 2 : index
    %c0_44 = arith.constant 0 : index
    %c0_45 = arith.constant 0 : index
    %43 = vector.load %arg2[%c0_42, %c2_43, %c0_44, %c0_45] : memref<1x18x18x4xbf16, #tpu.memory_space<vmem>>, vector<1x16x16x4xbf16>
    %44 = vector.shape_cast %43 : vector<1x16x16x4xbf16> to vector<16x16x4xbf16>
    %45 = vector.shape_cast %44 : vector<16x16x4xbf16> to vector<256x4xbf16>
    %c6 = arith.constant 6 : index
    %c0_46 = arith.constant 0 : index
    %c0_47 = arith.constant 0 : index
    %46 = vector.load %arg3[%c6, %c0_46, %c0_47] : memref<9x4x128xbf16, #tpu.memory_space<vmem>>, vector<1x4x128xbf16>
    %47 = vector.shape_cast %46 : vector<1x4x128xbf16> to vector<4x128xbf16>
    %cst_48 = arith.constant dense<0.000000e+00> : vector<256x128xf32>
    %48 = tpu.matmul %45, %47, %cst_48 {dimension_numbers = #tpu.dot_dimension_numbers<[1], [0], [0], [1], [0, 0, 1, 1], [], []>} : vector<256x4xbf16>, vector<4x128xbf16>, vector<256x128xf32> -> vector<256x128xf32>
    %49 = arith.addf %42, %48 : vector<256x128xf32>
    %c0_49 = arith.constant 0 : index
    %c2_50 = arith.constant 2 : index
    %c1_51 = arith.constant 1 : index
    %c0_52 = arith.constant 0 : index
    %50 = vector.load %arg2[%c0_49, %c2_50, %c1_51, %c0_52] : memref<1x18x18x4xbf16, #tpu.memory_space<vmem>>, vector<1x16x16x4xbf16>
    %51 = vector.shape_cast %50 : vector<1x16x16x4xbf16> to vector<16x16x4xbf16>
    %52 = vector.shape_cast %51 : vector<16x16x4xbf16> to vector<256x4xbf16>
    %c7 = arith.constant 7 : index
    %c0_53 = arith.constant 0 : index
    %c0_54 = arith.constant 0 : index
    %53 = vector.load %arg3[%c7, %c0_53, %c0_54] : memref<9x4x128xbf16, #tpu.memory_space<vmem>>, vector<1x4x128xbf16>
    %54 = vector.shape_cast %53 : vector<1x4x128xbf16> to vector<4x128xbf16>
    %cst_55 = arith.constant dense<0.000000e+00> : vector<256x128xf32>
    %55 = tpu.matmul %52, %54, %cst_55 {dimension_numbers = #tpu.dot_dimension_numbers<[1], [0], [0], [1], [0, 0, 1, 1], [], []>} : vector<256x4xbf16>, vector<4x128xbf16>, vector<256x128xf32> -> vector<256x128xf32>
    %56 = arith.addf %49, %55 : vector<256x128xf32>
    %c0_56 = arith.constant 0 : index
    %c2_57 = arith.constant 2 : index
    %c2_58 = arith.constant 2 : index
    %c0_59 = arith.constant 0 : index
    %57 = vector.load %arg2[%c0_56, %c2_57, %c2_58, %c0_59] : memref<1x18x18x4xbf16, #tpu.memory_space<vmem>>, vector<1x16x16x4xbf16>
    %58 = vector.shape_cast %57 : vector<1x16x16x4xbf16> to vector<16x16x4xbf16>
    %59 = vector.shape_cast %58 : vector<16x16x4xbf16> to vector<256x4xbf16>
    %c8 = arith.constant 8 : index
    %c0_60 = arith.constant 0 : index
    %c0_61 = arith.constant 0 : index
    %60 = vector.load %arg3[%c8, %c0_60, %c0_61] : memref<9x4x128xbf16, #tpu.memory_space<vmem>>, vector<1x4x128xbf16>
    %61 = vector.shape_cast %60 : vector<1x4x128xbf16> to vector<4x128xbf16>
    %cst_62 = arith.constant dense<0.000000e+00> : vector<256x128xf32>
    %62 = tpu.matmul %59, %61, %cst_62 {dimension_numbers = #tpu.dot_dimension_numbers<[1], [0], [0], [1], [0, 0, 1, 1], [], []>} : vector<256x4xbf16>, vector<4x128xbf16>, vector<256x128xf32> -> vector<256x128xf32>
    %63 = arith.addf %56, %62 : vector<256x128xf32>
    %c0_63 = arith.constant 0 : index
    %c0_64 = arith.constant 0 : index
    %64 = vector.load %arg4[%c0_63, %c0_64] : memref<1x128xf32, #tpu.memory_space<vmem>>, vector<1x128xf32>
    %65 = vector.broadcast %64 : vector<1x128xf32> to vector<256x128xf32>
    %66 = arith.addf %63, %65 : vector<256x128xf32>
    %cst_65 = arith.constant 0.000000e+00 : f32
    %67 = vector.broadcast %cst_65 : f32 to vector<256x128xf32>
    %68 = arith.maximumf %66, %67 : vector<256x128xf32>
    %69 = vector.shape_cast %68 : vector<256x128xf32> to vector<1x16x16x128xf32>
    %c0_66 = arith.constant 0 : index
    %c0_67 = arith.constant 0 : index
    %c0_68 = arith.constant 0 : index
    %c0_69 = arith.constant 0 : index
    %70 = vector.load %arg5[%c0_66, %c0_67, %c0_68, %c0_69] : memref<1x16x16x128xf32, #tpu.memory_space<vmem>>, vector<1x16x16x128xf32>
    tpu.vector_store %arg5[%c0_66, %c0_67, %c0_68, %c0_69], %69 {strides = array<i32>} : memref<1x16x16x128xf32, #tpu.memory_space<vmem>>, vector<1x16x16x128xf32>,
    return
  }
  func.func @transform_0(%arg0: i32, %arg1: i32) -> (i32, i32, i32, i32) {
    %c0_i32 = arith.constant 0 : i32
    %c0_i32_0 = arith.constant 0 : i32
    %c0_i32_1 = arith.constant 0 : i32
    %c0_i32_2 = arith.constant 0 : i32
    return %arg0, %c0_i32, %c0_i32_0, %c0_i32_1 : i32, i32, i32, i32
  }
  func.func @transform_1(%arg0: i32, %arg1: i32) -> (i32, i32, i32) {
    %c0_i32 = arith.constant 0 : i32
    %c0_i32_0 = arith.constant 0 : i32
    %c0_i32_1 = arith.constant 0 : i32
    %c0_i32_2 = arith.constant 0 : i32
    return %c0_i32, %c0_i32_0, %c0_i32_1 : i32, i32, i32
  }
  func.func @transform_2(%arg0: i32, %arg1: i32) -> (i32, i32) {
    %c0_i32 = arith.constant 0 : i32
    %c0_i32_0 = arith.constant 0 : i32
    %c0_i32_1 = arith.constant 0 : i32
    return %c0_i32, %c0_i32_0 : i32, i32
  }
  func.func @transform_3(%arg0: i32, %arg1: i32) -> (i32, i32, i32, i32) {
    %c0_i32 = arith.constant 0 : i32
    %c0_i32_0 = arith.constant 0 : i32
    %c0_i32_1 = arith.constant 0 : i32
    return %arg0, %arg1, %c0_i32, %c0_i32_0 : i32, i32, i32, i32
  }
}

</mosaic_0001>

<bundles_post_ra>
// kernel: tpu_custom_call.1
= control target key start
LH: loop header
LB: loop body
LE: loop exit
PB: predicated region body
PF: predicated region fallthrough
CT: control target
= control target key end

     0   :  { %8 = vsyncpa [#allocation3], 0  ;;  %s8380_s0 = inlined_call_operand.vmem [shape: bf16[2,18,18,4], index: 0, kind: input, shape index: {}]   ;;  %s8381_s1 = inlined_call_operand.vmem [shape: bf16[9,4,128], index: 1, kind: input, shape index: {}]   ;;  %s8382_s2 = inlined_call_operand.vmem [shape: f32[1,128], index: 2, kind: input, shape index: {}]   ;;  %s8383_s3 = inlined_call_operand.hbm [shape: f32[2,16,16,128], index: 3, kind: output, shape index: {}]  }
   0x1   :  { %10 = vsyncpa [#allocation3 + $0x1], 0  ;;  %s6480_s12 = smov 0   ;;  %s6482_s13 = smov 0  }
   0x2   :  { %s6484_s14 = smov 0   ;;  %s6486_s15 = smov 0  }
   0x3   :  { %s6488_s16 = smov 0   ;;  %s6490_s17 = smov 0  }
   0x4 LB: > { %s4937_s18 = sadd.s32 4294967295, %s6455_s17   ;;  %s4938_s19 = sadd.s32 4294967294, %s6455_s17   ;;  %s6455_s17 = sphi %s6490_s17, %s16_s17   ;;  %s6451_s16 = sphi %s6488_s16, %s8457_s16   ;;  %s6447_s15 = sphi %s6486_s15, %s8456_s15   ;;  %s6443_s14 = sphi %s6484_s14, %s8455_s14   ;;  %s6439_s13 = sphi %s6482_s13, %s8454_s13   ;;  %s6435_s12 = sphi %s6480_s12, %s8453_s12  }
   0x5   : > { %s28_s20 = sadd.s32 1, %s6451_s16  ;;  %s105_s21 = sadd.s32 1, %s6443_s14 }
   0x6   : > { %p30_p0 = scmp.ge.s32.totalorder %s28_s20, 2  ;;  %p115_p1 = scmp.ne.s32.totalorder %s6443_s14, %s6439_s13 }
   0x7   : > { %p116_p2 = scmp.eq.s32.totalorder %s4937_s18, 1  ;;  %p121_p3 = scmp.ne.s32.totalorder %s6439_s13, %s6435_s12 }
   0x8   : > { %s8459_s20 = smov (%p30_p0, %s28_s20), 0  ;;  %p122_p5 = scmp.eq.s32.totalorder %s4938_s19, 1 }
   0x9   : > { %p6520_p4 = por %p116_p2, %p115_p1  ;;  %s100_s23 = ssub.s32 %s6451_s16, %s8459_s20 }
   0xa   : > { %p4941_p6 = scmp.ge.s32.totalorder %s6455_s17, 1  ;;  %p103_p7 = scmp.eq.s32.totalorder %s100_s23, 0 }
   0xb   : > { %p6527_p8 = por %p122_p5, %p121_p3  ;;  %p154_p9 = scmp.lt.s32.totalorder %s6455_s17, 3 }
   0xc   : > { %s6533_s25 = scalar_select %p103_p7, %s6443_s14, %s105_s21  }
   0xd   : > { %p155_p10 = pnand %p4941_p6, %p154_p9 }
   0xf   : > { %158 = sbr.rel (%p155_p10) target bundleno = 611 (0x263), region = 32 }
  0x16   : > { %v4944_v0 = vld [vmem:[%s8381_s1 + $0x2] sm:$0x3]  ;;  %vm720_vm0 = vcmask 1041408   ;;  %v5171_v1 = vld [vmem:[%s8381_s1 + $0x8] sm:$0x3]  ;;  %p178_p11 = scmp.lt.s32.totalorder %s6447_s15, 1 }
  0x17   : > { %6204 = vmatprep.subr.msk.bf16.mxu1 %vm720_vm0, %v4944_v0  ;;  %6208 = vmatprep.subr.msk.bf16.mxu0 %vm720_vm0, %v5171_v1  ;;  %v722_v2 = vsel %vm720_vm0, %v4944_v0, 0  ;;  %v6546_v3 = vsel %vm720_vm0, %v5171_v1, 0  ;;  %v217_v4 = vld [vmem:[%s8381_s1] sm:$0x3]  ;;  %v5236_v5 = vld [vmem:[%s8381_s1 + $0xa] sm:$0x3] }
  0x18   : > { %8399 = vst [vmem:[#allocation5_spill] sm:$0xff] %v6546_v3  ;;  %5641 = vmatpush3.bf16.msra.mxu1 %v722_v2  ;;  %5777 = vmatpush3.bf16.msra.mxu0 %v6546_v3  ;;  %s179_s30 = scalar_select %p178_p11, %s6447_s15, 1  ;;  %vm234_vm1 = vsmask.f32 3328  ;;  %vm235_vm2 = vsmask.f32 7440 }
  0x19   : > { %6205 = vmatprep.subr.msk.bf16.mxu1 %vm720_vm0, %v217_v4  ;;  %6210 = vmatprep.subr.msk.bf16.mxu0 %vm720_vm0, %v5236_v5  ;;  %vm671_vm3 = vcmask 31744   ;;  %v6574_v17 = vsel %vm720_vm0, %v217_v4, 0  ;;  %v6580_v26 = vld [vmem:[%s8381_s1 + $0xc] sm:$0x3]  ;;  %vm6587_vm4 = vmor %vm234_vm1, %vm235_vm2  ;;  %v6593_v37 = vsel %vm720_vm0, %v5236_v5, 0  ;;  %vm1225_vm5 = vcmask 1042432  }
  0x1a   : > { %s6214_s8 = smul.u32 216, %s179_s30  ;;  %v6597_v41 = vsel %vm720_vm0, %v6580_v26, 0  ;;  %vm1226_vm6 = vcmask 1046532   ;;  %s175_s9 = sand.u32 1, %s6439_s13  }
  0x1b   : > { %vm6813_vm7 = vmor %vm1225_vm5, %vm1226_vm6  ;;  %s4942_s18 = sshll.u32 %s175_s9, 8  ;;  %s5486_s21 = sshll.u32 %s6447_s15, 12 }
  0x1c   : > { %s6561_s11 = scalar_lea.vmem %s8380_s0, %s6214_s8  ;;  %s8257_s19 = scalar_lea.vmem [#allocation2], %s4942_s18 }
  0x1d   : > { %v185_v6 = vld [vmem:[%s6561_s11] sm:$0xf]  ;;  %v186_v7 = vld [vmem:[%s6561_s11 + $0x4] sm:$0xf]  ;;  %v218_v8 = vld [vmem:[%s6561_s11 + $0x8] sm:$0x1]  ;;  %s8325_s28 = scalar_lea.hbm %s8383_s3, %s5486_s21 }
  0x1e   : > { %v238_v9 = vshrl.u32 %v185_v6, 16  ;;  %v241_v10 = vshll.u32 %v185_v6, 16  ;;  %v247_v11 = vshll.u32 %v186_v7, 16  ;;  %v251_v12 = vshrl.u32 %v186_v7, 16  ;;  %v5123_v13 = vld [vmem:[%s6561_s11 + $0xc] sm:$0xf] }
  0x1f   : > { %v257_v14 = vshll.u32 %v218_v8, 16  ;;  %v6568_v15 = vld [vmem:[%s6561_s11 + $0x10] sm:$0xf]  ;;  %v6571_v16 = vld [vmem:[%s6561_s11 + $0x14] sm:$0x1]  ;;  %v2042_v23 = vshrl.u32 %v5123_v13, 16 }
  0x20   : > { %v240_v18 = vrot.slane %v238_v9, 4  ;;  %v243_v19 = vrot.slane %v241_v10, 5  ;;  %v249_v20 = vrot.slane %v247_v11, 5  ;;  %v253_v21 = vrot.slane %v251_v12, 4  ;;  %v187_v31 = vld [vmem:[%s6561_s11 + $0xc] sm:$0xf] }
  0x21   : > { %v259_v22 = vrot.slane %v257_v14, 5  ;;  %v2045_v24 = vshll.u32 %v5123_v13, 16  ;;  %v2051_v25 = vshll.u32 %v6568_v15, 16  ;;  %v2055_v29 = vshrl.u32 %v6568_v15, 16  ;;  %v188_v36 = vld [vmem:[%s6561_s11 + $0x10] sm:$0xf] }
  0x22   : > { %v244_v27 = vor.u32 %v243_v19, %v240_v18  ;;  %v254_v28 = vor.u32 %v253_v21, %v249_v20  ;;  %v2061_v30 = vshll.u32 %v6571_v16, 16  ;;  %v2044_v33 = vrot.slane %v2042_v23, 4  ;;  %v219_v44 = vld [vmem:[%s6561_s11 + $0x14] sm:$0x1]  ;;  %v5126_v55 = vld [vmem:[%s6561_s11 + $0x18] sm:$0xf] }
  0x23   : > { %v2047_v34 = vrot.slane %v2045_v24, 5  ;;  %v2053_v35 = vrot.slane %v2051_v25, 5  ;;  %v2057_v40 = vrot.slane %v2055_v29, 4  ;;  %v262_v45 = vshrl.u32 %v187_v31, 16  ;;  %v6606_v60 = vld [vmem:[%s6561_s11 + $0x1c] sm:$0xf] }
  0x24   : > { %v245_v38 = vrot.slane %v244_v27, 4  ;;  %v255_v39 = vrot.slane %v254_v28, 4  ;;  %v2063_v43 = vrot.slane %v2061_v30, 5  ;;  %v265_v46 = vshll.u32 %v187_v31, 16  ;;  %v6614_v1 = vld [vmem:[%s6561_s11 + $0x20] sm:$0x1] }
  0x25   : > { %v2048_v42 = vor.u32 %v2047_v34, %v2044_v33  ;;  %v2058_v49 = vor.u32 %v2057_v40, %v2053_v35  ;;  %v271_v50 = vshll.u32 %v188_v36, 16  ;;  %v264_v53 = vrot.slane %v262_v45, 4  ;;  %v189_v18 = vld [vmem:[%s6561_s11 + $0x18] sm:$0xf]  ;;  %v190_v23 = vld [vmem:[%s6561_s11 + $0x1c] sm:$0xf] }
  0x26   : > { %v250_v47 = vsel %vm6587_vm4, %v245_v38, %v249_v20  ;;  %v260_v48 = vsel %vm6587_vm4, %v255_v39, %v259_v22  ;;  %v267_v54 = vrot.slane %v265_v46, 5  ;;  %v275_v58 = vshrl.u32 %v188_v36, 16  ;;  %v220_v31 = vld [vmem:[%s6561_s11 + $0x20] sm:$0x1]  ;;  %v5129_v40 = vld [vmem:[%s6561_s11 + $0x24] sm:$0xf] }
  0x27   : > { %v4945_v51 = vcombine.low %v250_v47, %v260_v48  ;;  %v2049_v52 = vrot.slane %v2048_v42, 4  ;;  %v2059_v56 = vrot.slane %v2058_v49, 4  ;;  %v273_v57 = vrot.slane %v271_v50, 5  ;;  %v6637_v46 = vld [vmem:[%s6561_s11 + $0x28] sm:$0xf]  ;;  %s4864_s23 = sshll.u32 %s8257_s19, 4  ;;  %s8327_s23 = int_to_ptr.vmem [resolvable:$true] %s4864_s23 }
  0x28   : > { %v281_v59 = vshll.u32 %v219_v44, 16  ;;  %v2785_v62 = vrot.slane %v6568_v15, 5  ;;  %v2788_v63 = vrot.slane %v6571_v16, 5  ;;  %v268_v0 = vor.u32 %v267_v54, %v264_v53  ;;  %v6646_v54 = vld [vmem:[%s6561_s11 + $0x2c] sm:$0x1]  ;;  %s8334_s15 = scalar_lea.sflag [#allocation3], %s175_s9 }
  0x29   : > { %5642 = vmatprep.mubr.msk.bf16.mxu1 %vm671_vm3, %v4945_v51  ;;  %v2054_v61 = vsel %vm6587_vm4, %v2049_v52, %v2053_v35  ;;  %v2064_v2 = vsel %vm6587_vm4, %v2059_v56, %v2063_v43  ;;  %v277_v4 = vrot.slane %v275_v58, 4  ;;  %v2066_v6 = vshrl.u32 %v5126_v55, 16  ;;  %v5025_v51 = vld [vmem:[%s8381_s1 + $0x4] sm:$0x3]  ;;  %v6846_v16 = vld [vmem:[%s6561_s11 + $0x7c] sm:$0xf] }
  0x2a   : > { %v283_v5 = vrot.slane %v281_v59, 5  ;;  %v5172_v7 = vcombine.low %v2054_v61, %v2064_v2  ;;  %v269_v8 = vrot.slane %v268_v0, 4  ;;  %v2069_v9 = vshll.u32 %v5126_v55, 16  ;;  %v191_v0 = vld [vmem:[%s6561_s11 + $0x24] sm:$0xf]  ;;  %s6377_s29 = scalar_lea.vmem %s8327_s23, 4096 }
  0x2b   : > { %v2075_v10 = vshll.u32 %v6606_v60, 16  ;;  %v278_v11 = vor.u32 %v277_v4, %v273_v57  ;;  %v2068_v12 = vrot.slane %v2066_v6, 4  ;;  %v2079_v13 = vshrl.u32 %v6606_v60, 16  ;;  %p6378_p12 = scmp.ne.s32.totalorder %s8327_s23, %s6377_s29  ;;  %s6457_s30 = smov [#allocation2]  }
  0x2c   : > { %v2085_v14 = vshll.u32 %v6614_v1, 16  ;;  %5778 = vmatprep.mubr.msk.bf16.mxu0 %vm671_vm3, %v5172_v7  ;;  %v274_v19 = vsel %vm6587_vm4, %v269_v8, %v273_v57  ;;  %v2071_v20 = vrot.slane %v2069_v9, 5  ;;  %v2792_v22 = vrot.slane %v6606_v60, 5  ;;  %v192_v7 = vld [vmem:[%s6561_s11 + $0x28] sm:$0xf]  ;;  %s6381_s4 = sshll.u32 %s6457_s30, 4  ;;  %s6382_s4 = int_to_ptr.vmem [resolvable:$false] %s6381_s4 }
  0x2d   : > { %v2077_v21 = vrot.slane %v2075_v10, 5  ;;  %v279_v24 = vrot.slane %v278_v11, 4  ;;  %v2081_v25 = vrot.slane %v2079_v13, 4  ;;  %v2795_v28 = vrot.slane %v6614_v1, 5  ;;  %v221_v13 = vld [vmem:[%s6561_s11 + $0x2c] sm:$0x1]  ;;  %p6379_p13 = pnand %p6378_p12, %p6520_p4  ;;  %p6384_p1 = scmp.lt.s32.totalorder %s8327_s23, %s6382_s4 }
  0x2e   : > { %v2087_v27 = vrot.slane %v2085_v14, 5  ;;  %v2072_v29 = vor.u32 %v2071_v20, %v2068_v12  ;;  %v6630_v30 = vrot.slane %v2792_v22, 4  ;;  %v286_v33 = vshrl.u32 %v189_v18, 16  ;;  %s6383_s5 = scalar_lea.vmem %s6382_s4, 8192 }
  0x2f   : > { %v289_v34 = vshll.u32 %v189_v18, 16  ;;  %v284_v35 = vsel %vm6587_vm4, %v279_v24, %v283_v5  ;;  %v2082_v36 = vor.u32 %v2081_v25, %v2077_v21  ;;  %v295_v38 = vshll.u32 %v190_v23, 16  ;;  %v5132_v24 = vld [vmem:[%s6561_s11 + $0x30] sm:$0xf]  ;;  %p6380_p0 = pneg %p6379_p13  ;;  %p6385_p2 = scmp.lt.s32.totalorder %s6383_s5, %s6377_s29 }
  0x30   : > { %v299_v39 = vshrl.u32 %v190_v23, 16  ;;  %v4946_v42 = vcombine.low %v274_v19, %v284_v35  ;;  %v2073_v43 = vrot.slane %v2072_v29, 4  ;;  %v288_v44 = vrot.slane %v286_v33, 4  ;;  %v6666_v33 = vld [vmem:[%s6561_s11 + $0x34] sm:$0xf] }
  0x31   : > { %v291_v45 = vrot.slane %v289_v34, 5  ;;  %v2083_v47 = vrot.slane %v2082_v36, 4  ;;  %v297_v48 = vrot.slane %v295_v38, 5  ;;  %v305_v50 = vshll.u32 %v220_v31, 16  ;;  %p6386_p3 = por %p6385_p2, %p6384_p1 }
  0x32   : > { %v301_v49 = vrot.slane %v299_v39, 4  ;;  %5643 = vmatmul.mubr.msk.bf16.vlgmr.msra.gmra.mrb[0].mxu1 %vm671_vm3, %v4946_v42  ;;  %v2078_v52 = vsel %vm6587_vm4, %v2073_v43, %v2077_v21  ;;  %v2090_v55 = vshrl.u32 %v5129_v40, 16  ;;  %v2093_v56 = vshll.u32 %v5129_v40, 16  ;;  %v6674_v40 = vld [vmem:[%s6561_s11 + $0x38] sm:$0x1] }
  0x33   : > { %v292_v53 = vor.u32 %v291_v45, %v288_v44  ;;  %5675 = vmatpush3.bf16.msra.mxu1 %v6574_v17  ;;  %v2088_v57 = vsel %vm6587_vm4, %v2083_v47, %v2087_v27  ;;  %v307_v59 = vrot.slane %v305_v50, 5  ;;  %v2099_v61 = vshll.u32 %v6637_v46, 16  ;;  %p6387_p5 = pnand %p6386_p3, %p6380_p0 }
  0x34   : > { %v302_v58 = vor.u32 %v301_v49, %v297_v48  ;;  %v5173_v2 = vcombine.low %v2078_v52, %v2088_v57  ;;  %v2092_v5 = vrot.slane %v2090_v55, 4  ;;  %v2095_v6 = vrot.slane %v2093_v56, 5  ;;  %6206 = vmatprep.subr.msk.bf16.mxu1 %vm720_vm0, %v5025_v51  ;;  %v193_v52 = vld [vmem:[%s6561_s11 + $0x30] sm:$0xf] }
  0x35   : > { %v293_v4 = vrot.slane %v292_v53, 4  ;;  %v2101_v9 = vrot.slane %v2099_v61, 5  ;;  %v2103_v17 = vshrl.u32 %v6637_v46, 16  ;;  %v2109_v10 = vshll.u32 %v6646_v54, 16 }
  0x36   : > { %v303_v8 = vrot.slane %v302_v58, 4  ;;  %5779 = vmatmul.mubr.msk.bf16.vlgmr.msra.gmra.mrb[0].mxu0 %vm671_vm3, %v5173_v2  ;;  %v2096_v12 = vor.u32 %v2095_v6, %v2092_v5  ;;  %v310_v14 = vshrl.u32 %v191_v0, 16  ;;  %v313_v18 = vshll.u32 %v191_v0, 16  ;;  %v194_v58 = vld [vmem:[%s6561_s11 + $0x34] sm:$0xf] }
  0x37   : > { %v298_v11 = vsel %vm6587_vm4, %v293_v4, %v297_v48  ;;  %5811 = vmatpush3.bf16.msra.mxu0 %v6593_v37  ;;  %v2105_v20 = vrot.slane %v2103_v17, 4  ;;  %v2111_v21 = vrot.slane %v2109_v10, 5  ;;  %v319_v23 = vshll.u32 %v192_v7, 16  ;;  %v222_v4 = vld [vmem:[%s6561_s11 + $0x38] sm:$0x1] }
  0x38   : > { %v308_v19 = vsel %vm6587_vm4, %v303_v8, %v307_v59  ;;  %v2097_v27 = vrot.slane %v2096_v12, 4  ;;  %v312_v29 = vrot.slane %v310_v14, 4  ;;  %v315_v31 = vrot.slane %v313_v18, 5  ;;  %6211 = vmatprep.subr.msk.bf16.mxu0 %vm720_vm0, %v6580_v26  ;;  %v5135_v12 = vld [vmem:[%s6561_s11 + $0x3c] sm:$0xf] }
  0x39   : > { %v4947_v25 = vcombine.low %v298_v11, %v308_v19  ;;  %v2106_v34 = vor.u32 %v2105_v20, %v2101_v9  ;;  %v321_v35 = vrot.slane %v319_v23, 5  ;;  %v323_v37 = vshrl.u32 %v192_v7, 16  ;;  %v6691_v20 = vld [vmem:[%s6561_s11 + $0x40] sm:$0xf] }
  0x3a   : > { %v329_v36 = vshll.u32 %v221_v13, 16  ;;  %v2102_v38 = vsel %vm6587_vm4, %v2097_v27, %v2101_v9  ;;  %v316_v39 = vor.u32 %v315_v31, %v312_v29  ;;  %v2114_v42 = vshrl.u32 %v5132_v24, 16 }
  0x3b   : > { %5646 = vmatprep.mubr.msk.bf16.mxu1 %vm671_vm3, %v4947_v25  ;;  %v2117_v43 = vshll.u32 %v5132_v24, 16  ;;  %v2107_v44 = vrot.slane %v2106_v34, 4  ;;  %v325_v45 = vrot.slane %v323_v37, 4  ;;  %v2123_v26 = vshll.u32 %v6666_v33, 16  ;;  %v6696_v34 = vld [vmem:[%s6561_s11 + $0x44] sm:$0x1] }
  0x3c   : > { %v331_v47 = vrot.slane %v329_v36, 5  ;;  %v317_v48 = vrot.slane %v316_v39, 4  ;;  %v2116_v49 = vrot.slane %v2114_v42, 4  ;;  %v2127_v51 = vshrl.u32 %v6666_v33, 16  ;;  %v195_v42 = vld [vmem:[%s6561_s11 + $0x3c] sm:$0xf] }
  0x3d   : > { %v2119_v50 = vrot.slane %v2117_v43, 5  ;;  %v2112_v53 = vsel %vm6587_vm4, %v2107_v44, %v2111_v21  ;;  %v326_v55 = vor.u32 %v325_v45, %v321_v35  ;;  %v2125_v56 = vrot.slane %v2123_v26, 5  ;;  %v196_v26 = vld [vmem:[%s6561_s11 + $0x40] sm:$0xf] }
  0x3e   : > { %v2133_v57 = vshll.u32 %v6674_v40, 16  ;;  %v5174_v59 = vcombine.low %v2102_v38, %v2112_v53  ;;  %v322_v61 = vsel %vm6587_vm4, %v317_v48, %v321_v35  ;;  %v2129_v2 = vrot.slane %v2127_v51, 4 }
  0x3f   : > { %v2120_v0 = vor.u32 %v2119_v50, %v2116_v49  ;;  %v327_v5 = vrot.slane %v326_v55, 4  ;;  %v334_v7 = vshrl.u32 %v193_v52, 16  ;;  %v337_v8 = vshll.u32 %v193_v52, 16 }
  0x40   : > { %v2135_v6 = vrot.slane %v2133_v57, 5  ;;  %5782 = vmatprep.mubr.msk.bf16.mxu0 %vm671_vm3, %v5174_v59  ;;  %v2130_v17 = vor.u32 %v2129_v2, %v2125_v56  ;;  %v343_v10 = vshll.u32 %v194_v58, 16  ;;  %v347_v11 = vshrl.u32 %v194_v58, 16  ;;  %v5138_v2 = vld [vmem:[%s6561_s11 + $0x48] sm:$0xf] }
  0x41   : > { %v2121_v9 = vrot.slane %v2120_v0, 4  ;;  %v332_v13 = vsel %vm6587_vm4, %v327_v5, %v331_v47  ;;  %v336_v14 = vrot.slane %v334_v7, 4  ;;  %v339_v18 = vrot.slane %v337_v8, 5  ;;  %v6714_v8 = vld [vmem:[%s6561_s11 + $0x4c] sm:$0xf] }
  0x42   : > { %v353_v19 = vshll.u32 %v222_v4, 16  ;;  %v4948_v21 = vcombine.low %v322_v61, %v332_v13  ;;  %v2131_v24 = vrot.slane %v2130_v17, 4  ;;  %v345_v25 = vrot.slane %v343_v10, 5  ;;  %v223_v61 = vld [vmem:[%s6561_s11 + $0x44] sm:$0x1] }
  0x43   : > { %v2126_v23 = vsel %vm6587_vm4, %v2121_v9, %v2125_v56  ;;  %v340_v27 = vor.u32 %v339_v18, %v336_v14  ;;  %v349_v29 = vrot.slane %v347_v11, 4  ;;  %v2138_v35 = vshrl.u32 %v5135_v12, 16 }
  0x44   : > { %v355_v31 = vrot.slane %v353_v19, 5  ;;  %5647 = vmatmul.mubr.msk.bf16.gmra.mrb[4].mxu1 %vm671_vm3, %v4948_v21  ;;  %v2136_v37 = vsel %vm6587_vm4, %v2131_v24, %v2135_v6  ;;  %v2141_v36 = vshll.u32 %v5135_v12, 16  ;;  %v2147_v38 = vshll.u32 %v6691_v20, 16 }
  0x45   : > { %v2151_v39 = vshrl.u32 %v6691_v20, 16  ;;  %v5175_v43 = vcombine.low %v2126_v23, %v2136_v37  ;;  %v341_v44 = vrot.slane %v340_v27, 4  ;;  %v350_v45 = vor.u32 %v349_v29, %v345_v25  ;;  %v6722_v23 = vld [vmem:[%s6561_s11 + $0x50] sm:$0x1]  ;;  %v6726_v27 = vld [vmem:[%s6561_s11 + $0x48] sm:$0xf] }
  0x46   : > { %v2140_v47 = vrot.slane %v2138_v35, 4  ;;  %v2143_v48 = vrot.slane %v2141_v36, 5  ;;  %v2149_v49 = vrot.slane %v2147_v38, 5  ;;  %v2157_v51 = vshll.u32 %v6696_v34, 16  ;;  %v6729_v36 = vld [vmem:[%s6561_s11 + $0x4c] sm:$0xf] }
  0x47   : > { %v2153_v50 = vrot.slane %v2151_v39, 4  ;;  %5783 = vmatmul.mubr.msk.bf16.gmra.mrb[4].mxu0 %vm671_vm3, %v5175_v43  ;;  %v346_v52 = vsel %vm6587_vm4, %v341_v44, %v345_v25  ;;  %v351_v53 = vrot.slane %v350_v45, 4  ;;  %v358_v55 = vshrl.u32 %v195_v42, 16 }
  0x48   : > { %v361_v56 = vshll.u32 %v195_v42, 16  ;;  %v2144_v57 = vor.u32 %v2143_v48, %v2140_v47  ;;  %v2159_v59 = vrot.slane %v2157_v51, 5  ;;  %v367_v0 = vshll.u32 %v196_v26, 16 }
  0x49   : > { %v2154_v58 = vor.u32 %v2153_v50, %v2149_v49  ;;  %v356_v4 = vsel %vm6587_vm4, %v351_v53, %v355_v31  ;;  %v360_v5 = vrot.slane %v358_v55, 4  ;;  %v371_v7 = vshrl.u32 %v196_v26, 16  ;;  %v224_v26 = vld [vmem:[%s6561_s11 + $0x50] sm:$0x1]  ;;  %v5141_v53 = vld [vmem:[%s6561_s11 + $0x54] sm:$0xf] }
  0x4a   : > { %v363_v6 = vrot.slane %v361_v56, 5  ;;  %v4949_v9 = vcombine.low %v346_v52, %v356_v4  ;;  %v2145_v17 = vrot.slane %v2144_v57, 4  ;;  %v369_v11 = vrot.slane %v367_v0, 5  ;;  %v6745_v4 = vld [vmem:[%s6561_s11 + $0x58] sm:$0xf] }
  0x4b   : > { %v2155_v10 = vrot.slane %v2154_v58, 4  ;;  %v373_v13 = vrot.slane %v371_v7, 4  ;;  %v377_v14 = vshll.u32 %v223_v61, 16  ;;  %v2162_v18 = vshrl.u32 %v5138_v2, 16 }
  0x4c   : > { %v364_v12 = vor.u32 %v363_v6, %v360_v5  ;;  %5650 = vmatprep.mubr.msk.bf16.mxu1 %vm671_vm3, %v4949_v9  ;;  %v2150_v19 = vsel %vm6587_vm4, %v2145_v17, %v2149_v49  ;;  %v2165_v24 = vshll.u32 %v5138_v2, 16  ;;  %v2171_v25 = vshll.u32 %v6714_v8, 16 }
  0x4d   : > { %v2160_v21 = vsel %vm6587_vm4, %v2155_v10, %v2159_v59  ;;  %v374_v35 = vor.u32 %v373_v13, %v369_v11  ;;  %v379_v37 = vrot.slane %v377_v14, 5  ;;  %v2164_v38 = vrot.slane %v2162_v18, 4 }
  0x4e   : > { %v5176_v29 = vcombine.low %v2150_v19, %v2160_v21  ;;  %v365_v31 = vrot.slane %v364_v12, 4  ;;  %v2167_v39 = vrot.slane %v2165_v24, 5  ;;  %v2173_v42 = vrot.slane %v2171_v25, 5  ;;  %v6751_v12 = vld [vmem:[%s6561_s11 + $0x5c] sm:$0x1] }
  0x4f   : > { %v2175_v43 = vshrl.u32 %v6714_v8, 16  ;;  %v375_v45 = vrot.slane %v374_v35, 4  ;;  %v2181_v47 = vshll.u32 %v6722_v23, 16  ;;  %v382_v48 = vshrl.u32 %v6726_v27, 16  ;;  %v6755_v24 = vld [vmem:[%s6561_s11 + $0x54] sm:$0xf] }
  0x50   : > { %5786 = vmatprep.mubr.msk.bf16.mxu0 %vm671_vm3, %v5176_v29  ;;  %v370_v44 = vsel %vm6587_vm4, %v365_v31, %v369_v11  ;;  %v2168_v49 = vor.u32 %v2167_v39, %v2164_v38  ;;  %v385_v51 = vshll.u32 %v6726_v27, 16  ;;  %v391_v52 = vshll.u32 %v6729_v36, 16 }
  0x51   : > { %v2177_v50 = vrot.slane %v2175_v43, 4  ;;  %v380_v55 = vsel %vm6587_vm4, %v375_v45, %v379_v37  ;;  %v2183_v56 = vrot.slane %v2181_v47, 5  ;;  %v384_v57 = vrot.slane %v382_v48, 4  ;;  %v6761_v37 = vld [vmem:[%s6561_s11 + $0x58] sm:$0xf] }
  0x52   : > { %v395_v58 = vshrl.u32 %v6729_v36, 16  ;;  %v4950_v59 = vcombine.low %v370_v44, %v380_v55  ;;  %v2169_v61 = vrot.slane %v2168_v49, 4  ;;  %v387_v2 = vrot.slane %v385_v51, 5 }
  0x53   : > { %v2178_v0 = vor.u32 %v2177_v50, %v2173_v42  ;;  %v393_v5 = vrot.slane %v391_v52, 5  ;;  %v401_v7 = vshll.u32 %v224_v26, 16  ;;  %v2186_v9 = vshrl.u32 %v5141_v53, 16  ;;  %v225_v26 = vld [vmem:[%s6561_s11 + $0x5c] sm:$0x1] }
  0x54   : > { %v397_v6 = vrot.slane %v395_v58, 4  ;;  %5651 = vmatmul.mubr.msk.bf16.gmra.mrb[8].mxu1 %vm671_vm3, %v4950_v59  ;;  %v2174_v17 = vsel %vm6587_vm4, %v2169_v61, %v2173_v42  ;;  %v388_v11 = vor.u32 %v387_v2, %v384_v57  ;;  %v2189_v13 = vshll.u32 %v5141_v53, 16  ;;  %v5144_v53 = vld [vmem:[%s6561_s11 + $0x60] sm:$0xf]  ;;  %v6775_v59 = vld [vmem:[%s6561_s11 + $0x64] sm:$0xf] }
  0x55   : > { %v2179_v10 = vrot.slane %v2178_v0, 4  ;;  %v403_v18 = vrot.slane %v401_v7, 5  ;;  %v2188_v19 = vrot.slane %v2186_v9, 4  ;;  %v2195_v21 = vshll.u32 %v6745_v4, 16  ;;  %v6782_v9 = vld [vmem:[%s6561_s11 + $0x68] sm:$0x1] }
  0x56   : > { %v398_v14 = vor.u32 %v397_v6, %v393_v5  ;;  %v389_v29 = vrot.slane %v388_v11, 4  ;;  %v2191_v31 = vrot.slane %v2189_v13, 5  ;;  %v2199_v35 = vshrl.u32 %v6745_v4, 16 }
  0x57   : > { %v2184_v25 = vsel %vm6587_vm4, %v2179_v10, %v2183_v56  ;;  %v2197_v42 = vrot.slane %v2195_v21, 5  ;;  %v2205_v43 = vshll.u32 %v6751_v12, 16  ;;  %v406_v48 = vshrl.u32 %v6755_v24, 16 }
  0x58   : > { %v5177_v38 = vcombine.low %v2174_v17, %v2184_v25  ;;  %v399_v39 = vrot.slane %v398_v14, 4  ;;  %v394_v44 = vsel %vm6587_vm4, %v389_v29, %v393_v5  ;;  %v2192_v45 = vor.u32 %v2191_v31, %v2188_v19  ;;  %v6786_v19 = vld [vmem:[%s6561_s11 + $0x60] sm:$0xf] }
  0x59   : > { %v2201_v47 = vrot.slane %v2199_v35, 4  ;;  %v2207_v50 = vrot.slane %v2205_v43, 5  ;;  %v409_v51 = vshll.u32 %v6755_v24, 16  ;;  %v415_v52 = vshll.u32 %v6761_v37, 16  ;;  %v6792_v35 = vld [vmem:[%s6561_s11 + $0x64] sm:$0xf] }
  0x5a   : > { %5787 = vmatmul.mubr.msk.bf16.gmra.mrb[8].mxu0 %vm671_vm3, %v5177_v38  ;;  %v404_v49 = vsel %vm6587_vm4, %v399_v39, %v403_v18  ;;  %v2193_v56 = vrot.slane %v2192_v45, 4  ;;  %v408_v58 = vrot.slane %v406_v48, 4  ;;  %v419_v2 = vshrl.u32 %v6761_v37, 16 }
  0x5b   : > { %v4951_v55 = vcombine.low %v394_v44, %v404_v49  ;;  %v2202_v57 = vor.u32 %v2201_v47, %v2197_v42  ;;  %v411_v61 = vrot.slane %v409_v51, 5  ;;  %v417_v0 = vrot.slane %v415_v52, 5 }
  0x5c   : > { %v425_v5 = vshll.u32 %v225_v26, 16  ;;  %v2198_v6 = vsel %vm6587_vm4, %v2193_v56, %v2197_v42  ;;  %v2210_v17 = vshrl.u32 %v5144_v53, 16  ;;  %v2213_v10 = vshll.u32 %v5144_v53, 16 }
  0x5d   : > { %5654 = vmatprep.mubr.msk.bf16.mxu1 %vm671_vm3, %v4951_v55  ;;  %v2203_v7 = vrot.slane %v2202_v57, 4  ;;  %v412_v11 = vor.u32 %v411_v61, %v408_v58  ;;  %v421_v13 = vrot.slane %v419_v2, 4  ;;  %v2219_v18 = vshll.u32 %v6775_v59, 16  ;;  %v5204_v58 = vld [vmem:[%s6561_s11 + $0xc] sm:$0xe] }
  0x5e   : > { %v427_v14 = vrot.slane %v425_v5, 5  ;;  %v2212_v25 = vrot.slane %v2210_v17, 4  ;;  %v2215_v29 = vrot.slane %v2213_v10, 5  ;;  %v2223_v31 = vshrl.u32 %v6775_v59, 16 }
  0x5f   : > { %v2208_v21 = vsel %vm6587_vm4, %v2203_v7, %v2207_v50  ;;  %v413_v39 = vrot.slane %v412_v11, 4  ;;  %v422_v42 = vor.u32 %v421_v13, %v417_v0  ;;  %v2221_v43 = vrot.slane %v2219_v18, 5  ;;  %v226_v50 = vld [vmem:[%s6561_s11 + $0x68] sm:$0x1] }
  0x60   : > { %v5178_v38 = vcombine.low %v2198_v6, %v2208_v21  ;;  %v2216_v44 = vor.u32 %v2215_v29, %v2212_v25  ;;  %v2225_v45 = vrot.slane %v2223_v31, 4  ;;  %v2229_v47 = vshll.u32 %v6782_v9, 16  ;;  %v6820_v29 = vld [vmem:[%s6561_s11 + $0x70] sm:$0xf] }
  0x61   : > { %v430_v26 = vshrl.u32 %v6786_v19, 16  ;;  %v418_v48 = vsel %vm6587_vm4, %v413_v39, %v417_v0  ;;  %v423_v49 = vrot.slane %v422_v42, 4  ;;  %v433_v51 = vshll.u32 %v6786_v19, 16  ;;  %v6807_v0 = vld [vmem:[%s6561_s11 + $0x6c] sm:$0xf] }
  0x62   : > { %5790 = vmatprep.mubr.msk.bf16.mxu0 %vm671_vm3, %v5178_v38  ;;  %v439_v52 = vshll.u32 %v6792_v35, 16  ;;  %v2217_v53 = vrot.slane %v2216_v44, 4  ;;  %v2226_v55 = vor.u32 %v2225_v45, %v2221_v43  ;;  %v2231_v56 = vrot.slane %v2229_v47, 5 }
  0x63   : > { %v432_v57 = vrot.slane %v430_v26, 4  ;;  %v428_v61 = vsel %vm6587_vm4, %v423_v49, %v427_v14  ;;  %v435_v2 = vrot.slane %v433_v51, 5  ;;  %v443_v6 = vshrl.u32 %v6792_v35, 16  ;;  %v227_v26 = vld [vmem:[%s6561_s11 + $0x74] sm:$0x1] }
  0x64   : > { %v441_v5 = vrot.slane %v439_v52, 5  ;;  %v4952_v7 = vcombine.low %v418_v48, %v428_v61  ;;  %v2222_v17 = vsel %vm6587_vm4, %v2217_v53, %v2221_v43  ;;  %v2227_v10 = vrot.slane %v2226_v55, 4  ;;  %v5205_v48 = vld [vmem:[%s6561_s11 + $0x18] sm:$0xe] }
  0x65   : > { %v449_v11 = vshll.u32 %v226_v50, 16  ;;  %v436_v14 = vor.u32 %v435_v2, %v432_v57  ;;  %v445_v18 = vrot.slane %v443_v6, 4  ;;  %v5220_v21 = vrot.slane %v5204_v58, 9  ;;  %v6839_v53 = vld [vmem:[%s6561_s11 + $0x78] sm:$0xf] }
  0x66   : > { %v2787_v25 = vrot.slane %v2785_v62, 4  ;;  %5655 = vmatmul.mubr.msk.bf16.gmra.mrb[12].mxu1 %vm671_vm3, %v4952_v7  ;;  %v2232_v31 = vsel %vm6587_vm4, %v2227_v10, %v2231_v56  ;;  %v454_v39 = vshrl.u32 %v6807_v0, 16  ;;  %v457_v42 = vshll.u32 %v6807_v0, 16  ;;  %v228_v57 = vld [vmem:[%s6561_s11 + $0x80] sm:$0x1] }
  0x67   : > { %v451_v38 = vrot.slane %v449_v11, 5  ;;  %v5179_v43 = vcombine.low %v2222_v17, %v2232_v31  ;;  %v437_v44 = vrot.slane %v436_v14, 4  ;;  %v446_v45 = vor.u32 %v445_v18, %v441_v5  ;;  %v5206_v10 = vld [vmem:[%s6561_s11 + $0x24] sm:$0xe] }
  0x68   : > { %v2786_v47 = vsel %vm6813_vm7, %v5220_v21, %v2785_v62  ;;  %v2789_v49 = vsel %vm6813_vm7, %v2787_v25, %v2788_v63  ;;  %v456_v50 = vrot.slane %v454_v39, 4  ;;  %v459_v51 = vrot.slane %v457_v42, 5  ;;  %v6865_v39 = vld [vmem:[%s6561_s11 + $0x84] sm:$0xf] }
  0x69   : > { %v463_v52 = vshll.u32 %v6820_v29, 16  ;;  %5791 = vmatmul.mubr.msk.bf16.gmra.mrb[12].mxu0 %vm671_vm3, %v5179_v43  ;;  %v442_v15 = vsel %vm6587_vm4, %v437_v44, %v441_v5  ;;  %v447_v62 = vrot.slane %v446_v45, 4  ;;  %v5237_v55 = vcombine.low %v2786_v47, %v2789_v49  ;;  %v6873_v43 = vld [vmem:[%s6561_s11 + $0x88] sm:$0xf] }
  0x6a   : > { %v467_v56 = vshrl.u32 %v6820_v29, 16  ;;  %v460_v63 = vor.u32 %v459_v51, %v456_v50  ;;  %v473_v61 = vshll.u32 %v227_v26, 16  ;;  %v5221_v2 = vrot.slane %v5205_v48, 9 }
  0x6b   : > { %v465_v58 = vrot.slane %v463_v52, 5  ;;  %v452_v6 = vsel %vm6587_vm4, %v447_v62, %v451_v38  ;;  %5812 = vmatprep.mubr.msk.bf16.mxu0 %vm671_vm3, %v5237_v55  ;;  %v2796_v5 = vsel %vm6813_vm7, %v6630_v30, %v2795_v28  ;;  %v478_v17 = vshrl.u32 %v6839_v53, 16  ;;  %v229_v52 = vld [vmem:[%s6561_s11 + $0x8c] sm:$0x1] }
  0x6c   : > { %v469_v7 = vrot.slane %v467_v56, 4  ;;  %v4953_v11 = vcombine.low %v442_v15, %v452_v6  ;;  %v461_v14 = vrot.slane %v460_v63, 4  ;;  %v475_v18 = vrot.slane %v473_v61, 5 }
  0x6d   : > { %v2793_v21 = vsel %vm6813_vm7, %v5221_v2, %v2792_v22  ;;  %v480_v38 = vrot.slane %v478_v17, 4  ;;  %v481_v1 = vshll.u32 %v6839_v53, 16  ;;  %v487_v30 = vshll.u32 %v6846_v16, 16  ;;  %v6878_v22 = vld [vmem:[%s8381_s1 + $0xe] sm:$0x3] }
  0x6e   : > { %v470_v25 = vor.u32 %v469_v7, %v465_v58  ;;  %v5238_v31 = vcombine.low %v2793_v21, %v2796_v5  ;;  %5658 = vmatprep.mubr.msk.bf16.mxu1 %vm671_vm3, %v4953_v11  ;;  %v466_v28 = vsel %vm6587_vm4, %v461_v14, %v465_v58  ;;  %v491_v60 = vshrl.u32 %v6846_v16, 16  ;;  %v6897_v5 = vld [vmem:[%s6561_s11 + $0x90] sm:$0xf] }
  0x6f   : > { %v497_v42 = vshll.u32 %v228_v57, 16  ;;  %v483_v45 = vrot.slane %v481_v1, 5  ;;  %v5222_v47 = vrot.slane %v5206_v10, 9  ;;  %v2799_v26 = vrot.slane %v6637_v46, 5  ;;  %v5207_v57 = vld [vmem:[%s6561_s11 + $0x30] sm:$0xe] }
  0x70   : > { %v471_v44 = vrot.slane %v470_v25, 4  ;;  %v489_v48 = vrot.slane %v487_v30, 5  ;;  %v493_v49 = vrot.slane %v491_v60, 4  ;;  %v2802_v51 = vrot.slane %v6646_v54, 5  ;;  %v6909_v30 = vld [vmem:[%s6561_s11 + $0x94] sm:$0xf] }
  0x71   : > { %v499_v50 = vrot.slane %v497_v42, 5  ;;  %5813 = vmatmul.mubr.msk.bf16.vlgmr.msra.gmra.mrb[0].mxu0 %vm671_vm3, %v5238_v31  ;;  %v484_v62 = vor.u32 %v483_v45, %v480_v38  ;;  %v2800_v55 = vsel %vm6813_vm7, %v5222_v47, %v2799_v26  ;;  %v2801_v56 = vrot.slane %v2799_v26, 4  ;;  %v230_v60 = vld [vmem:[%s6561_s11 + $0x98] sm:$0x1]  ;;  %v5208_v26 = vld [vmem:[%s6561_s11 + $0x3c] sm:$0xe] }
  0x72   : > { %v476_v15 = vsel %vm6587_vm4, %v471_v44, %v475_v18  ;;  %5845 = vmatpush3.bf16.msra.mxu0 %v6597_v41  ;;  %v494_v46 = vor.u32 %v493_v49, %v489_v48  ;;  %v502_v58 = vshrl.u32 %v6865_v39, 16  ;;  %v505_v54 = vshll.u32 %v6865_v39, 16 }
  0x73   : > { %v4954_v63 = vcombine.low %v466_v28, %v476_v15  ;;  %v485_v61 = vrot.slane %v484_v62, 4  ;;  %v2803_v2 = vsel %vm6813_vm7, %v2801_v56, %v2802_v51  ;;  %v511_v6 = vshll.u32 %v6873_v43, 16  ;;  %6212 = vmatprep.subr.msk.bf16.mxu0 %vm720_vm0, %v6878_v22 }
  0x74   : > { %v515_v7 = vshrl.u32 %v6873_v43, 16  ;;  %v495_v41 = vrot.slane %v494_v46, 4  ;;  %v5239_v17 = vcombine.low %v2800_v55, %v2803_v2  ;;  %v504_v10 = vrot.slane %v502_v58, 4  ;;  %v6929_v46 = vld [vmem:[%s6561_s11 + $0xa0] sm:$0xf] }
  0x75   : > { %5659 = vmatmul.mubr.msk.bf16.gmra.mrb[16].mxu1 %vm671_vm3, %v4954_v63  ;;  %v507_v11 = vrot.slane %v505_v54, 5  ;;  %v490_v14 = vsel %vm6587_vm4, %v485_v61, %v489_v48  ;;  %v513_v18 = vrot.slane %v511_v6, 5  ;;  %v521_v25 = vshll.u32 %v229_v52, 16  ;;  %v6918_v52 = vld [vmem:[%s6561_s11 + $0x9c] sm:$0xf] }
  0x76   : > { %v517_v21 = vrot.slane %v515_v7, 4  ;;  %v500_v31 = vsel %vm6587_vm4, %v495_v41, %v499_v50  ;;  %5816 = vmatprep.mubr.msk.bf16.mxu0 %vm671_vm3, %v5239_v17  ;;  %v5223_v1 = vrot.slane %v5207_v57, 9  ;;  %v2806_v28 = vrot.slane %v6666_v33, 5 }
  0x77   : > { %v508_v38 = vor.u32 %v507_v11, %v504_v10  ;;  %v4955_v42 = vcombine.low %v490_v14, %v500_v31  ;;  %v523_v45 = vrot.slane %v521_v25, 5  ;;  %v2809_v47 = vrot.slane %v6674_v40, 5  ;;  %v231_v10 = vld [vmem:[%s6561_s11 + $0xa4] sm:$0x1]  ;;  %v5209_v11 = vld [vmem:[%s6561_s11 + $0x48] sm:$0xe] }
  0x78   : > { %v518_v44 = vor.u32 %v517_v21, %v513_v18  ;;  %v2807_v49 = vsel %vm6813_vm7, %v5223_v1, %v2806_v28  ;;  %v2808_v50 = vrot.slane %v2806_v28, 4  ;;  %v526_v51 = vshrl.u32 %v6897_v5, 16 }
  0x79   : > { %v509_v48 = vrot.slane %v508_v38, 4  ;;  %5662 = vmatprep.mubr.msk.bf16.mxu1 %vm671_vm3, %v4955_v42  ;;  %v529_v15 = vshll.u32 %v6897_v5, 16  ;;  %v535_v62 = vshll.u32 %v6909_v30, 16  ;;  %v539_v40 = vshrl.u32 %v6909_v30, 16 }
  0x7a   : > { %v519_v33 = vrot.slane %v518_v44, 4  ;;  %v2810_v56 = vsel %vm6813_vm7, %v2808_v50, %v2809_v47  ;;  %v528_v57 = vrot.slane %v526_v51, 4  ;;  %v545_v63 = vshll.u32 %v230_v60, 16 }
  0x7b   : > { %v514_v55 = vsel %vm6587_vm4, %v509_v48, %v513_v18  ;;  %v5240_v54 = vcombine.low %v2807_v49, %v2810_v56  ;;  %v531_v61 = vrot.slane %v529_v15, 5  ;;  %v537_v2 = vrot.slane %v535_v62, 5  ;;  %v6955_v56 = vld [vmem:[%s6561_s11 + $0xac] sm:$0xf] }
  0x7c   : > { %v524_v58 = vsel %vm6587_vm4, %v519_v33, %v523_v45  ;;  %v541_v7 = vrot.slane %v539_v40, 4  ;;  %v547_v41 = vrot.slane %v545_v63, 5  ;;  %v5224_v17 = vrot.slane %v5208_v26, 9  ;;  %v6950_v33 = vld [vmem:[%s6561_s11 + $0xa8] sm:$0xf] }
  0x7d   : > { %v4956_v6 = vcombine.low %v514_v55, %v524_v58  ;;  %5817 = vmatmul.mubr.msk.bf16.gmra.mrb[4].mxu0 %vm671_vm3, %v5240_v54  ;;  %v532_v14 = vor.u32 %v531_v61, %v528_v57  ;;  %v2813_v18 = vrot.slane %v6691_v20, 5  ;;  %v2816_v21 = vrot.slane %v6696_v34, 5  ;;  %v232_v61 = vld [vmem:[%s6561_s11 + $0xb0] sm:$0x1] }
  0x7e   : > { %v550_v25 = vshrl.u32 %v6918_v52, 16  ;;  %v542_v31 = vor.u32 %v541_v7, %v537_v2  ;;  %v553_v38 = vshll.u32 %v6918_v52, 16  ;;  %v559_v1 = vshll.u32 %v6929_v46, 16 }
  0x7f   : > { %5663 = vmatmul.mubr.msk.bf16.gmra.mrb[20].mxu1 %vm671_vm3, %v4956_v6  ;;  %v563_v28 = vshrl.u32 %v6929_v46, 16  ;;  %v533_v60 = vrot.slane %v532_v14, 4  ;;  %v2814_v42 = vsel %vm6813_vm7, %v5224_v17, %v2813_v18  ;;  %v2815_v20 = vrot.slane %v2813_v18, 4  ;;  %v6970_v14 = vld [vmem:[%s6561_s11 + $0xb4] sm:$0xf] }
  0x80   : > { %v552_v44 = vrot.slane %v550_v25, 4  ;;  %v543_v34 = vrot.slane %v542_v31, 4  ;;  %v555_v45 = vrot.slane %v553_v38, 5  ;;  %v561_v47 = vrot.slane %v559_v1, 5 }
  0x81   : > { %v565_v26 = vrot.slane %v563_v28, 4  ;;  %v538_v48 = vsel %vm6587_vm4, %v533_v60, %v537_v2  ;;  %v2817_v49 = vsel %vm6813_vm7, %v2815_v20, %v2816_v21  ;;  %v569_v50 = vshll.u32 %v231_v10, 16  ;;  %v5210_v2 = vld [vmem:[%s6561_s11 + $0x54] sm:$0xe] }
  0x82   : > { %v5225_v51 = vrot.slane %v5209_v11, 9  ;;  %v548_v15 = vsel %vm6587_vm4, %v543_v34, %v547_v41  ;;  %v5241_v62 = vcombine.low %v2814_v42, %v2817_v49  ;;  %v556_v40 = vor.u32 %v555_v45, %v552_v44  ;;  %v6979_v42 = vld [vmem:[%s6561_s11 + $0xb8] sm:$0xf]  ;;  %v233_v49 = vld [vmem:[%s6561_s11 + $0xbc] sm:$0x1] }
  0x83   : > { %v566_v55 = vor.u32 %v565_v26, %v561_v47  ;;  %v4957_v57 = vcombine.low %v538_v48, %v548_v15  ;;  %v571_v63 = vrot.slane %v569_v50, 5  ;;  %v2820_v58 = vrot.slane %v6714_v8, 5 }
  0x84   : > { %v2823_v54 = vrot.slane %v6722_v23, 5  ;;  %5820 = vmatprep.mubr.msk.bf16.mxu0 %vm671_vm3, %v5241_v62  ;;  %v557_v6 = vrot.slane %v556_v40, 4  ;;  %v574_v41 = vshrl.u32 %v6950_v33, 16  ;;  %v577_v17 = vshll.u32 %v6950_v33, 16 }
  0x85   : > { %v567_v7 = vrot.slane %v566_v55, 4  ;;  %5666 = vmatprep.mubr.msk.bf16.mxu1 %vm671_vm3, %v4957_v57  ;;  %v2821_v10 = vsel %vm6813_vm7, %v5225_v51, %v2820_v58  ;;  %v2822_v11 = vrot.slane %v2820_v58, 4  ;;  %v583_v8 = vshll.u32 %v6955_v56, 16  ;;  %v5211_v55 = vld [vmem:[%s6561_s11 + $0x60] sm:$0xe] }
  0x86   : > { %v587_v23 = vshrl.u32 %v6955_v56, 16  ;;  %v562_v18 = vsel %vm6587_vm4, %v557_v6, %v561_v47  ;;  %v576_v25 = vrot.slane %v574_v41, 4  ;;  %v579_v31 = vrot.slane %v577_v17, 5  ;;  %v5212_v6 = vld [vmem:[%s6561_s11 + $0x6c] sm:$0xe] }
  0x87   : > { %v572_v21 = vsel %vm6587_vm4, %v567_v7, %v571_v63  ;;  %v2824_v1 = vsel %vm6813_vm7, %v2822_v11, %v2823_v54  ;;  %v585_v28 = vrot.slane %v583_v8, 5  ;;  %v593_v34 = vshll.u32 %v232_v61, 16  ;;  %v5148_v11 = vld [vmem:[%s6561_s11 + $0x70] sm:$0xf]  ;;  %v5149_v8 = vld [vmem:[%s6561_s11 + $0x74] sm:$0x1] }
  0x88   : > { %v4958_v38 = vcombine.low %v562_v18, %v572_v21  ;;  %v589_v60 = vrot.slane %v587_v23, 4  ;;  %v5242_v20 = vcombine.low %v2821_v10, %v2824_v1  ;;  %v580_v44 = vor.u32 %v579_v31, %v576_v25 }
  0x89   : > { %v5226_v45 = vrot.slane %v5210_v2, 9  ;;  %v2827_v26 = vrot.slane %v6745_v4, 5  ;;  %v2830_v48 = vrot.slane %v6751_v12, 5  ;;  %v598_v50 = vshrl.u32 %v6970_v14, 16 }
  0x8a   : > { %5667 = vmatmul.mubr.msk.bf16.gmra.mrb[24].mxu1 %vm671_vm3, %v4958_v38  ;;  %v590_v47 = vor.u32 %v589_v60, %v585_v28  ;;  %5821 = vmatmul.mubr.msk.bf16.gmra.mrb[8].mxu0 %vm671_vm3, %v5242_v20  ;;  %v581_v51 = vrot.slane %v580_v44, 4  ;;  %v595_v15 = vrot.slane %v593_v34, 5  ;;  %v601_v62 = vshll.u32 %v6970_v14, 16 }
  0x8b   : > { %v607_v40 = vshll.u32 %v6979_v42, 16  ;;  %v2828_v4 = vsel %vm6813_vm7, %v5226_v45, %v2827_v26  ;;  %v2829_v12 = vrot.slane %v2827_v26, 4  ;;  %v600_v63 = vrot.slane %v598_v50, 4 }
  0x8c   : > { %v591_v57 = vrot.slane %v590_v47, 4  ;;  %v586_v58 = vsel %vm6587_vm4, %v581_v51, %v585_v28  ;;  %v603_v54 = vrot.slane %v601_v62, 5  ;;  %v611_v2 = vshrl.u32 %v6979_v42, 16  ;;  %v5213_v47 = vld [vmem:[%s6561_s11 + $0x78] sm:$0xe] }
  0x8d   : > { %v609_v61 = vrot.slane %v607_v40, 5  ;;  %v2831_v41 = vsel %vm6813_vm7, %v2829_v12, %v2830_v48  ;;  %v617_v17 = vshll.u32 %v233_v49, 16  ;;  %v5227_v10 = vrot.slane %v5211_v55, 9  ;;  %v6320_v51 = vld [vmem:[%s6561_s11] sm:$0xf] }
  0x8e   : > { %v596_v7 = vsel %vm6587_vm4, %v591_v57, %v595_v15  ;;  %v5243_v18 = vcombine.low %v2828_v4, %v2831_v41  ;;  %v604_v21 = vor.u32 %v603_v54, %v600_v63  ;;  %v613_v25 = vrot.slane %v611_v2, 4  ;;  %v7017_v15 = vld [vmem:[%s6561_s11 + $0x4] sm:$0xf]  ;;  %v7021_v40 = vld [vmem:[%s6561_s11 + $0x7c] sm:$0xf] }
  0x8f   : > { %v4959_v23 = vcombine.low %v586_v58, %v596_v7  ;;  %v619_v31 = vrot.slane %v617_v17, 5  ;;  %v2834_v38 = vrot.slane %v6775_v59, 5  ;;  %v2837_v1 = vrot.slane %v6782_v9, 5  ;;  %v7024_v55 = vld [vmem:[%s6561_s11 + $0x80] sm:$0x1] }
  0x90   : > { %v5228_v28 = vrot.slane %v5212_v6, 9  ;;  %5824 = vmatprep.mubr.msk.bf16.mxu0 %vm671_vm3, %v5243_v18  ;;  %v605_v60 = vrot.slane %v604_v21, 4  ;;  %v614_v20 = vor.u32 %v613_v25, %v609_v61  ;;  %v2841_v44 = vrot.slane %v5148_v11, 5  ;;  %v5154_v57 = vld [vmem:[%s6561_s11 + $0x88] sm:$0xf] }
  0x91   : > { %5670 = vmatprep.mubr.msk.bf16.mxu1 %vm671_vm3, %v4959_v23  ;;  %v2844_v34 = vrot.slane %v5149_v8, 5  ;;  %v2835_v45 = vsel %vm6813_vm7, %v5227_v10, %v2834_v38  ;;  %v2836_v59 = vrot.slane %v2834_v38, 4  ;;  %v4977_v62 = vcombine.low %v6320_v51, %v7017_v15  ;;  %v5155_v54 = vld [vmem:[%s6561_s11 + $0x8c] sm:$0x1]  ;;  %v5157_v17 = vld [vmem:[%s6561_s11 + $0x94] sm:$0xf] }
  0x92   : > { %v610_v9 = vsel %vm6587_vm4, %v605_v60, %v609_v61  ;;  %v615_v26 = vrot.slane %v614_v20, 4  ;;  %v2842_v48 = vsel %vm6813_vm7, %v5228_v28, %v2841_v44  ;;  %v2843_v49 = vrot.slane %v2841_v44, 4  ;;  %v5214_v61 = vld [vmem:[%s6561_s11 + $0x84] sm:$0xe]  ;;  %v5215_v23 = vld [vmem:[%s6561_s11 + $0x90] sm:$0xe] }
  0x93   : > { %v2838_v50 = vsel %vm6813_vm7, %v2836_v59, %v2837_v1  ;;  %v5229_v58 = vrot.slane %v5213_v47, 9  ;;  %v2848_v7 = vrot.slane %v7021_v40, 5  ;;  %v2851_v41 = vrot.slane %v7024_v55, 5  ;;  %v5158_v25 = vld [vmem:[%s6561_s11 + $0x98] sm:$0x1] }
  0x94   : > { %v620_v4 = vsel %vm6587_vm4, %v615_v26, %v619_v31  ;;  %v5244_v12 = vcombine.low %v2835_v45, %v2838_v50  ;;  %v2845_v63 = vsel %vm6813_vm7, %v2843_v49, %v2844_v34  ;;  %v5230_v10 = vrot.slane %v5214_v61, 9  ;;  %v5160_v31 = vld [vmem:[%s6561_s11 + $0xa0] sm:$0xf]  ;;  %v5161_v60 = vld [vmem:[%s6561_s11 + $0xa4] sm:$0x1] }
  0x95   : > { %v4960_v2 = vcombine.low %v610_v9, %v620_v4  ;;  %v5245_v6 = vcombine.low %v2842_v48, %v2845_v63  ;;  %v2855_v11 = vrot.slane %v5154_v57, 5  ;;  %v2858_v8 = vrot.slane %v5155_v54, 5  ;;  %v5216_v20 = vld [vmem:[%s6561_s11 + $0x9c] sm:$0xe]  ;;  %v6322_v44 = vld [vmem:[%s6561_s11 + $0xc] sm:$0xf] }
  0x96   : > { %5825 = vmatmul.mubr.msk.bf16.gmra.mrb[12].mxu0 %vm671_vm3, %v5244_v12  ;;  %v2849_v18 = vsel %vm6813_vm7, %v5229_v58, %v2848_v7  ;;  %v2850_v21 = vrot.slane %v2848_v7, 4  ;;  %v2862_v28 = vrot.slane %v5157_v17, 5  ;;  %v7051_v34 = vld [vmem:[%s6561_s11 + $0x10] sm:$0xf]  ;;  %v6324_v47 = vld [vmem:[%s6561_s11 + $0x18] sm:$0xf] }
  0x97   : > { %5671 = vmatmul.mubr.msk.bf16.gmra.mrb[28].mxu1 %vm671_vm3, %v4960_v2  ;;  %5828 = vmatprep.mubr.msk.bf16.mxu0 %vm671_vm3, %v5245_v6  ;;  %v2856_v38 = vsel %vm6813_vm7, %v5230_v10, %v2855_v11  ;;  %v2857_v1 = vrot.slane %v2855_v11, 4  ;;  %v4978_v45 = vcombine.low %v6322_v44, %v7051_v34  ;;  %v7058_v9 = vld [vmem:[%s6561_s11 + $0x1c] sm:$0xf]  ;;  %v5231_v48 = vrot.slane %v5215_v23, 9  ;;  %v5163_v57 = vld [vmem:[%s6561_s11 + $0xac] sm:$0xf] }
  0x98   : > { %5676 = vmatprep.mubr.msk.bf16.mxu1 %vm671_vm3, %v4977_v62  ;;  %v2852_v59 = vsel %vm6813_vm7, %v2850_v21, %v2851_v41  ;;  %v4979_v26 = vcombine.low %v6324_v47, %v7058_v9  ;;  %v2864_v51 = vrot.slane %v2862_v28, 4  ;;  %v2865_v62 = vrot.slane %v5158_v25, 5  ;;  %v6326_v54 = vld [vmem:[%s8381_s1 + $0x4] sm:$0x3]  ;;  %v5166_v2 = vld [vmem:[%s6561_s11 + $0xb8] sm:$0xf] }
  0x99   : > { %v5246_v49 = vcombine.low %v2849_v18, %v2852_v59  ;;  %v2859_v50 = vsel %vm6813_vm7, %v2857_v1, %v2858_v8  ;;  %v5232_v12 = vrot.slane %v5216_v20, 9  ;;  %v2869_v63 = vrot.slane %v5160_v31, 5  ;;  %v7073_v7 = vld [vmem:[%s8381_s1 + $0x6] sm:$0x3]  ;;  %v5164_v10 = vld [vmem:[%s6561_s11 + $0xb0] sm:$0x1] }
  0x9a   : > { %v5247_v4 = vcombine.low %v2856_v38, %v2859_v50  ;;  %v2872_v58 = vrot.slane %v5161_v60, 5  ;;  %v1439_v61 = vsel %vm720_vm0, %v6326_v54, 0  ;;  %v2863_v41 = vsel %vm6813_vm7, %v5231_v48, %v2862_v28  ;;  %v5217_v11 = vld [vmem:[%s6561_s11 + $0xa8] sm:$0xe]  ;;  %v5167_v25 = vld [vmem:[%s6561_s11 + $0xbc] sm:$0x1] }
  0x9b   : > { %v2871_v6 = vrot.slane %v2869_v63, 4  ;;  %v2866_v17 = vsel %vm6813_vm7, %v2864_v51, %v2865_v62  ;;  %v2876_v8 = vrot.slane %v5163_v57, 5  ;;  %v2870_v23 = vsel %vm6813_vm7, %v5232_v12, %v2869_v63  ;;  %v5218_v31 = vld [vmem:[%s6561_s11 + $0xb4] sm:$0xe]  ;;  %v6327_v38 = vld [vmem:[%s6561_s11 + $0x24] sm:$0xf] }
  0x9c   : > { %v2883_v21 = vrot.slane %v5166_v2, 5  ;;  %v7094_v1 = vld [vmem:[%s6561_s11 + $0x28] sm:$0xf]  ;;  %v5248_v60 = vcombine.low %v2863_v41, %v2866_v17  ;;  %v5233_v44 = vrot.slane %v5217_v11, 9  ;;  %v2879_v59 = vrot.slane %v5164_v10, 5 }
  0x9d   : > { %v2873_v18 = vsel %vm6813_vm7, %v2871_v6, %v2872_v58  ;;  %v4980_v28 = vcombine.low %v6327_v38, %v7094_v1  ;;  %v6329_v47 = vld [vmem:[%s6561_s11 + $0x30] sm:$0xf]  ;;  %v2886_v51 = vrot.slane %v5167_v25, 5  ;;  %v5169_v62 = vld [vmem:[%s6561_s11 + $0xc4] sm:$0xf]  ;;  %v2271_v25 = vshrl.u32 %v7021_v40, 16 }
  0x9e   : > { %5829 = vmatmul.mubr.msk.bf16.gmra.mrb[16].mxu0 %vm671_vm3, %v5246_v49  ;;  %v5249_v20 = vcombine.low %v2870_v23, %v2873_v18  ;;  %v5234_v49 = vrot.slane %v5218_v31, 9  ;;  %v2885_v50 = vrot.slane %v2883_v21, 4  ;;  %v2877_v57 = vsel %vm6813_vm7, %v5233_v44, %v2876_v8  ;;  %v5219_v12 = vld [vmem:[%s6561_s11 + $0xc0] sm:$0xe]  ;;  %v6331_v41 = vld [vmem:[%s6561_s11 + $0x3c] sm:$0xf] }
  0x9f   : > { %5677 = vmatmul.mubr.msk.bf16.vlgmr.msra.gmra.mrb[0].mxu1 %vm671_vm3, %v4978_v45  ;;  %5832 = vmatprep.mubr.msk.bf16.mxu0 %vm671_vm3, %v5247_v4  ;;  %v2878_v45 = vrot.slane %v2876_v8, 4  ;;  %v2890_v63 = vrot.slane %v5169_v62, 5  ;;  %v5235_v6 = vrot.slane %v5219_v12, 9  ;;  %v7119_v17 = vld [vmem:[%s6561_s11 + $0x40] sm:$0xf]  ;;  %v4983_v18 = vcombine.low %v6726_v27, %v6729_v36  ;;  %v6283_v62 = vld [vmem:[%s6561_s11 + $0x24] sm:$0xff]  }
  0xa0   : > { %5709 = vmatpush3.bf16.msra.mxu1 %v1439_v61  ;;  %5680 = vmatprep.mubr.msk.bf16.mxu1 %vm671_vm3, %v4979_v26  ;;  %v7099_v26 = vld [vmem:[%s6561_s11 + $0x34] sm:$0xf]  ;;  %v2884_v58 = vsel %vm6813_vm7, %v5234_v49, %v2883_v21  ;;  %v2887_v54 = vsel %vm6813_vm7, %v2885_v50, %v2886_v51  ;;  %v5170_v61 = vld [vmem:[%s6561_s11 + $0xc8] sm:$0x1]  ;;  %v4982_v10 = vcombine.low %v6331_v41, %v7119_v17  ;;  %v2267_v21 = vshll.u32 %v7021_v40, 16 }
  0xa1   : > { %6207 = vmatprep.subr.msk.bf16.mxu1 %vm720_vm0, %v7073_v7  ;;  %v4981_v48 = vcombine.low %v6329_v47, %v7099_v26  ;;  %v2880_v4 = vsel %vm6813_vm7, %v2878_v45, %v2879_v59  ;;  %v5251_v11 = vcombine.low %v2884_v58, %v2887_v54  ;;  %v2892_v8 = vrot.slane %v2890_v63, 4  ;;  %v1177_v45 = vld [vmem:[%s6561_s11] sm:$0xe]  ;;  %v1178_v59 = vld [vmem:[%s6561_s11 + $0xc] sm:$0xe] }
  0xa2   : > { %v5250_v2 = vcombine.low %v2877_v57, %v2880_v4  ;;  %v2893_v23 = vrot.slane %v5170_v61, 5  ;;  %v2891_v31 = vsel %vm6813_vm7, %v5235_v6, %v2890_v63  ;;  %v7134_v27 = vrot.slane %v2267_v21, 5  ;;  %v1181_v41 = vld [vmem:[%s6561_s11 + $0x30] sm:$0xe] }
  0xa3   : > { %v2273_v36 = vrot.slane %v2271_v25, 4  ;;  %v4985_v44 = vcombine.low %v6786_v19, %v6792_v35  ;;  %v2277_v47 = vshll.u32 %v7024_v55, 16  ;;  %v5009_v19 = vrot.slane %v1177_v45, 9 }
  0xa4   : > { %v2894_v38 = vsel %vm6813_vm7, %v2892_v8, %v2893_v23  ;;  %8404 = vst [vmem:[#allocation6_spill] sm:$0xff] %v7134_v27  ;;  %v5010_v35 = vrot.slane %v1178_v59, 9  ;;  %v1244_v4 = vrot.slane %v7058_v9, 5  ;;  %v1251_v12 = vrot.slane %v7094_v1, 5  ;;  %v1182_v8 = vld [vmem:[%s6561_s11 + $0x3c] sm:$0xe] }
  0xa5   : > { %v5252_v40 = vcombine.low %v2891_v31, %v2894_v38  ;;  %v2274_v49 = vor.u32 %v2273_v36, %v7134_v27  ;;  %v7154_v51 = vrot.slane %v2277_v47, 5  ;;  %v4986_v58 = vcombine.low %v6807_v0, %v6820_v29  ;;  %v1183_v31 = vld [vmem:[%s6561_s11 + $0x48] sm:$0xe]  ;;  %v6337_v59 = vld [vmem:[%s6561_s11 + $0x38] sm:$0x1] }
  0xa6   : > { %5833 = vmatmul.mubr.msk.bf16.gmra.mrb[20].mxu0 %vm671_vm3, %v5248_v60  ;;  %v4984_v60 = vcombine.low %v6755_v24, %v6761_v37  ;;  %v6334_v24 = vld [vmem:[%s6561_s11 + $0x14] sm:$0x1]  ;;  %v4079_v54 = vsel %vm720_vm0, %v6878_v22, 0  ;;  %v4987_v61 = vcombine.low %v6839_v53, %v6846_v16  ;;  %v4988_v6 = vcombine.low %v6865_v39, %v6873_v43  ;;  %v6335_v16 = vld [vmem:[%s6561_s11 + $0x20] sm:$0x1] }
  0xa7   : > { %5681 = vmatmul.mubr.msk.bf16.gmra.mrb[4].mxu1 %vm671_vm3, %v4980_v28  ;;  %5836 = vmatprep.mubr.msk.bf16.mxu0 %vm671_vm3, %v5249_v20  ;;  %v1237_v28 = vrot.slane %v7051_v34, 5  ;;  %v6281_v20 = vld [vmem:[%s6561_s11 + $0x18] sm:$0xff]   ;;  %v6333_v34 = vld [vmem:[%s6561_s11 + $0x8] sm:$0x1]  ;;  %v1240_v37 = vrot.slane %v6334_v24, 5  ;;  %8405 = vst [vmem:[#allocation7_spill] sm:$0xff] %v7154_v51  ;;  %v4989_v9 = vcombine.low %v6897_v5, %v6909_v30 }
  0xa8   : > { %5684 = vmatprep.mubr.msk.bf16.mxu1 %vm671_vm3, %v4981_v48  ;;  %v1230_v48 = vrot.slane %v7017_v15, 5  ;;  %v1233_v50 = vrot.slane %v6333_v34, 5  ;;  %v1179_v15 = vld [vmem:[%s6561_s11 + $0x18] sm:$0xe]  ;;  %v7159_v63 = vrot.slane %v2274_v49, 4  ;;  %v1247_v22 = vrot.slane %v6335_v16, 5 }
  0xa9   : > { %v1239_v55 = vrot.slane %v1237_v28, 4  ;;  %v5011_v1 = vrot.slane %v1179_v15, 9  ;;  %v7181_v29 = vsel %vm6813_vm7, %v5010_v35, %v1237_v28  ;;  %v1253_v25 = vrot.slane %v1251_v12, 4  ;;  %v5334_v24 = vld [vmem:[%s6561_s11 + $0x18] sm:$0xf] }
  0xaa   : > { %v1232_v57 = vrot.slane %v1230_v48, 4  ;;  %8406 = vst [vmem:[#allocation8_spill] sm:$0xff] %v7159_v63  ;;  %v7177_v0 = vsel %vm6813_vm7, %v5009_v19, %v1230_v48  ;;  %v1261_v47 = vrot.slane %v6337_v59, 5  ;;  %v7218_v49 = vsel %vm720_vm0, %v7073_v7, 0  ;;  %v5335_v7 = vld [vmem:[%s6561_s11 + $0x1c] sm:$0xf] }
  0xab   : > { %v7185_v53 = vsel %vm6813_vm7, %v1239_v55, %v1240_v37  ;;  %v7222_v34 = vsel %vm6813_vm7, %v5011_v1, %v1244_v4  ;;  %v6287_v37 = vld [vmem:[%s6561_s11 + $0x3c] sm:$0xff]   ;;  %v5014_v35 = vrot.slane %v1182_v8, 9  ;;  %v6338_v55 = vld [vmem:[%s6561_s11 + $0x44] sm:$0x1]  ;;  %v3600_v8 = vshll.u32 %v5334_v24, 16 }
  0xac   : > { %v7196_v23 = vsel %vm6813_vm7, %v1232_v57, %v1233_v50  ;;  %v1184_v50 = vld [vmem:[%s6561_s11 + $0x54] sm:$0xe]  ;;  %v1268_v15 = vrot.slane %v6338_v55, 5  ;;  %v5338_v39 = vld [vmem:[%s6561_s11 + $0x28] sm:$0xf] }
  0xad   : > { %v6345_v5 = vld [vmem:[%s6561_s11 + $0x70] sm:$0xf] }
  0xae   : > { %5837 = vmatmul.mubr.msk.bf16.gmra.mrb[24].mxu0 %vm671_vm3, %v5250_v2  ;;  %v1180_v2 = vld [vmem:[%s6561_s11 + $0x24] sm:$0xe]  ;;  %v1293_v30 = vrot.slane %v6345_v5, 5 }
  0xaf   : > { %5685 = vmatmul.mubr.msk.bf16.gmra.mrb[8].mxu1 %vm671_vm3, %v4982_v10  ;;  %5840 = vmatprep.mubr.msk.bf16.mxu0 %vm671_vm3, %v5251_v11  ;;  %v1258_v10 = vrot.slane %v7099_v26, 5  ;;  %v6285_v11 = vld [vmem:[%s6561_s11 + $0x30] sm:$0xff]   ;;  %v5012_v21 = vrot.slane %v1180_v2, 9 }
  0xb0   : > { %5688 = vmatprep.mubr.msk.bf16.mxu1 %vm671_vm3, %v4983_v18  ;;  %v7192_v26 = vld [vmem:[%s8381_s1 + $0x10] sm:$0x3]  ;;  %v1246_v18 = vrot.slane %v1244_v4, 4  ;;  %v1295_v48 = vrot.slane %v1293_v30, 4 }
  0xb1   : > { %v1260_v45 = vrot.slane %v1258_v10, 4  ;;  %v7229_v19 = vsel %vm6813_vm7, %v5012_v21, %v1251_v12  ;;  %v3610_v21 = vshrl.u32 %v5335_v7, 16 }
  0xb2   : > { %v7238_v4 = vsel %vm6813_vm7, %v1246_v18, %v1247_v22  ;;  %v3597_v22 = vshrl.u32 %v5334_v24, 16  ;;  %v3606_v18 = vshll.u32 %v5335_v7, 16  ;;  %v5337_v24 = vld [vmem:[%s6561_s11 + $0x24] sm:$0xf] }
  0xb3   : > { %v7251_v1 = vsel %vm6813_vm7, %v1260_v45, %v1261_v47 }
  0xb4   : > { %v3599_v43 = vrot.slane %v3597_v22, 4  ;;  %v7293_v7 = vrot.slane %v3606_v18, 5  ;;  %v3624_v22 = vshll.u32 %v5337_v24, 16  ;;  %v3634_v18 = vshrl.u32 %v5338_v39, 16 }
  0xb6   : > { %5841 = vmatmul.mubr.msk.bf16.gmra.mrb[28].mxu0 %vm671_vm3, %v5252_v40  ;;  %v6336_v40 = vld [vmem:[%s6561_s11 + $0x2c] sm:$0x1]  ;;  %v3626_v27 = vrot.slane %v3624_v22, 5 }
  0xb7   : > { %5689 = vmatmul.mubr.msk.bf16.gmra.mrb[12].mxu1 %vm671_vm3, %v4984_v60  ;;  %5846 = vmatprep.mubr.msk.bf16.mxu0 %vm671_vm3, %v6281_v20  ;;  %v1254_v28 = vrot.slane %v6336_v40, 5  ;;  %v1265_v60 = vrot.slane %v7119_v17, 5  ;;  %v6341_v40 = vld [vmem:[%s6561_s11 + $0x50] sm:$0x1]  ;;  %v6346_v17 = vld [vmem:[%s6561_s11 + $0x74] sm:$0x1] }
  0xb8   : > { %5692 = vmatprep.mubr.msk.bf16.mxu1 %vm671_vm3, %v4985_v44  ;;  %v5013_v44 = vrot.slane %v1181_v41, 9  ;;  %v5016_v41 = vrot.slane %v1184_v50, 9  ;;  %v1185_v50 = vld [vmem:[%s6561_s11 + $0x60] sm:$0xe]  ;;  %v5339_v20 = vld [vmem:[%s6561_s11 + $0x2c] sm:$0x1] }
  0xb9   : > { %v1267_v12 = vrot.slane %v1265_v60, 4  ;;  %v7264_v45 = vsel %vm6813_vm7, %v5014_v35, %v1265_v60  ;;  %v6342_v35 = vld [vmem:[%s6561_s11 + $0x5c] sm:$0x1] }
  0xba   : > { %v7247_v2 = vsel %vm6813_vm7, %v5013_v44, %v1258_v10  ;;  %v1282_v55 = vrot.slane %v6342_v35, 5  ;;  %v1186_v35 = vld [vmem:[%s6561_s11 + $0x6c] sm:$0xe] }
  0xbb   : > { %v7268_v59 = vsel %vm6813_vm7, %v1267_v12, %v1268_v15  ;;  %v6343_v15 = vld [vmem:[%s6561_s11 + $0x64] sm:$0xf]  ;;  %v3612_v12 = vrot.slane %v3610_v21, 4  ;;  %v5018_v5 = vrot.slane %v1186_v35, 9 }
  0xbc   : > { %v6293_v21 = vld [vmem:[%s6561_s11 + $0x60] sm:$0xff]  }
  0xbe   : > { %5847 = vmatmul.mubr.msk.bf16.vlgmr.msra.gmra.mrb[0].mxu0 %vm671_vm3, %v6283_v62  ;;  %v6339_v62 = vld [vmem:[%s6561_s11 + $0x4c] sm:$0xf] }
  0xbf   : > { %5693 = vmatmul.mubr.msk.bf16.gmra.mrb[16].mxu1 %vm671_vm3, %v4986_v58  ;;  %5879 = vmatpush3.bf16.msra.mxu0 %v4079_v54  ;;  %v1272_v57 = vrot.slane %v6339_v62, 5  ;;  %v7242_v58 = vsel %vm6813_vm7, %v1253_v25, %v1254_v28  ;;  %v5015_v54 = vrot.slane %v1183_v31, 9  ;;  %v1275_v28 = vrot.slane %v6341_v40, 5 }
  0xc0   : > { %5696 = vmatprep.mubr.msk.bf16.mxu1 %vm671_vm3, %v4987_v61  ;;  %5850 = vmatprep.mubr.msk.bf16.mxu0 %vm671_vm3, %v6285_v11  ;;  %v6289_v61 = vld [vmem:[%s6561_s11 + $0x48] sm:$0xff]   ;;  %v6340_v11 = vld [vmem:[%s6561_s11 + $0x58] sm:$0xf]  ;;  %v1286_v62 = vrot.slane %v6343_v15, 5  ;;  %v5341_v15 = vld [vmem:[%s6561_s11 + $0x34] sm:$0xf] }
  0xc1   : > { %6213 = vmatprep.subr.msk.bf16.mxu0 %vm720_vm0, %v7192_v26  ;;  %v1279_v16 = vrot.slane %v6340_v11, 5  ;;  %v1274_v31 = vrot.slane %v1272_v57, 4  ;;  %v7272_v47 = vsel %vm6813_vm7, %v5015_v54, %v1272_v57  ;;  %v5336_v57 = vld [vmem:[%s6561_s11 + $0x20] sm:$0x1]  ;;  %v5340_v54 = vld [vmem:[%s6561_s11 + $0x30] sm:$0xf] }
  0xc2   : > { %v5017_v11 = vrot.slane %v1185_v50, 9  ;;  %v3648_v50 = vshll.u32 %v5340_v54, 16  ;;  %v3616_v25 = vshll.u32 %v5336_v57, 16  ;;  %v3654_v36 = vshll.u32 %v5341_v15, 16 }
  0xc3   : > { %v7283_v60 = vsel %vm6813_vm7, %v5016_v41, %v1279_v16  ;;  %v7299_v41 = vsel %vm6813_vm7, %v1274_v31, %v1275_v28  ;;  %v1288_v31 = vrot.slane %v1286_v62, 4  ;;  %v3645_v28 = vshrl.u32 %v5340_v54, 16 }
  0xc4   : > { %v7341_v35 = vrot.slane %v3654_v36, 5 }
  0xc6   : > { %5851 = vmatmul.mubr.msk.bf16.gmra.mrb[4].mxu0 %vm671_vm3, %v6287_v37  ;;  %v1281_v37 = vrot.slane %v1279_v16, 4  ;;  %v6344_v16 = vld [vmem:[%s6561_s11 + $0x68] sm:$0x1] }
  0xc7   : > { %5697 = vmatmul.mubr.msk.bf16.gmra.mrb[20].mxu1 %vm671_vm3, %v4988_v6  ;;  %5854 = vmatprep.mubr.msk.bf16.mxu0 %vm671_vm3, %v6289_v61  ;;  %v3602_v6 = vrot.slane %v3600_v8, 5  ;;  %v6291_v61 = vld [vmem:[%s6561_s11 + $0x54] sm:$0xff]   ;;  %v1289_v40 = vrot.slane %v6344_v16, 5  ;;  %v3630_v8 = vshll.u32 %v5338_v39, 16  ;;  %v3613_v16 = vor.u32 %v3612_v12, %v7293_v7 }
  0xc8   : > { %5700 = vmatprep.mubr.msk.bf16.mxu1 %vm671_vm3, %v4989_v9  ;;  %v3621_v9 = vshrl.u32 %v5337_v24, 16  ;;  %v7308_v44 = vsel %vm6813_vm7, %v1281_v37, %v1282_v55  ;;  %v1296_v24 = vrot.slane %v6346_v17, 5  ;;  %v3658_v39 = vshrl.u32 %v5341_v15, 16 }
  0xc9   : > { %v3603_v10 = vor.u32 %v3602_v6, %v3599_v43  ;;  %v7314_v37 = vrot.slane %v3630_v8, 5  ;;  %v3636_v55 = vrot.slane %v3634_v18, 4  ;;  %v8407_v43 = vcombine.low %v6918_v52, %v6929_v46  ;;  %v6347_v8 = vld [vmem:[%s6561_s11 + $0x7c] sm:$0xf]  ;;  %v7350_v18 = vld [vmem:[%s6561_s11 + $0x38] sm:$0x1] }
  0xca   : > { %v3623_v38 = vrot.slane %v3621_v9, 4  ;;  %v7323_v17 = vsel %vm6813_vm7, %v5017_v11, %v1286_v62  ;;  %v7327_v57 = vsel %vm6813_vm7, %v1288_v31, %v1289_v40  ;;  %v3647_v6 = vrot.slane %v3645_v28, 4  ;;  %8409 = vst [vmem:[#allocation9_spill] sm:$0xff] %v7350_v18 }
  0xcb   : > { %v3650_v12 = vrot.slane %v3648_v50, 5  ;;  %v8408_v52 = vcombine.low %v6950_v33, %v6955_v56  ;;  %v3604_v46 = vrot.slane %v3603_v10, 4  ;;  %v3614_v54 = vrot.slane %v3613_v16, 4  ;;  %v6295_v33 = vld [vmem:[%s6561_s11 + $0x6c] sm:$0xff]   ;;  %v1188_v16 = vld [vmem:[%s6561_s11 + $0x84] sm:$0xe] }
  0xcc   : > { %v3640_v62 = vshll.u32 %v5339_v20, 16  ;;  %v7335_v11 = vsel %vm6813_vm7, %v5018_v5, %v1293_v30  ;;  %v7339_v40 = vsel %vm6813_vm7, %v1295_v48, %v1296_v24  ;;  %v3660_v9 = vrot.slane %v3658_v39, 4  ;;  %v6296_v48 = vld [vmem:[%s6561_s11 + $0x78] sm:$0xff]  }
  0xcd   : > { %v3627_v10 = vor.u32 %v3626_v27, %v3623_v38  ;;  %v3637_v20 = vor.u32 %v3636_v55, %v7314_v37  ;;  %v1300_v30 = vrot.slane %v6347_v8, 5  ;;  %v3651_v38 = vor.u32 %v3650_v12, %v3647_v6  ;;  %v5343_v5 = vld [vmem:[%s6561_s11 + $0x3c] sm:$0xf] }
  0xce   : > { %5855 = vmatmul.mubr.msk.bf16.gmra.mrb[8].mxu0 %vm671_vm3, %v6291_v61  ;;  %v3618_v61 = vrot.slane %v3616_v25, 5  ;;  %v1187_v25 = vld [vmem:[%s6561_s11 + $0x78] sm:$0xe]  ;;  %v7366_v50 = vrot.slane %v3640_v62, 5  ;;  %v3661_v39 = vor.u32 %v3660_v9, %v7341_v35  ;;  %v3664_v55 = vshll.u32 %v7350_v18, 16 }
  0xcf   : > { %5701 = vmatmul.mubr.msk.bf16.gmra.mrb[24].mxu1 %vm671_vm3, %v8407_v43  ;;  %5858 = vmatprep.mubr.msk.bf16.mxu0 %vm671_vm3, %v6293_v21  ;;  %v3609_v21 = vsel %vm6587_vm4, %v3604_v46, %v7293_v7  ;;  %v5019_v24 = vrot.slane %v1187_v25, 9  ;;  %v6348_v43 = vld [vmem:[%s6561_s11 + $0x88] sm:$0xf]  ;;  %v7374_v7 = vld [vmem:[%s6561_s11 + $0x40] sm:$0xf]  ;;  %v3628_v12 = vrot.slane %v3627_v10, 4  ;;  %v8411_v62 = vcombine.low %v6970_v14, %v6979_v42 }
  0xd0   : > { %5704 = vmatprep.mubr.msk.bf16.mxu1 %vm671_vm3, %v8408_v52  ;;  %v3619_v31 = vsel %vm6587_vm4, %v3614_v54, %v3618_v61  ;;  %v1307_v6 = vrot.slane %v6348_v43, 5  ;;  %8410 = vst [vmem:[#allocation10_spill] sm:$0xff] %v7374_v7  ;;  %v3638_v52 = vrot.slane %v3637_v20, 4  ;;  %v1302_v46 = vrot.slane %v1300_v30, 4  ;;  %v6349_v54 = vld [vmem:[%s6561_s11 + $0x80] sm:$0x1] }
  0xd1   : > { %v1303_v61 = vrot.slane %v6349_v54, 5  ;;  %v3652_v9 = vrot.slane %v3651_v38, 4  ;;  %v5020_v25 = vrot.slane %v1188_v16, 9  ;;  %v3669_v8 = vshrl.u32 %v5343_v5, 16  ;;  %v6297_v10 = vld [vmem:[%s6561_s11 + $0x84] sm:$0xff]  }
  0xd2   : > { %v3672_v43 = vshll.u32 %v5343_v5, 16  ;;  %v7388_v20 = vcombine.low %v3609_v21, %v3619_v31  ;;  %v7392_v14 = vsel %vm720_vm0, %v7192_v26, 0  ;;  %v3682_v38 = vshrl.u32 %v7374_v7, 16  ;;  %v6298_v21 = vld [vmem:[%s6561_s11 + $0x90] sm:$0xff]   ;;  %v6354_v18 = vld [vmem:[%s6561_s11 + $0xa0] sm:$0xf] }
  0xd3   : > { %v3662_v16 = vrot.slane %v3661_v39, 4  ;;  %v3666_v5 = vrot.slane %v3664_v55, 5  ;;  %v1309_v54 = vrot.slane %v1307_v6, 4  ;;  %v3633_v31 = vsel %vm6587_vm4, %v3628_v12, %v7314_v37 }
  0xd4   : > { %v3643_v26 = vsel %vm6587_vm4, %v3638_v52, %v7366_v50  ;;  %v7407_v39 = vsel %vm6813_vm7, %v5019_v24, %v1300_v30  ;;  %v7411_v55 = vsel %vm6813_vm7, %v1302_v46, %v1303_v61  ;;  %v3657_v37 = vsel %vm6587_vm4, %v3652_v9, %v7341_v35  ;;  %v5349_v30 = vld [vmem:[%s6561_s11 + $0x54] sm:$0xf]  ;;  %v7428_v24 = vld [vmem:[%s6561_s11 + $0x58] sm:$0xf]  ;;  %v7433_v61 = vld [vmem:[%s6561_s11 + $0x90] sm:$0xe] }
  0xd5   : > { %v7424_v12 = vsel %vm6813_vm7, %v5020_v25, %v1307_v6  ;;  %v3671_v50 = vrot.slane %v3669_v8, 4  ;;  %v3674_v52 = vrot.slane %v3672_v43, 5  ;;  %v3684_v46 = vrot.slane %v3682_v38, 4 }
  0xd6   : > { %5859 = vmatmul.mubr.msk.bf16.gmra.mrb[12].mxu0 %vm671_vm3, %v6295_v33  ;;  %v8412_v33 = vcombine.low %v7177_v0, %v7196_v23  ;;  %v6350_v0 = vld [vmem:[%s6561_s11 + $0x8c] sm:$0x1]  ;;  %v3667_v36 = vsel %vm6587_vm4, %v3662_v16, %v3666_v5  ;;  %v3717_v25 = vshrl.u32 %v5349_v30, 16  ;;  %v3720_v8 = vshll.u32 %v5349_v30, 16 }
  0xd7   : > { %5705 = vmatmul.mubr.msk.bf16.gmra.mrb[28].mxu1 %vm671_vm3, %v8411_v62  ;;  %5862 = vmatprep.mubr.msk.bf16.mxu0 %vm671_vm3, %v6296_v48  ;;  %v3678_v48 = vshll.u32 %v7374_v7, 16  ;;  %v1310_v23 = vrot.slane %v6350_v0, 5  ;;  %v5346_v62 = vld [vmem:[%s6561_s11 + $0x48] sm:$0xf]  ;;  %v7417_v0 = vld [vmem:[%s6561_s11 + $0x4c] sm:$0xf]  ;;  %v8414_v38 = vcombine.low %v7181_v29, %v7185_v53  ;;  %v7451_v16 = vcombine.low %v3633_v31, %v3643_v26 }
  0xd8   : > { %5710 = vmatprep.mubr.msk.bf16.mxu1 %vm671_vm3, %v8412_v33  ;;  %v7414_v33 = vld [vmem:[%s6561_s11 + $0x44] sm:$0x1]  ;;  %v3693_v27 = vshrl.u32 %v5346_v62, 16  ;;  %v3696_v15 = vshll.u32 %v5346_v62, 16  ;;  %v3702_v6 = vshll.u32 %v7417_v0, 16  ;;  %v3706_v9 = vshrl.u32 %v7417_v0, 16 }
  0xd9   : > { %8413 = vst [vmem:[#allocation11_spill] sm:$0xff] %v7414_v33  ;;  %v7430_v28 = vrot.slane %v3678_v48, 5  ;;  %v7439_v35 = vsel %vm6813_vm7, %v1309_v54, %v1310_v23  ;;  %v3726_v43 = vshll.u32 %v7428_v24, 16  ;;  %v3730_v48 = vshrl.u32 %v7428_v24, 16  ;;  %v5352_v31 = vld [vmem:[%s6561_s11 + $0x60] sm:$0xf] }
  0xda   : > { %v3688_v5 = vshll.u32 %v7414_v33, 16  ;;  %v5021_v54 = vrot.slane %v7433_v61, 9  ;;  %v8415_v23 = vcombine.low %v7222_v34, %v7238_v4  ;;  %v7462_v29 = vcombine.low %v3657_v37, %v3667_v36  ;;  %v6299_v26 = vld [vmem:[%s6561_s11 + $0x9c] sm:$0xff]   ;;  %v6300_v30 = vld [vmem:[%s6561_s11 + $0xa8] sm:$0xff]  }
  0xdb   : > { %v3675_v53 = vor.u32 %v3674_v52, %v3671_v50  ;;  %v3695_v62 = vrot.slane %v3693_v27, 4  ;;  %v7473_v34 = vrot.slane %v3702_v6, 5  ;;  %v3708_v4 = vrot.slane %v3706_v9, 4  ;;  %v6351_v36 = vld [vmem:[%s8381_s1 + $0x8] sm:$0x3] }
  0xdc   : > { %v3719_v27 = vrot.slane %v3717_v25, 4  ;;  %v3722_v37 = vrot.slane %v3720_v8, 5  ;;  %v7482_v50 = vrot.slane %v3726_v43, 5  ;;  %v3732_v52 = vrot.slane %v3730_v48, 4  ;;  %v6352_v6 = vld [vmem:[%s6561_s11 + $0x94] sm:$0xf] }
  0xdd   : > { %v7488_v9 = vld [vmem:[%s6561_s11 + $0x64] sm:$0xf]  ;;  %v3741_v61 = vshrl.u32 %v5352_v31, 16  ;;  %v7490_v22 = vrot.slane %v3675_v53, 4  ;;  %v1321_v25 = vrot.slane %v6354_v18, 5  ;;  %v3709_v43 = vor.u32 %v3708_v4, %v7473_v34 }
  0xde   : > { %5863 = vmatmul.mubr.msk.bf16.gmra.mrb[16].mxu0 %vm671_vm3, %v6297_v10  ;;  %8416 = vst [vmem:[#allocation12_spill] sm:$0xff] %v7488_v9  ;;  %v3744_v10 = vshll.u32 %v5352_v31, 16  ;;  %v3723_v31 = vor.u32 %v3722_v37, %v3719_v27  ;;  %v3733_v53 = vor.u32 %v3732_v52, %v7482_v50  ;;  %v8417_v18 = vcombine.low %v7229_v19, %v7242_v58  ;;  %v6301_v37 = vld [vmem:[%s6561_s11 + $0xb4] sm:$0xff]  }
  0xdf   : > { %5711 = vmatmul.mubr.msk.bf16.vlgmr.msra.gmra.mrb[0].mxu1 %vm671_vm3, %v8414_v38  ;;  %5866 = vmatprep.mubr.msk.bf16.mxu0 %vm671_vm3, %v6298_v21  ;;  %v3698_v21 = vrot.slane %v3696_v15, 5  ;;  %v7471_v38 = vld [vmem:[%s6561_s11 + $0x50] sm:$0x1]  ;;  %v7480_v15 = vld [vmem:[%s6561_s11 + $0x5c] sm:$0x1]  ;;  %v8418_v27 = vcombine.low %v7247_v2, %v7251_v1  ;;  %v1323_v52 = vrot.slane %v1321_v25, 4 }
  0xe0   : > { %5743 = vmatpush3.bf16.msra.mxu1 %v7218_v49  ;;  %5714 = vmatprep.mubr.msk.bf16.mxu1 %vm671_vm3, %v8415_v23  ;;  %v3685_v49 = vor.u32 %v3684_v46, %v7430_v28  ;;  %v7484_v46 = vrot.slane %v3688_v5, 5  ;;  %v1314_v23 = vrot.slane %v6352_v6, 5  ;;  %v3712_v48 = vshll.u32 %v7471_v38, 16  ;;  %v1190_v5 = vld [vmem:[%s6561_s11 + $0x9c] sm:$0xe] }
  0xe1   : > { %6209 = vmatprep.subr.msk.bf16.mxu1 %vm720_vm0, %v6351_v36  ;;  %v6353_v36 = vld [vmem:[%s6561_s11 + $0x98] sm:$0x1]  ;;  %v3699_v7 = vor.u32 %v3698_v21, %v3695_v62  ;;  %v3736_v6 = vshll.u32 %v7480_v15, 16  ;;  %v3754_v62 = vshrl.u32 %v7488_v9, 16  ;;  %v3746_v4 = vrot.slane %v3744_v10, 5 }
  0xe2   : > { %v1317_v33 = vrot.slane %v6353_v36, 5  ;;  %v3686_v8 = vrot.slane %v3685_v49, 4  ;;  %v3750_v36 = vshll.u32 %v7488_v9, 16  ;;  %v7509_v21 = vsel %vm6813_vm7, %v5021_v54, %v1314_v23  ;;  %v7520_v2 = vld [vmem:[%s6561_s11 + $0x68] sm:$0x1] }
  0xe3   : > { %v3743_v49 = vrot.slane %v3741_v61, 4  ;;  %v3700_v19 = vrot.slane %v3699_v7, 4  ;;  %v5022_v58 = vrot.slane %v1190_v5, 9  ;;  %v3710_v3 = vrot.slane %v3709_v43, 4  ;;  %8419 = vst [vmem:[#allocation13_spill] sm:$0xff] %v7520_v2  ;;  %v6302_v5 = vld [vmem:[%s6561_s11 + $0xc0] sm:$0xff]  }
  0xe4   : > { %v3714_v54 = vrot.slane %v3712_v48, 5  ;;  %v3738_v63 = vrot.slane %v3736_v6, 5  ;;  %v1328_v61 = vrot.slane %v6955_v56, 5  ;;  %v3724_v10 = vrot.slane %v3723_v31, 4  ;;  %v1192_v31 = vld [vmem:[%s6561_s11 + $0xb4] sm:$0xe] }
  0xe5   : > { %v3734_v51 = vrot.slane %v3733_v53, 4  ;;  %v7522_v1 = vrot.slane %v3750_v36, 5  ;;  %v3756_v7 = vrot.slane %v3754_v62, 4  ;;  %v3681_v43 = vsel %vm6587_vm4, %v7490_v22, %v7430_v28  ;;  %v6356_v62 = vld [vmem:[%s6561_s11 + $0xb0] sm:$0x1] }
  0xe6   : > { %5867 = vmatmul.mubr.msk.bf16.gmra.mrb[20].mxu0 %vm671_vm3, %v6299_v26  ;;  %v1316_v26 = vrot.slane %v1314_v23, 4  ;;  %v1191_v23 = vld [vmem:[%s6561_s11 + $0xa8] sm:$0xe]  ;;  %v3691_v48 = vsel %vm6587_vm4, %v3686_v8, %v7484_v46  ;;  %v3747_v6 = vor.u32 %v3746_v4, %v3743_v49  ;;  %v3705_v53 = vsel %vm6587_vm4, %v3700_v19, %v7473_v34  ;;  %v5355_v46 = vld [vmem:[%s6561_s11 + $0x6c] sm:$0xf] }
  0xe7   : > { %5715 = vmatmul.mubr.msk.bf16.gmra.mrb[4].mxu1 %vm671_vm3, %v8417_v18  ;;  %5870 = vmatprep.mubr.msk.bf16.mxu0 %vm671_vm3, %v6300_v30  ;;  %v6355_v18 = vld [vmem:[%s6561_s11 + $0xa4] sm:$0x1]  ;;  %v7542_v36 = vsel %vm6813_vm7, %v5022_v58, %v1321_v25  ;;  %v5023_v28 = vrot.slane %v1191_v23, 9  ;;  %v1330_v8 = vrot.slane %v1328_v61, 4  ;;  %v3760_v49 = vshll.u32 %v7520_v2, 16 }
  0xe8   : > { %5718 = vmatprep.mubr.msk.bf16.mxu1 %vm671_vm3, %v8418_v27  ;;  %v1324_v30 = vrot.slane %v6355_v18, 5  ;;  %v7534_v56 = vsel %vm6813_vm7, %v1316_v26, %v1317_v33  ;;  %v3715_v33 = vsel %vm6587_vm4, %v3710_v3, %v3714_v54  ;;  %v1331_v26 = vrot.slane %v6356_v62, 5  ;;  %v5358_v18 = vld [vmem:[%s6561_s11 + $0x78] sm:$0xf]  ;;  %v7597_v54 = vld [vmem:[%s6561_s11 + $0xbc] sm:$0x1] }
  0xe9   : > { %v3729_v34 = vsel %vm6587_vm4, %v3724_v10, %v7482_v50  ;;  %v3739_v25 = vsel %vm6587_vm4, %v3734_v51, %v3738_v63  ;;  %v3757_v4 = vor.u32 %v3756_v7, %v7522_v1  ;;  %v5024_v27 = vrot.slane %v1192_v31, 9  ;;  %v7571_v51 = vld [vmem:[%s6561_s11 + $0x70] sm:$0xf]  ;;  %v7601_v10 = vld [vmem:[%s6561_s11 + $0x7c] sm:$0xf] }
  0xea   : > { %v7546_v22 = vsel %vm6813_vm7, %v1323_v52, %v1324_v30  ;;  %v8421_v3 = vcombine.low %v7264_v45, %v7268_v59  ;;  %v7567_v19 = vrot.slane %v3747_v6, 4  ;;  %v1335_v50 = vrot.slane %v6979_v42, 5  ;;  %8422 = vst [vmem:[#allocation15_spill] sm:$0xff] %v7571_v51  ;;  %8424 = vst [vmem:[#allocation16_spill] sm:$0xff] %v7601_v10  ;;  %v5361_v7 = vld [vmem:[%s6561_s11 + $0x84] sm:$0xf] }
  0xeb   : > { %8420 = vst [vmem:[#allocation14_spill] sm:$0xff] %v7546_v22  ;;  %v3765_v63 = vshrl.u32 %v5355_v46, 16  ;;  %v8423_v45 = vcombine.low %v7272_v47, %v7299_v41  ;;  %v7579_v58 = vcombine.low %v3705_v53, %v3715_v33  ;;  %v7585_v42 = vsel %vm6813_vm7, %v5023_v28, %v1328_v61  ;;  %v6303_v61 = vld [vmem:[%s6561_s11 + $0xcc] sm:$0xff]   ;;  %v7613_v31 = vld [vmem:[%s6561_s11 + $0x88] sm:$0xf] }
  0xec   : > { %v7588_v30 = vcombine.low %v3729_v34, %v3739_v25  ;;  %v7592_v47 = vsel %vm6813_vm7, %v1330_v8, %v1331_v26  ;;  %v7594_v41 = vrot.slane %v3760_v49, 5  ;;  %v3774_v6 = vshll.u32 %v7571_v51, 16  ;;  %8425 = vst [vmem:[#allocation17_spill] sm:$0xff] %v7613_v31  ;;  %v5364_v62 = vld [vmem:[%s6561_s11 + $0x90] sm:$0xf] }
  0xed   : > { %v7619_v28 = vrot.slane %v1335_v50, 4  ;;  %v7621_v33 = vrot.slane %v3765_v63, 4  ;;  %v3778_v8 = vshrl.u32 %v7571_v51, 16  ;;  %v3789_v26 = vshrl.u32 %v5358_v18, 16  ;;  %v7628_v25 = vld [vmem:[%s6561_s11 + $0x94] sm:$0xf] }
  0xee   : > { %5871 = vmatmul.mubr.msk.bf16.gmra.mrb[24].mxu0 %vm671_vm3, %v6301_v37  ;;  %v7565_v37 = vcombine.low %v3681_v43, %v3691_v48  ;;  %v7609_v43 = vsel %vm6813_vm7, %v5024_v27, %v1335_v50  ;;  %v3768_v48 = vshll.u32 %v5355_v46, 16  ;;  %v3792_v49 = vshll.u32 %v5358_v18, 16  ;;  %8426 = vst [vmem:[#allocation18_spill] sm:$0xff] %v7628_v25  ;;  %v7666_v2 = vld [vmem:[%s6561_s11 + $0x8c] sm:$0x1] }
  0xef   : > { %5719 = vmatmul.mubr.msk.bf16.gmra.mrb[8].mxu1 %vm671_vm3, %v8421_v3  ;;  %5874 = vmatprep.mubr.msk.bf16.mxu0 %vm671_vm3, %v6302_v5  ;;  %v7605_v5 = vrot.slane %v3757_v4, 4  ;;  %v3798_v46 = vshll.u32 %v7601_v10, 16  ;;  %v3802_v34 = vshrl.u32 %v7601_v10, 16  ;;  %v3813_v4 = vshrl.u32 %v5361_v7, 16 }
  0xf0   : > { %5722 = vmatprep.mubr.msk.bf16.mxu1 %vm671_vm3, %v8423_v45  ;;  %v3816_v27 = vshll.u32 %v5361_v7, 16  ;;  %v3822_v3 = vshll.u32 %v7613_v31, 16  ;;  %v3826_v50 = vshrl.u32 %v7613_v31, 16  ;;  %v7638_v45 = vld [vmem:[%s6561_s11 + $0x74] sm:$0x1]  ;;  %v3770_v18 = vrot.slane %v3768_v48, 5 }
  0xf1   : > { %v3837_v52 = vshrl.u32 %v5364_v62, 16  ;;  %v3840_v53 = vshll.u32 %v5364_v62, 16  ;;  %v8427_v7 = vcombine.low %v7283_v60, %v7308_v44  ;;  %v3780_v59 = vrot.slane %v3778_v8, 4  ;;  %v5367_v48 = vld [vmem:[%s6561_s11 + $0x9c] sm:$0xf] }
  0xf2   : > { %v3846_v63 = vshll.u32 %v7628_v25, 16  ;;  %v3850_v23 = vshrl.u32 %v7628_v25, 16  ;;  %v8428_v62 = vcombine.low %v7323_v17, %v7327_v57  ;;  %v7656_v44 = vld [vmem:[%s6561_s11 + $0x80] sm:$0x1]  ;;  %v3791_v60 = vrot.slane %v3789_v26, 4 }
  0xf3   : > { %8429 = vst [vmem:[#allocation19_spill] sm:$0xff] %v7656_v44  ;;  %v3815_v31 = vrot.slane %v3813_v4, 4  ;;  %v3818_v8 = vrot.slane %v3816_v27, 5  ;;  %v7660_v10 = vrot.slane %v3822_v3, 5  ;;  %v3828_v51 = vrot.slane %v3826_v50, 4 }
  0xf4   : > { %v7663_v25 = vld [vmem:[%s6561_s11 + $0xa0] sm:$0xf]  ;;  %v3839_v17 = vrot.slane %v3837_v52, 4  ;;  %v3842_v57 = vrot.slane %v3840_v53, 5  ;;  %v3864_v9 = vshll.u32 %v5367_v48, 16  ;;  %v3771_v26 = vor.u32 %v3770_v18, %v7621_v33 }
  0xf5   : > { %v3808_v27 = vshll.u32 %v7656_v44, 16  ;;  %v7675_v3 = vld [vmem:[%s6561_s11 + $0x98] sm:$0x1]  ;;  %v3870_v50 = vshll.u32 %v7663_v25, 16  ;;  %v3874_v52 = vshrl.u32 %v7663_v25, 16  ;;  %v3819_v22 = vor.u32 %v3818_v8, %v3815_v31 }
  0xf6   : > { %5875 = vmatmul.mubr.msk.bf16.gmra.mrb[28].mxu0 %vm671_vm3, %v6303_v61  ;;  %v7646_v61 = vrot.slane %v3774_v6, 5  ;;  %v3804_v6 = vrot.slane %v3802_v34, 4  ;;  %v3852_v34 = vrot.slane %v3850_v23, 4  ;;  %v3832_v33 = vshll.u32 %v7666_v2, 16 }
  0xf7   : > { %5723 = vmatmul.mubr.msk.bf16.gmra.mrb[12].mxu1 %vm671_vm3, %v8427_v7  ;;  %5880 = vmatprep.mubr.msk.bf16.mxu0 %vm671_vm3, %v7388_v20  ;;  %v3794_v7 = vrot.slane %v3792_v49, 5  ;;  %v7658_v20 = vrot.slane %v3798_v46, 5  ;;  %v3784_v49 = vshll.u32 %v7638_v45, 16  ;;  %v7670_v46 = vrot.slane %v3846_v63, 5 }
  0xf8   : > { %5726 = vmatprep.mubr.msk.bf16.mxu1 %vm671_vm3, %v8428_v62  ;;  %v3861_v62 = vshrl.u32 %v5367_v48, 16  ;;  %v3781_v4 = vor.u32 %v3780_v59, %v7646_v61  ;;  %v3829_v23 = vor.u32 %v3828_v51, %v7660_v10  ;;  %v3843_v59 = vor.u32 %v3842_v57, %v3839_v17  ;;  %v7708_v57 = vld [vmem:[%s6561_s11 + $0xa4] sm:$0x1] }
  0xf9   : > { %v3795_v53 = vor.u32 %v3794_v7, %v3791_v60  ;;  %v3805_v48 = vor.u32 %v3804_v6, %v7658_v20  ;;  %v3866_v18 = vrot.slane %v3864_v9, 5  ;;  %v8430_v44 = vcombine.low %v7335_v11, %v7339_v40 }
  0xfa   : > { %v3863_v63 = vrot.slane %v3861_v62, 4  ;;  %v8431_v31 = vrot.slane %v7597_v54, 5  ;;  %v3786_v51 = vrot.slane %v3784_v49, 5  ;;  %v3853_v60 = vor.u32 %v3852_v34, %v7670_v46  ;;  %v7711_v34 = vld [vmem:[%s6561_s11 + $0xac] sm:$0xf] }
  0xfb   : > { %v3856_v9 = vshll.u32 %v7675_v3, 16  ;;  %v8432_v11 = vcombine.low %v7407_v39, %v7411_v55  ;;  %v3772_v40 = vrot.slane %v3771_v26, 4  ;;  %v7704_v54 = vrot.slane %v3870_v50, 5 }
  0xfc   : > { %v3796_v7 = vrot.slane %v3795_v53, 4  ;;  %v3806_v6 = vrot.slane %v3805_v48, 4  ;;  %v3810_v8 = vrot.slane %v3808_v27, 5  ;;  %v3834_v17 = vrot.slane %v3832_v33, 5  ;;  %v7721_v48 = vld [vmem:[%s6561_s11 + $0xb0] sm:$0x1] }
  0xfd   : > { %v3820_v39 = vrot.slane %v3819_v22, 4  ;;  %v3830_v55 = vrot.slane %v3829_v23, 4  ;;  %v3844_v62 = vrot.slane %v3843_v59, 4  ;;  %v3867_v49 = vor.u32 %v3866_v18, %v3863_v63 }
  0xfe   : > { %5881 = vmatmul.mubr.msk.bf16.vlgmr.msra.gmra.mrb[0].mxu0 %vm671_vm3, %v7451_v16  ;;  %v7694_v16 = vsel %vm6813_vm7, %v7619_v28, %v8431_v31  ;;  %v3876_v28 = vrot.slane %v3874_v52, 4  ;;  %v3858_v26 = vrot.slane %v3856_v9, 5  ;;  %v3777_v52 = vsel %vm6587_vm4, %v3772_v40, %v7646_v61 }
  0xff   : > { %5727 = vmatmul.mubr.msk.bf16.gmra.mrb[16].mxu1 %vm671_vm3, %v8430_v44  ;;  %5913 = vmatpush3.bf16.msra.mxu0 %v7392_v14  ;;  %v3782_v14 = vrot.slane %v3781_v4, 4  ;;  %v5370_v44 = vld [vmem:[%s6561_s11 + $0xa8] sm:$0xf]  ;;  %v3880_v22 = vshll.u32 %v7708_v57, 16  ;;  %v3801_v33 = vsel %vm6587_vm4, %v3796_v7, %v7658_v20  ;;  %v3811_v23 = vsel %vm6587_vm4, %v3806_v6, %v3810_v8 }
 0x100   : > { %5730 = vmatprep.mubr.msk.bf16.mxu1 %vm671_vm3, %v8432_v11  ;;  %5884 = vmatprep.mubr.msk.bf16.mxu0 %vm671_vm3, %v7462_v29  ;;  %v3854_v29 = vrot.slane %v3853_v60, 4  ;;  %v3885_v4 = vshrl.u32 %v5370_v44, 16  ;;  %v3888_v50 = vshll.u32 %v5370_v44, 16  ;;  %v3877_v53 = vor.u32 %v3876_v28, %v7704_v54  ;;  %v5419_v11 = vld [vmem:[%s6561_s11 + $0x48] sm:$0xe] }
 0x101   : > { %v3787_v27 = vsel %vm6587_vm4, %v3782_v14, %v3786_v51  ;;  %v3894_v59 = vshll.u32 %v7711_v34, 16  ;;  %v3898_v61 = vshrl.u32 %v7711_v34, 16  ;;  %v3825_v63 = vsel %vm6587_vm4, %v3820_v39, %v7660_v10  ;;  %v7786_v39 = vld [vmem:[%s6561_s11 + $0xb8] sm:$0xf] }
 0x102   : > { %v3835_v18 = vsel %vm6587_vm4, %v3830_v55, %v3834_v17  ;;  %v3849_v20 = vsel %vm6587_vm4, %v3844_v62, %v7670_v46  ;;  %v3868_v31 = vrot.slane %v3867_v49, 4  ;;  %v8433_v51 = vcombine.low %v7424_v12, %v7439_v35 }
 0x103   : > { %v3887_v10 = vrot.slane %v3885_v4, 4  ;;  %v3890_v60 = vrot.slane %v3888_v50, 5  ;;  %v3904_v9 = vshll.u32 %v7721_v48, 16  ;;  %v8434_v46 = vcombine.low %v7509_v21, %v7534_v56  ;;  %v5373_v21 = vld [vmem:[%s6561_s11 + $0xb4] sm:$0xf] }
 0x104   : > { %v5040_v12 = vcombine.low %v7585_v42, %v7592_v47  ;;  %v8435_v35 = vsel %vm6587_vm4, %v7605_v5, %v7594_v41  ;;  %v3878_v14 = vrot.slane %v3877_v53, 4  ;;  %v3882_v28 = vrot.slane %v3880_v22, 5  ;;  %v5421_v4 = vld [vmem:[%s6561_s11 + $0x60] sm:$0xe]  ;;  %v5422_v53 = vld [vmem:[%s6561_s11 + $0x6c] sm:$0xe] }
 0x105   : > { %v5041_v56 = vcombine.low %v7609_v43, %v7694_v16  ;;  %v7769_v44 = vcombine.low %v3777_v52, %v3787_v27  ;;  %v7771_v42 = vrot.slane %v3894_v59, 5  ;;  %v3900_v47 = vrot.slane %v3898_v61, 4  ;;  %v8444_v16 = vld [vmem:[#allocation7_spill] sm:$0xff] }
 0x106   : > { %5885 = vmatmul.mubr.msk.bf16.gmra.mrb[4].mxu0 %vm671_vm3, %v7565_v37  ;;  %v3859_v37 = vsel %vm6587_vm4, %v3854_v29, %v3858_v26  ;;  %v7773_v41 = vcombine.low %v3801_v33, %v3811_v23  ;;  %v7775_v5 = vcombine.low %v3825_v63, %v3835_v18  ;;  %v3873_v6 = vsel %vm6587_vm4, %v3868_v31, %v7704_v54  ;;  %v8437_v23 = vld [vmem:[#allocation14_spill] sm:$0xff]  ;;  %v5376_v63 = vld [vmem:[%s6561_s11 + $0xc0] sm:$0xf]  ;;  %v8439_v18 = vld [vmem:[#allocation12_spill] sm:$0xff] }
 0x107   : > { %5731 = vmatmul.mubr.msk.bf16.gmra.mrb[20].mxu1 %vm671_vm3, %v8433_v51  ;;  %5888 = vmatprep.mubr.msk.bf16.mxu0 %vm671_vm3, %v7579_v58  ;;  %v8436_v58 = vsel %vm6587_vm4, %v7567_v19, %v7522_v1  ;;  %v7777_v7 = vcombine.low %v3849_v20, %v3859_v37  ;;  %v5435_v1 = vrot.slane %v5419_v11, 9  ;;  %v5420_v19 = vld [vmem:[%s6561_s11 + $0x54] sm:$0xe]  ;;  %v3891_v8 = vor.u32 %v3890_v60, %v3887_v10 }
 0x108   : > { %5734 = vmatprep.mubr.msk.bf16.mxu1 %vm671_vm3, %v8434_v46  ;;  %v5389_v40 = vcombine.low %v8436_v58, %v8435_v35  ;;  %v7783_v17 = vrot.slane %v3904_v9, 5  ;;  %v3909_v55 = vshrl.u32 %v5373_v21, 16  ;;  %v3883_v62 = vsel %vm6587_vm4, %v3878_v14, %v3882_v28  ;;  %v8440_v31 = vld [vmem:[#allocation13_spill] sm:$0xff]  ;;  %v8441_v9 = vld [vmem:[#allocation15_spill] sm:$0xff]  ;;  %v7835_v35 = vld [vmem:[%s6561_s11 + $0xbc] sm:$0x1] }
 0x109   : > { %v3912_v49 = vshll.u32 %v5373_v21, 16  ;;  %v4368_v29 = vrot.slane %v7417_v0, 5  ;;  %v4371_v26 = vrot.slane %v7471_v38, 5  ;;  %v3901_v50 = vor.u32 %v3900_v47, %v7771_v42  ;;  %v7838_v58 = vld [vmem:[%s6561_s11 + $0xc4] sm:$0xf] }
 0x10a   : > { %v5436_v52 = vrot.slane %v5420_v19, 9  ;;  %v4375_v54 = vrot.slane %v7428_v24, 5  ;;  %v4378_v27 = vrot.slane %v7480_v15, 5  ;;  %v3918_v22 = vshll.u32 %v7786_v39, 16  ;;  %v5423_v19 = vld [vmem:[%s6561_s11 + $0x78] sm:$0xe] }
 0x10b   : > { %v3922_v33 = vshrl.u32 %v7786_v39, 16  ;;  %v7803_v0 = vsel %vm6813_vm7, %v5435_v1, %v4368_v29  ;;  %v4370_v38 = vrot.slane %v4368_v29, 4  ;;  %v8438_v59 = vcombine.low %v7542_v36, %v8437_v23  ;;  %v8442_v23 = vld [vmem:[#allocation16_spill] sm:$0xff] }
 0x10c   : > { %v7810_v24 = vcombine.low %v3873_v6, %v3883_v62  ;;  %v7814_v15 = vsel %vm6813_vm7, %v5436_v52, %v4375_v54  ;;  %v5437_v61 = vrot.slane %v5421_v4, 9  ;;  %v4382_v20 = vrot.slane %v8439_v18, 5  ;;  %v6304_v6 = vld [vmem:[%s6561_s11 + $0xc] sm:$0xff]  }
 0x10d   : > { %v7820_v36 = vsel %vm6813_vm7, %v4370_v38, %v4371_v26  ;;  %v4385_v51 = vrot.slane %v8440_v31, 5  ;;  %v5438_v37 = vrot.slane %v5422_v53, 9  ;;  %v4389_v11 = vrot.slane %v8441_v9, 5 }
 0x10e   : > { %5889 = vmatmul.mubr.msk.bf16.gmra.mrb[8].mxu0 %vm671_vm3, %v7588_v30  ;;  %v4377_v30 = vrot.slane %v4375_v54, 4  ;;  %v5452_v10 = vcombine.low %v7803_v0, %v7820_v36  ;;  %v4392_v46 = vrot.slane %v7638_v45, 5  ;;  %v7844_v14 = vsel %vm6813_vm7, %v5437_v61, %v4382_v20 }
 0x10f   : > { %5735 = vmatmul.mubr.msk.bf16.gmra.mrb[24].mxu1 %vm671_vm3, %v8438_v59  ;;  %5892 = vmatprep.mubr.msk.bf16.mxu0 %vm671_vm3, %v5389_v40  ;;  %v4384_v28 = vrot.slane %v4382_v20, 4  ;;  %v7846_v21 = vrot.slane %v3909_v55, 4  ;;  %v3933_v47 = vshrl.u32 %v5376_v63, 16  ;;  %v7850_v45 = vsel %vm6813_vm7, %v5438_v37, %v4389_v11  ;;  %v5150_v55 = vld [vmem:[%s6561_s11 + $0x78] sm:$0xf]  ;;  %v8443_v59 = vld [vmem:[#allocation19_spill] sm:$0xff] }
 0x110   : > { %5738 = vmatprep.mubr.msk.bf16.mxu1 %vm671_vm3, %v5040_v12  ;;  %v7828_v60 = vsel %vm6813_vm7, %v4377_v30, %v4378_v27  ;;  %v7832_v12 = vrot.slane %v3891_v8, 4  ;;  %v4391_v1 = vrot.slane %v4389_v11, 4  ;;  %v7854_v8 = vrot.slane %v3901_v50, 4 }
 0x111   : > { %v5453_v40 = vcombine.low %v7814_v15, %v7828_v60  ;;  %v7856_v62 = vrot.slane %v3912_v49, 5  ;;  %v3936_v29 = vshll.u32 %v5376_v63, 16  ;;  %v7860_v26 = vsel %vm6813_vm7, %v4384_v28, %v4385_v51  ;;  %v8446_v28 = vld [vmem:[#allocation17_spill] sm:$0xff]  ;;  %v6367_v60 = vld [vmem:[%s6561_s11 + $0xa0] sm:$0xf] }
 0x112   : > { %v7863_v4 = vrot.slane %v3918_v22, 5  ;;  %v7865_v52 = vrot.slane %v3922_v33, 4  ;;  %v5454_v54 = vcombine.low %v7844_v14, %v7860_v26  ;;  %v7871_v27 = vsel %vm6813_vm7, %v4391_v1, %v4392_v46  ;;  %v5424_v33 = vld [vmem:[%s6561_s11 + $0x84] sm:$0xe]  ;;  %v6305_v1 = vld [vmem:[%s6561_s11 + $0x18] sm:$0xff]  }
 0x113   : > { %v3928_v49 = vshll.u32 %v7835_v35, 16  ;;  %v3942_v50 = vshll.u32 %v7838_v58, 16  ;;  %v5455_v53 = vcombine.low %v7850_v45, %v7871_v27  ;;  %v5439_v22 = vrot.slane %v5423_v19, 9  ;;  %v6371_v27 = vld [vmem:[%s6561_s11 + $0xac] sm:$0xf] }
 0x114   : > { %v3935_v38 = vrot.slane %v3933_v47, 4  ;;  %v4399_v30 = vrot.slane %v8443_v59, 5  ;;  %v2258_v61 = vshrl.u32 %v5150_v55, 16  ;;  %v3938_v63 = vrot.slane %v3936_v29, 5  ;;  %v5379_v29 = vld [vmem:[%s6561_s11 + $0xcc] sm:$0xf] }
 0x115   : > { %v3946_v18 = vshrl.u32 %v7838_v58, 16  ;;  %v2261_v43 = vshll.u32 %v5150_v55, 16  ;;  %v5440_v37 = vrot.slane %v5424_v33, 9  ;;  %v3897_v9 = vsel %vm6587_vm4, %v7832_v12, %v7771_v42  ;;  %v7914_v55 = vld [vmem:[%s6561_s11 + $0xd0] sm:$0xf] }
 0x116   : > { %5893 = vmatmul.mubr.msk.bf16.gmra.mrb[12].mxu0 %vm671_vm3, %v7769_v44  ;;  %v4396_v44 = vrot.slane %v8442_v23, 5  ;;  %v2260_v51 = vrot.slane %v2258_v61, 4  ;;  %v3915_v11 = vor.u32 %v7856_v62, %v7846_v21  ;;  %v4403_v47 = vrot.slane %v8446_v28, 5  ;;  %v6306_v21 = vld [vmem:[%s6561_s11 + $0x24] sm:$0xff]  }
 0x117   : > { %5739 = vmatmul.mubr.msk.bf16.gmra.mrb[28].mxu1 %vm671_vm3, %v5041_v56  ;;  %5896 = vmatprep.mubr.msk.bf16.mxu0 %vm671_vm3, %v7773_v41  ;;  %v8445_v56 = vld [vmem:[#allocation8_spill] sm:$0xff]  ;;  %v2263_v46 = vrot.slane %v2261_v43, 5  ;;  %v3907_v19 = vsel %vm6587_vm4, %v7854_v8, %v7783_v17  ;;  %v4406_v12 = vrot.slane %v7666_v2, 5  ;;  %v7922_v62 = vrot.slane %v3942_v50, 5  ;;  %v5425_v8 = vld [vmem:[%s6561_s11 + $0x90] sm:$0xe] }
 0x118   : > { %5744 = vmatprep.mubr.msk.bf16.mxu1 %vm671_vm3, %v6304_v6  ;;  %v2280_v41 = vsel %vm6587_vm4, %v8445_v56, %v8444_v16  ;;  %v7896_v20 = vsel %vm6813_vm7, %v5439_v22, %v4396_v44  ;;  %v4398_v31 = vrot.slane %v4396_v44, 4  ;;  %v3925_v6 = vor.u32 %v7865_v52, %v7863_v4  ;;  %v7928_v52 = vld [vmem:[%s6561_s11 + $0xc8] sm:$0x1]  ;;  %v8448_v16 = vld [vmem:[#allocation5_spill] sm:$0xff] }
 0x119   : > { %v3948_v22 = vrot.slane %v3946_v18, 4  ;;  %v2264_v17 = vor.u32 %v2263_v46, %v2260_v51  ;;  %v3930_v23 = vrot.slane %v3928_v49, 5  ;;  %v3939_v44 = vor.u32 %v3938_v63, %v3935_v38  ;;  %v8449_v51 = vld [vmem:[#allocation6_spill] sm:$0xff] }
 0x11a   : > { %v7918_v42 = vsel %vm6813_vm7, %v4398_v31, %v4399_v30  ;;  %v7932_v59 = vsel %vm6813_vm7, %v5440_v37, %v4403_v47  ;;  %v4405_v30 = vrot.slane %v4403_v47, 4  ;;  %v3957_v2 = vshrl.u32 %v5379_v29, 16 }
 0x11b   : > { %v5456_v33 = vcombine.low %v7896_v20, %v7918_v42  ;;  %v3960_v50 = vshll.u32 %v5379_v29, 16  ;;  %v3966_v61 = vshll.u32 %v7914_v55, 16  ;;  %v2265_v18 = vrot.slane %v2264_v17, 4  ;;  %v6307_v29 = vld [vmem:[%s6561_s11 + $0x30] sm:$0xff]  }
 0x11c   : > { %v3970_v49 = vshrl.u32 %v7914_v55, 16  ;;  %v7943_v38 = vsel %vm6813_vm7, %v4405_v30, %v4406_v12  ;;  %v5441_v63 = vrot.slane %v5425_v8, 9  ;;  %v3949_v56 = vor.u32 %v3948_v22, %v7922_v62 }
 0x11d   : > { %v3952_v31 = vshll.u32 %v7928_v52, 16  ;;  %v5457_v37 = vcombine.low %v7932_v59, %v7943_v38  ;;  %v5395_v46 = vcombine.low %v3897_v9, %v3907_v19  ;;  %v3916_v28 = vrot.slane %v3915_v11, 4  ;;  %v5426_v11 = vld [vmem:[%s6561_s11 + $0x9c] sm:$0xe] }
 0x11e   : > { %5897 = vmatmul.mubr.msk.bf16.gmra.mrb[16].mxu0 %vm671_vm3, %v7775_v5  ;;  %v8447_v5 = vld [vmem:[#allocation18_spill] sm:$0xff]  ;;  %v3926_v47 = vrot.slane %v3925_v6, 4  ;;  %v3940_v12 = vrot.slane %v3939_v44, 4  ;;  %v4413_v8 = vrot.slane %v7675_v3, 5  ;;  %v3959_v30 = vrot.slane %v3957_v2, 4 }
 0x11f   : > { %5745 = vmatmul.mubr.msk.bf16.vlgmr.msra.gmra.mrb[0].mxu1 %vm671_vm3, %v6305_v1  ;;  %5900 = vmatprep.mubr.msk.bf16.mxu0 %vm671_vm3, %v7777_v7  ;;  %v4410_v43 = vrot.slane %v8447_v5, 5  ;;  %v2270_v7 = vsel %vm6587_vm4, %v2265_v18, %v8449_v51  ;;  %v3962_v18 = vrot.slane %v3960_v50, 5  ;;  %v7966_v5 = vrot.slane %v3966_v61, 5  ;;  %v6308_v19 = vld [vmem:[%s6561_s11 + $0x3c] sm:$0xff]  }
 0x120   : > { %5947 = vmatpush3.bf16.msra.mxu1 %v8448_v16  ;;  %5748 = vmatprep.mubr.msk.bf16.mxu1 %vm671_vm3, %v6306_v21  ;;  %v7955_v1 = vcombine.low %v2270_v7, %v2280_v41  ;;  %v7959_v21 = vld [vmem:[%s6561_s11 + $0xd4] sm:$0x1]  ;;  %v3972_v9 = vrot.slane %v3970_v49, 4  ;;  %v3950_v41 = vrot.slane %v3949_v56, 4  ;;  %v3954_v6 = vrot.slane %v3952_v31, 5 }
 0x121   : > { %v7963_v22 = vsel %vm6813_vm7, %v5441_v63, %v4410_v43  ;;  %v4412_v17 = vrot.slane %v4410_v43, 4  ;;  %v3921_v63 = vsel %vm6587_vm4, %v3916_v28, %v7863_v4  ;;  %v3931_v2 = vsel %vm6587_vm4, %v3926_v47, %v3930_v23  ;;  %v6358_v16 = vld [vmem:[%s6561_s11 + $0x1c] sm:$0xf]  ;;  %v5427_v28 = vld [vmem:[%s6561_s11 + $0xa8] sm:$0xe] }
 0x122   : > { %v3976_v50 = vshll.u32 %v7959_v21, 16  ;;  %v5442_v61 = vrot.slane %v5426_v11, 9  ;;  %v4417_v49 = vrot.slane %v7663_v25, 5  ;;  %v3945_v4 = vsel %vm6587_vm4, %v3940_v12, %v7922_v62  ;;  %v5415_v62 = vld [vmem:[%s6561_s11 + $0x18] sm:$0xe]  ;;  %v6309_v47 = vld [vmem:[%s6561_s11 + $0x48] sm:$0xff]  }
 0x123   : > { %v7972_v44 = vsel %vm6813_vm7, %v4412_v17, %v4413_v8  ;;  %v3973_v43 = vor.u32 %v3972_v9, %v7966_v5  ;;  %v4420_v23 = vrot.slane %v7708_v57, 5  ;;  %v3955_v25 = vsel %vm6587_vm4, %v3950_v41, %v3954_v6  ;;  %v6359_v11 = vld [vmem:[%s6561_s11 + $0x20] sm:$0x1] }
 0x124   : > { %v5458_v3 = vcombine.low %v7963_v22, %v7972_v44  ;;  %v4340_v56 = vrot.slane %v6358_v16, 5  ;;  %v7998_v31 = vsel %vm6813_vm7, %v5442_v61, %v4417_v49  ;;  %v4419_v51 = vrot.slane %v4417_v49, 4  ;;  %v5428_v49 = vld [vmem:[%s6561_s11 + $0xb4] sm:$0xe] }
 0x125   : > { %v5396_v7 = vcombine.low %v3921_v63, %v3931_v2  ;;  %v3974_v17 = vrot.slane %v3973_v43, 4  ;;  %v5443_v41 = vrot.slane %v5427_v28, 9  ;;  %v4424_v6 = vrot.slane %v7711_v34, 5  ;;  %v5416_v2 = vld [vmem:[%s6561_s11 + $0x24] sm:$0xe] }
 0x126   : > { %5901 = vmatmul.mubr.msk.bf16.gmra.mrb[20].mxu0 %vm671_vm3, %v7810_v24  ;;  %v3963_v24 = vor.u32 %v3962_v18, %v3959_v30  ;;  %v8003_v57 = vsel %vm6813_vm7, %v4419_v51, %v4420_v23  ;;  %v6310_v30 = vld [vmem:[%s6561_s11 + $0x54] sm:$0xff]   ;;  %v5431_v18 = vrot.slane %v5415_v62, 9  ;;  %v4342_v9 = vrot.slane %v4340_v56, 4  ;;  %v6362_v28 = vld [vmem:[%s6561_s11 + $0x2c] sm:$0x1] }
 0x127   : > { %5749 = vmatmul.mubr.msk.bf16.gmra.mrb[4].mxu1 %vm671_vm3, %v6307_v29  ;;  %5904 = vmatprep.mubr.msk.bf16.mxu0 %vm671_vm3, %v5395_v46  ;;  %v3978_v46 = vrot.slane %v3976_v50, 5  ;;  %v5397_v29 = vcombine.low %v3945_v4, %v3955_v25  ;;  %v5459_v8 = vcombine.low %v7998_v31, %v8003_v57  ;;  %v4427_v63 = vrot.slane %v7721_v48, 5  ;;  %v6360_v50 = vld [vmem:[%s6561_s11 + $0x28] sm:$0xf]  ;;  %v5417_v25 = vld [vmem:[%s6561_s11 + $0x30] sm:$0xe] }
 0x128   : > { %5752 = vmatprep.mubr.msk.bf16.mxu1 %vm671_vm3, %v6308_v19  ;;  %v3964_v12 = vrot.slane %v3963_v24, 4  ;;  %v4343_v19 = vrot.slane %v6359_v11, 5  ;;  %v4347_v61 = vrot.slane %v6360_v50, 5  ;;  %v8026_v48 = vsel %vm6813_vm7, %v5443_v41, %v4424_v6  ;;  %v6312_v11 = vld [vmem:[%s6561_s11 + $0x6c] sm:$0xff]   ;;  %v5429_v50 = vld [vmem:[%s6561_s11 + $0xc0] sm:$0xe] }
 0x129   : > { %v3979_v34 = vsel %vm6587_vm4, %v3974_v17, %v3978_v46  ;;  %v4426_v24 = vrot.slane %v4424_v6, 4  ;;  %v4341_v43 = vsel %vm6813_vm7, %v5431_v18, %v4340_v56  ;;  %v5432_v51 = vrot.slane %v5416_v2, 9  ;;  %v8450_v41 = vld [vmem:[#allocation9_spill] sm:$0xff]  ;;  %v6376_v31 = vld [vmem:[%s6561_s11 + $0xc8] sm:$0x1] }
 0x12a   : > { %v3969_v4 = vsel %vm6587_vm4, %v3964_v12, %v7966_v5  ;;  %v4344_v23 = vsel %vm6813_vm7, %v4342_v9, %v4343_v19  ;;  %v6361_v5 = vld [vmem:[%s6561_s11 + $0x34] sm:$0xf]  ;;  %v6311_v12 = vld [vmem:[%s6561_s11 + $0x60] sm:$0xff]   ;;  %v5433_v18 = vrot.slane %v5417_v25, 9  ;;  %v4434_v9 = vrot.slane %v7835_v35, 5 }
 0x12b   : > { %v4354_v16 = vrot.slane %v6361_v5, 5  ;;  %v8037_v62 = vsel %vm6813_vm7, %v4426_v24, %v4427_v63  ;;  %v5398_v46 = vcombine.low %v3969_v4, %v3979_v34  ;;  %v5448_v17 = vcombine.low %v4341_v43, %v4344_v23  ;;  %v5418_v24 = vld [vmem:[%s6561_s11 + $0x3c] sm:$0xe] }
 0x12c   : > { %v5460_v56 = vcombine.low %v8026_v48, %v8037_v62  ;;  %v4357_v6 = vrot.slane %v8450_v41, 5  ;;  %v4348_v35 = vsel %vm6813_vm7, %v5432_v51, %v4347_v61  ;;  %v5445_v5 = vrot.slane %v5429_v50, 9 }
 0x12d   : > { %v4356_v19 = vrot.slane %v4354_v16, 4  ;;  %v4355_v23 = vsel %vm6813_vm7, %v5433_v18, %v4354_v16  ;;  %v4441_v51 = vrot.slane %v7928_v52, 5  ;;  %v2421_v57 = vshll.u32 %v6376_v31, 16 }
 0x12e   : > { %5905 = vmatmul.mubr.msk.bf16.gmra.mrb[24].mxu0 %vm671_vm3, %v5396_v7  ;;  %v5444_v7 = vrot.slane %v5428_v49, 9 }
 0x12f   : > { %5753 = vmatmul.mubr.msk.bf16.gmra.mrb[8].mxu1 %vm671_vm3, %v6309_v47  ;;  %5908 = vmatprep.mubr.msk.bf16.mxu0 %vm671_vm3, %v5397_v29  ;;  %v4350_v47 = vrot.slane %v6362_v28, 5  ;;  %v4431_v29 = vrot.slane %v7786_v39, 5  ;;  %v8451_v39 = vld [vmem:[#allocation10_spill] sm:$0xff]  ;;  %v4358_v25 = vsel %vm6813_vm7, %v4356_v19, %v4357_v6  ;;  %v5434_v28 = vrot.slane %v5418_v24, 9 }
 0x130   : > { %5756 = vmatprep.mubr.msk.bf16.mxu1 %vm671_vm3, %v6310_v30  ;;  %v4349_v30 = vrot.slane %v4347_v61, 4  ;;  %v4361_v49 = vrot.slane %v8451_v39, 5  ;;  %v4438_v61 = vrot.slane %v7838_v58, 5  ;;  %v6363_v39 = vld [vmem:[%s6561_s11 + $0x70] sm:$0xf]  ;;  %v4445_v24 = vrot.slane %v7914_v55, 5 }
 0x131   : > { %v8049_v63 = vsel %vm6813_vm7, %v5444_v7, %v4431_v29  ;;  %v4433_v2 = vrot.slane %v4431_v29, 4  ;;  %v5147_v7 = vld [vmem:[%s6561_s11 + $0x6c] sm:$0xf]  ;;  %v8452_v29 = vld [vmem:[#allocation11_spill] sm:$0xff] }
 0x132   : > { %v4351_v34 = vsel %vm6813_vm7, %v4349_v30, %v4350_v47  ;;  %v4363_v47 = vrot.slane %v4361_v49, 4  ;;  %v6313_v30 = vld [vmem:[%s6561_s11 + $0x78] sm:$0xff]   ;;  %v8080_v16 = vsel %vm6813_vm7, %v5445_v5, %v4438_v61  ;;  %v4440_v18 = vrot.slane %v4438_v61, 4 }
 0x133   : > { %v8056_v4 = vsel %vm6813_vm7, %v4433_v2, %v4434_v9  ;;  %v5450_v9 = vcombine.low %v4355_v23, %v4358_v25  ;;  %v2234_v19 = vshrl.u32 %v5147_v7, 16  ;;  %v2237_v41 = vshll.u32 %v5147_v7, 16 }
 0x134   : > { %v5461_v43 = vcombine.low %v8049_v63, %v8056_v4  ;;  %v8085_v58 = vsel %vm6813_vm7, %v4440_v18, %v4441_v51  ;;  %v4362_v6 = vsel %vm6813_vm7, %v5434_v28, %v4361_v49  ;;  %v4448_v49 = vrot.slane %v7959_v21, 5  ;;  %v6315_v51 = vld [vmem:[%s6561_s11 + $0x90] sm:$0xff]   ;;  %v6316_v21 = vld [vmem:[%s6561_s11 + $0x9c] sm:$0xff]  }
 0x135   : > { %v5462_v50 = vcombine.low %v8080_v16, %v8085_v58  ;;  %v2236_v23 = vrot.slane %v2234_v19, 4  ;;  %v2239_v25 = vrot.slane %v2237_v41, 5  ;;  %v4447_v7 = vrot.slane %v4445_v24, 4 }
 0x136   : > { %5909 = vmatmul.mubr.msk.bf16.gmra.mrb[28].mxu0 %vm671_vm3, %v5398_v46  ;;  %v5449_v46 = vcombine.low %v4348_v35, %v4351_v34  ;;  %v2243_v35 = vshll.u32 %v6363_v39, 16  ;;  %v2247_v34 = vshrl.u32 %v6363_v39, 16 }
 0x137   : > { %5757 = vmatmul.mubr.msk.bf16.gmra.mrb[12].mxu1 %vm671_vm3, %v6311_v12  ;;  %5914 = vmatprep.mubr.msk.bf16.mxu0 %vm671_vm3, %v5448_v17  ;;  %v4364_v12 = vrot.slane %v8452_v29, 5  ;;  %v5430_v17 = vld [vmem:[%s6561_s11 + $0xcc] sm:$0xe]  ;;  %v8107_v55 = vsel %vm6813_vm7, %v4447_v7, %v4448_v49 }
 0x138   : > { %5760 = vmatprep.mubr.msk.bf16.mxu1 %vm671_vm3, %v6312_v11  ;;  %v6314_v11 = vld [vmem:[%s6561_s11 + $0x84] sm:$0xff]   ;;  %v5446_v52 = vrot.slane %v5430_v17, 9  ;;  %v2249_v28 = vrot.slane %v2247_v34, 4  ;;  %v6364_v17 = vld [vmem:[%s6561_s11 + $0x74] sm:$0x1] }
 0x139   : > { %v4365_v2 = vsel %vm6813_vm7, %v4363_v47, %v4364_v12  ;;  %v5153_v47 = vld [vmem:[%s6561_s11 + $0x84] sm:$0xf]  ;;  %v2240_v12 = vor.u32 %v2239_v25, %v2236_v23  ;;  %v6318_v34 = vld [vmem:[%s6561_s11 + $0xb4] sm:$0xff]  }
 0x13a   : > { %v8102_v5 = vsel %vm6813_vm7, %v5446_v52, %v4445_v24  ;;  %v5451_v61 = vcombine.low %v4362_v6, %v4365_v2  ;;  %v2285_v18 = vshll.u32 %v5153_v47, 16  ;;  %v5156_v6 = vld [vmem:[%s6561_s11 + $0x90] sm:$0xf]  ;;  %v6317_v2 = vld [vmem:[%s6561_s11 + $0xa8] sm:$0xff]  }
 0x13b   : > { %v5463_v29 = vcombine.low %v8102_v5, %v8107_v55  ;;  %v2241_v52 = vrot.slane %v2240_v12, 4  ;;  %v2306_v23 = vshrl.u32 %v5156_v6, 16  ;;  %v2309_v25 = vshll.u32 %v5156_v6, 16 }
 0x13c   : > { %v2339_v12 = vshll.u32 %v6367_v60, 16 }
 0x13d   : > { %v2311_v14 = vrot.slane %v2309_v25, 5  ;;  %v6370_v25 = vld [vmem:[%s6561_s11 + $0xa4] sm:$0x1] }
 0x13e   : > { %5915 = vmatmul.mubr.msk.bf16.vlgmr.msra.gmra.mrb[0].mxu0 %vm671_vm3, %v5449_v46  ;;  %v2245_v46 = vrot.slane %v2243_v35, 5  ;;  %v5159_v35 = vld [vmem:[%s6561_s11 + $0x9c] sm:$0xf]  ;;  %v8149_v6 = vrot.slane %v2339_v12, 5 }
 0x13f   : > { %5761 = vmatmul.mubr.msk.bf16.gmra.mrb[16].mxu1 %vm671_vm3, %v6313_v30  ;;  %5918 = vmatprep.mubr.msk.bf16.mxu0 %vm671_vm3, %v5450_v9  ;;  %v2253_v30 = vshll.u32 %v6364_v17, 16  ;;  %v2282_v9 = vshrl.u32 %v5153_v47, 16  ;;  %v2333_v47 = vshll.u32 %v5159_v35, 16  ;;  %v6368_v17 = vld [vmem:[%s6561_s11 + $0x8c] sm:$0x1] }
 0x140   : > { %5764 = vmatprep.mubr.msk.bf16.mxu1 %vm671_vm3, %v6314_v11  ;;  %v2250_v13 = vor.u32 %v2249_v28, %v2245_v46  ;;  %v6365_v11 = vld [vmem:[%s6561_s11 + $0x88] sm:$0xf]  ;;  %v2246_v7 = vsel %vm6587_vm4, %v2241_v52, %v2245_v46 }
 0x141   : > { %v2291_v19 = vshll.u32 %v6365_v11, 16  ;;  %v2295_v41 = vshrl.u32 %v6365_v11, 16  ;;  %v2255_v0 = vrot.slane %v2253_v30, 5  ;;  %v2284_v36 = vrot.slane %v2282_v9, 4 }
 0x142   : > { %v2251_v39 = vrot.slane %v2250_v13, 4  ;;  %v2301_v30 = vshll.u32 %v6368_v17, 16  ;;  %v2308_v9 = vrot.slane %v2306_v23, 4  ;;  %v2335_v11 = vrot.slane %v2333_v47, 5 }
 0x143   : > { %v8126_v24 = vrot.slane %v2291_v19, 5  ;;  %v2297_v49 = vrot.slane %v2295_v41, 4  ;;  %v6319_v19 = vld [vmem:[%s6561_s11 + $0xc0] sm:$0xff]  }
 0x144   : > { %v2256_v46 = vsel %vm6587_vm4, %v2251_v39, %v2255_v0  ;;  %v5162_v39 = vld [vmem:[%s6561_s11 + $0xa8] sm:$0xf] }
 0x145   : > { %v2298_v13 = vor.u32 %v2297_v49, %v8126_v24  ;;  %v5180_v41 = vcombine.low %v2246_v7, %v2256_v46  ;;  %v2349_v7 = vshll.u32 %v6370_v25, 16  ;;  %v2357_v45 = vshll.u32 %v5162_v39, 16 }
 0x146   : > { %5919 = vmatmul.mubr.msk.bf16.gmra.mrb[4].mxu0 %vm671_vm3, %v5451_v61  ;;  %v6366_v61 = vld [vmem:[%s6561_s11 + $0x94] sm:$0xf] }
 0x147   : > { %5765 = vmatmul.mubr.msk.bf16.gmra.mrb[20].mxu1 %vm671_vm3, %v6315_v51  ;;  %5922 = vmatprep.mubr.msk.bf16.mxu0 %vm671_vm3, %v5452_v10  ;;  %v2287_v10 = vrot.slane %v2285_v18, 5  ;;  %v2315_v51 = vshll.u32 %v6366_v61, 16  ;;  %v2319_v28 = vshrl.u32 %v6366_v61, 16  ;;  %v2299_v0 = vrot.slane %v2298_v13, 4 }
 0x148   : > { %5768 = vmatprep.mubr.msk.bf16.mxu1 %vm671_vm3, %v6316_v21  ;;  %v2330_v21 = vshrl.u32 %v5159_v35, 16  ;;  %v6369_v35 = vld [vmem:[%s6561_s11 + $0x98] sm:$0x1]  ;;  %v2354_v61 = vshrl.u32 %v5162_v39, 16  ;;  %v5168_v39 = vld [vmem:[%s6561_s11 + $0xc0] sm:$0xf] }
 0x149   : > { %v2288_v15 = vor.u32 %v2287_v10, %v2284_v36  ;;  %v8146_v26 = vrot.slane %v2315_v51, 5  ;;  %v2303_v36 = vrot.slane %v2301_v30, 5  ;;  %v2312_v10 = vor.u32 %v2311_v14, %v2308_v9  ;;  %v5165_v51 = vld [vmem:[%s6561_s11 + $0xb4] sm:$0xf] }
 0x14a   : > { %v2332_v18 = vrot.slane %v2330_v21, 4  ;;  %v2367_v21 = vshrl.u32 %v6371_v27, 16  ;;  %v2378_v20 = vshrl.u32 %v5165_v51, 16  ;;  %v2381_v42 = vshll.u32 %v5165_v51, 16 }
 0x14b   : > { %v2289_v52 = vrot.slane %v2288_v15, 4  ;;  %v2304_v46 = vsel %vm6587_vm4, %v2299_v0, %v2303_v36  ;;  %v2313_v15 = vrot.slane %v2312_v10, 4  ;;  %v2351_v30 = vrot.slane %v2349_v7, 5 }
 0x14c   : > { %v2336_v23 = vor.u32 %v2335_v11, %v2332_v18  ;;  %v2356_v9 = vrot.slane %v2354_v61, 4  ;;  %v2369_v11 = vrot.slane %v2367_v21, 4  ;;  %v6375_v61 = vld [vmem:[%s6561_s11 + $0xbc] sm:$0x1] }
 0x14d   : > { %v2294_v47 = vsel %vm6587_vm4, %v2289_v52, %v8126_v24  ;;  %v2318_v0 = vsel %vm6587_vm4, %v2313_v15, %v8146_v26  ;;  %v2397_v22 = vshll.u32 %v6375_v61, 16 }
 0x14e   : > { %5923 = vmatmul.mubr.msk.bf16.gmra.mrb[8].mxu0 %vm671_vm3, %v5453_v40  ;;  %v2343_v40 = vshrl.u32 %v6367_v60, 16  ;;  %v2337_v17 = vrot.slane %v2336_v23, 4  ;;  %v5182_v24 = vcombine.low %v2294_v47, %v2304_v46 }
 0x14f   : > { %5769 = vmatmul.mubr.msk.bf16.gmra.mrb[24].mxu1 %vm671_vm3, %v6317_v2  ;;  %5926 = vmatprep.mubr.msk.bf16.mxu0 %vm671_vm3, %v5454_v54  ;;  %v2321_v54 = vrot.slane %v2319_v28, 4 }
 0x150   : > { %5772 = vmatprep.mubr.msk.bf16.mxu1 %vm671_vm3, %v6318_v34  ;;  %v2345_v2 = vrot.slane %v2343_v40, 4  ;;  %v2325_v34 = vshll.u32 %v6369_v35, 16  ;;  %v2342_v10 = vsel %vm6587_vm4, %v2337_v17, %v8149_v6  ;;  %v2423_v17 = vrot.slane %v2421_v57, 5 }
 0x151   : > { %v2322_v49 = vor.u32 %v2321_v54, %v8146_v26  ;;  %v2359_v54 = vrot.slane %v2357_v45, 5  ;;  %v6373_v26 = vld [vmem:[%s6561_s11 + $0xb0] sm:$0x1] }
 0x152   : > { %v2346_v28 = vor.u32 %v2345_v2, %v8149_v6  ;;  %v2327_v60 = vrot.slane %v2325_v34, 5  ;;  %v2373_v35 = vshll.u32 %v6373_v26, 16  ;;  %v2402_v34 = vshrl.u32 %v5168_v39, 16 }
 0x153   : > { %v2323_v13 = vrot.slane %v2322_v49, 4  ;;  %v2360_v38 = vor.u32 %v2359_v54, %v2356_v9  ;;  %v2405_v6 = vshll.u32 %v5168_v39, 16  ;;  %v6374_v49 = vld [vmem:[%s6561_s11 + $0xc4] sm:$0xf] }
 0x154   : > { %v2347_v14 = vrot.slane %v2346_v28, 4  ;;  %v2411_v23 = vshll.u32 %v6374_v49, 16  ;;  %v2415_v25 = vshrl.u32 %v6374_v49, 16  ;;  %v2375_v45 = vrot.slane %v2373_v35, 5 }
 0x155   : > { %v2328_v36 = vsel %vm6587_vm4, %v2323_v13, %v2327_v60  ;;  %v2361_v51 = vrot.slane %v2360_v38, 4  ;;  %v2399_v60 = vrot.slane %v2397_v22, 5 }
 0x156   : > { %5927 = vmatmul.mubr.msk.bf16.gmra.mrb[12].mxu0 %vm671_vm3, %v5455_v53  ;;  %v2363_v53 = vshll.u32 %v6371_v27, 16  ;;  %v2352_v59 = vsel %vm6587_vm4, %v2347_v14, %v2351_v30  ;;  %v5183_v44 = vcombine.low %v2318_v0, %v2328_v36  ;;  %v2404_v27 = vrot.slane %v2402_v34, 4 }
 0x157   : > { %5773 = vmatmul.mubr.msk.bf16.gmra.mrb[28].mxu1 %vm671_vm3, %v6319_v19  ;;  %5930 = vmatprep.mubr.msk.bf16.mxu0 %vm671_vm3, %v5456_v33  ;;  %v6372_v33 = vld [vmem:[%s6561_s11 + $0xb8] sm:$0xf]  ;;  %v2380_v19 = vrot.slane %v2378_v20, 4  ;;  %v2413_v21 = vrot.slane %v2411_v23, 5  ;;  %v2417_v47 = vrot.slane %v2415_v25, 4 }
 0x158   : > { %5794 = vmatprep.mubr.msk.bf16.mxu1 %vm671_vm3, %v5180_v41  ;;  %v2387_v12 = vshll.u32 %v6372_v33, 16  ;;  %v2391_v40 = vshrl.u32 %v6372_v33, 16  ;;  %v2365_v18 = vrot.slane %v2363_v53, 5  ;;  %v2383_v41 = vrot.slane %v2381_v42, 5 }
 0x159   : > { %v2407_v53 = vrot.slane %v2405_v6, 5 }
 0x15a   : > { %v2389_v52 = vrot.slane %v2387_v12, 5  ;;  %v2393_v2 = vrot.slane %v2391_v40, 4  ;;  %v2366_v20 = vsel %vm6587_vm4, %v2361_v51, %v2365_v18  ;;  %v2418_v12 = vor.u32 %v2417_v47, %v2413_v21 }
 0x15b   : > { %v2408_v33 = vor.u32 %v2407_v53, %v2404_v27 }
 0x15c   : > { %v2394_v7 = vor.u32 %v2393_v2, %v2389_v52  ;;  %v2419_v13 = vrot.slane %v2418_v12, 4  ;;  %v8249_v2 = vld [vmem:[%s8382_s2] ss:$0 sm:$0xff] }
 0x15d   : > { %v2409_v40 = vrot.slane %v2408_v33, 4 }
 0x15e   : > { %5931 = vmatmul.mubr.msk.bf16.gmra.mrb[16].mxu0 %vm671_vm3, %v5457_v37  ;;  %v2370_v37 = vor.u32 %v2369_v11, %v2365_v18  ;;  %v2395_v15 = vrot.slane %v2394_v7, 4  ;;  %v2424_v9 = vsel %vm6587_vm4, %v2419_v13, %v2423_v17 }
 0x15f   : > { %5795 = vmatmul.mubr.msk.bf16.vlgmr.msra.gmra.mrb[16].mxu1 %vm671_vm3, %v7955_v1  ;;  %5934 = vmatprep.mubr.msk.bf16.mxu0 %vm671_vm3, %v5458_v3  ;;  %v2384_v1 = vor.u32 %v2383_v41, %v2380_v19  ;;  %v5184_v3 = vcombine.low %v2342_v10, %v2352_v59  ;;  %v2414_v30 = vsel %vm6587_vm4, %v2409_v40, %v2413_v21 }
 0x160   : > { %5798 = vmatprep.mubr.msk.bf16.mxu1 %vm671_vm3, %v5182_v24  ;;  %v2371_v28 = vrot.slane %v2370_v37, 4  ;;  %v2400_v48 = vsel %vm6587_vm4, %v2395_v15, %v2399_v60  ;;  %v5187_v14 = vcombine.low %v2414_v30, %v2424_v9 }
 0x161   : > { %v2385_v46 = vrot.slane %v2384_v1, 4 }
 0x162   : > { %v2376_v42 = vsel %vm6587_vm4, %v2371_v28, %v2375_v45 }
 0x163   : > { %v5185_v62 = vcombine.low %v2366_v20, %v2376_v42 }
 0x166   : > { %5935 = vmatmul.mubr.msk.bf16.gmra.mrb[20].mxu0 %vm671_vm3, %v5459_v8  ;;  %v2390_v8 = vsel %vm6587_vm4, %v2385_v46, %v2389_v52 }
 0x167   : > { %5799 = vmatmul.mubr.msk.bf16.gmra.mrb[20].mxu1 %vm671_vm3, %v5183_v44  ;;  %5938 = vmatprep.mubr.msk.bf16.mxu0 %vm671_vm3, %v5460_v56  ;;  %v5186_v56 = vcombine.low %v2390_v8, %v2400_v48 }
 0x168   : > { %5802 = vmatprep.mubr.msk.bf16.mxu1 %vm671_vm3, %v5184_v3 }
 0x16e   : > { %5939 = vmatmul.mubr.msk.bf16.gmra.mrb[24].mxu0 %vm671_vm3, %v5461_v43 }
 0x16f   : > { %5803 = vmatmul.mubr.msk.bf16.gmra.mrb[24].mxu1 %vm671_vm3, %v5185_v62  ;;  %5942 = vmatprep.mubr.msk.bf16.mxu0 %vm671_vm3, %v5462_v50 }
 0x170   : > { %5806 = vmatprep.mubr.msk.bf16.mxu1 %vm671_vm3, %v5186_v56 }
 0x176   : > { %5943 = vmatmul.mubr.msk.bf16.gmra.mrb[28].mxu0 %vm671_vm3, %v5463_v29 }
 0x177   : > { %5807 = vmatmul.mubr.msk.bf16.gmra.mrb[28].mxu1 %vm671_vm3, %v5187_v14 }
 0x1f2   : > { %v5746_v63 = vpop.f32.mrb[0].mxu1 }
 0x1f3   : > { %v1834_v4 = vpop.f32.mrb[1].mxu1 }
 0x1f4   : > { %v5747_v43 = vpop.f32.mrb[2].mxu1 }
 0x1f5   : > { %v1837_v16 = vpop.f32.mrb[3].mxu1 }
 0x1fa   : > { %v5750_v58 = vpop.f32.mrb[4].mxu1 }
 0x1fb   : > { %v1850_v50 = vpop.f32.mrb[5].mxu1 }
 0x1fc   : > { %v5751_v54 = vpop.f32.mrb[6].mxu1 }
 0x1fd   : > { %v1853_v18 = vpop.f32.mrb[7].mxu1 }
 0x202   : > { %v5754_v32 = vpop.f32.mrb[8].mxu1 }
 0x203   : > { %v1866_v11 = vpop.f32.mrb[9].mxu1 }
 0x204   : > { %v5755_v24 = vpop.f32.mrb[10].mxu1 }
 0x205   : > { %v1869_v19 = vpop.f32.mrb[11].mxu1 }
 0x20a   : > { %v8237_v41 = vpop.f32.mrb[12].mxu1 }
 0x20b   : > { %v8239_v5 = vpop.f32.mrb[13].mxu1 }
 0x20c   : > { %v8241_v55 = vpop.f32.mrb[14].mxu1 }
 0x20d   : > { %v8243_v29 = vpop.f32.mrb[15].mxu1 }
 0x211   : > { %v5916_v52 = vpop.f32.mrb[0].mxu0 }
 0x212   : > { %v5948_v39 = vadd.f32 %v5916_v52, %v5746_v63  ;;  %v4585_v0 = vpop.f32.mrb[1].mxu0 }
 0x213   : > { %v5949_v36 = vadd.f32 %v4585_v0, %v1834_v4  ;;  %v5917_v10 = vpop.f32.mrb[2].mxu0 }
 0x214   : > { %v4753_v59 = vadd.f32 %v5948_v39, %v8249_v2  ;;  %v5950_v38 = vadd.f32 %v5917_v10, %v5747_v43  ;;  %v4588_v37 = vpop.f32.mrb[3].mxu0 }
 0x215   : > { %v4751_v26 = vadd.f32 %v5949_v36, %v8249_v2  ;;  %v5951_v35 = vadd.f32 %v4588_v37, %v1837_v16 }
 0x216   : > { %v4785_v34 = vmax.f32 %v4753_v59, 0.0  ;;  %v4754_v6 = vadd.f32 %v5950_v38, %v8249_v2 }
 0x217   : > { %v4783_v49 = vmax.f32 %v4751_v26, 0.0  ;;  %v4752_v23 = vadd.f32 %v5951_v35, %v8249_v2 }
 0x218   : > { %4817 = vst [vmem:[%s8257_s19 + $0x10] sm:$0xff] %v4785_v34  ;;  %v4786_v25 = vmax.f32 %v4754_v6, 0.0 }
 0x219   : > { %4815 = vst [vmem:[%s8257_s19] sm:$0xff] %v4783_v49  ;;  %v4784_v1 = vmax.f32 %v4752_v23, 0.0  ;;  %v5920_v7 = vpop.f32.mrb[4].mxu0 }
 0x21a   : > { %4818 = vst [vmem:[%s8257_s19 + $0x18] sm:$0xff] %v4786_v25  ;;  %v5952_v61 = vadd.f32 %v5920_v7, %v5750_v58  ;;  %v4601_v22 = vpop.f32.mrb[5].mxu0 }
 0x21b   : > { %4816 = vst [vmem:[%s8257_s19 + $0x8] sm:$0xff] %v4784_v1  ;;  %v5953_v44 = vadd.f32 %v4601_v22, %v1850_v50  ;;  %v5921_v3 = vpop.f32.mrb[6].mxu0 }
 0x21c   : > { %v4757_v51 = vadd.f32 %v5952_v61, %v8249_v2  ;;  %v5954_v28 = vadd.f32 %v5921_v3, %v5751_v54  ;;  %v4604_v45 = vpop.f32.mrb[7].mxu0 }
 0x21d   : > { %v4755_v27 = vadd.f32 %v5953_v44, %v8249_v2  ;;  %v5955_v53 = vadd.f32 %v4604_v45, %v1853_v18 }
 0x21e   : > { %v4789_v21 = vmax.f32 %v4757_v51, 0.0  ;;  %v4758_v47 = vadd.f32 %v5954_v28, %v8249_v2 }
 0x21f   : > { %v4787_v46 = vmax.f32 %v4755_v27, 0.0  ;;  %v4756_v15 = vadd.f32 %v5955_v53, %v8249_v2 }
 0x220   : > { %4821 = vst [vmem:[%s8257_s19 + $0x30] sm:$0xff] %v4789_v21  ;;  %v4790_v60 = vmax.f32 %v4758_v47, 0.0 }
 0x221   : > { %4819 = vst [vmem:[%s8257_s19 + $0x20] sm:$0xff] %v4787_v46  ;;  %v4788_v20 = vmax.f32 %v4756_v15, 0.0  ;;  %v5924_v42 = vpop.f32.mrb[8].mxu0 }
 0x222   : > { %4822 = vst [vmem:[%s8257_s19 + $0x38] sm:$0xff] %v4790_v60  ;;  %v5956_v33 = vadd.f32 %v5924_v42, %v5754_v32  ;;  %v4617_v12 = vpop.f32.mrb[9].mxu0 }
 0x223   : > { %4820 = vst [vmem:[%s8257_s19 + $0x28] sm:$0xff] %v4788_v20  ;;  %v5957_v31 = vadd.f32 %v4617_v12, %v1866_v11  ;;  %v5925_v57 = vpop.f32.mrb[10].mxu0 }
 0x224   : > { %v4761_v8 = vadd.f32 %v5956_v33, %v8249_v2  ;;  %v5958_v48 = vadd.f32 %v5925_v57, %v5755_v24  ;;  %v4620_v62 = vpop.f32.mrb[11].mxu0 }
 0x225   : > { %v4759_v56 = vadd.f32 %v5957_v31, %v8249_v2  ;;  %v5959_v40 = vadd.f32 %v4620_v62, %v1869_v19 }
 0x226   : > { %v4793_v13 = vmax.f32 %v4761_v8, 0.0  ;;  %v4762_v17 = vadd.f32 %v5958_v48, %v8249_v2 }
 0x227   : > { %v4791_v30 = vmax.f32 %v4759_v56, 0.0  ;;  %v4760_v9 = vadd.f32 %v5959_v40, %v8249_v2 }
 0x228   : > { %4825 = vst [vmem:[%s8257_s19 + $0x50] sm:$0xff] %v4793_v13  ;;  %v4794_v14 = vmax.f32 %v4762_v17, 0.0 }
 0x229   : > { %4823 = vst [vmem:[%s8257_s19 + $0x40] sm:$0xff] %v4791_v30  ;;  %v4792_v63 = vmax.f32 %v4760_v9, 0.0  ;;  %v5928_v4 = vpop.f32.mrb[12].mxu0 }
 0x22a   : > { %4826 = vst [vmem:[%s8257_s19 + $0x58] sm:$0xff] %v4794_v14  ;;  %v5960_v43 = vadd.f32 %v5928_v4, %v8237_v41  ;;  %v4633_v16 = vpop.f32.mrb[13].mxu0 }
 0x22b   : > { %4824 = vst [vmem:[%s8257_s19 + $0x48] sm:$0xff] %v4792_v63  ;;  %v5961_v58 = vadd.f32 %v4633_v16, %v8239_v5  ;;  %v5929_v50 = vpop.f32.mrb[14].mxu0 }
 0x22c   : > { %v4765_v54 = vadd.f32 %v5960_v43, %v8249_v2  ;;  %v5962_v18 = vadd.f32 %v5929_v50, %v8241_v55  ;;  %v4636_v32 = vpop.f32.mrb[15].mxu0 }
 0x22d   : > { %v4763_v11 = vadd.f32 %v5961_v58, %v8249_v2  ;;  %v5963_v24 = vadd.f32 %v4636_v32, %v8243_v29 }
 0x22e   : > { %v4797_v19 = vmax.f32 %v4765_v54, 0.0  ;;  %v4766_v41 = vadd.f32 %v5962_v18, %v8249_v2 }
 0x22f   : > { %v4795_v52 = vmax.f32 %v4763_v11, 0.0  ;;  %v4764_v39 = vadd.f32 %v5963_v24, %v8249_v2 }
 0x230   : > { %4829 = vst [vmem:[%s8257_s19 + $0x70] sm:$0xff] %v4797_v19  ;;  %v4798_v5 = vmax.f32 %v4766_v41, 0.0 }
 0x231   : > { %4827 = vst [vmem:[%s8257_s19 + $0x60] sm:$0xff] %v4795_v52  ;;  %v4796_v0 = vmax.f32 %v4764_v39, 0.0  ;;  %v5932_v36 = vpop.f32.mrb[16].mxu0 }
 0x232   : > { %4830 = vst [vmem:[%s8257_s19 + $0x78] sm:$0xff] %v4798_v5  ;;  %v5796_v10 = vpop.f32.mrb[16].mxu1  ;;  %v4649_v55 = vpop.f32.mrb[17].mxu0 }
 0x233   : > { %4828 = vst [vmem:[%s8257_s19 + $0x68] sm:$0xff] %v4796_v0  ;;  %v5964_v59 = vadd.f32 %v5932_v36, %v5796_v10  ;;  %v2624_v38 = vpop.f32.mrb[17].mxu1  ;;  %v5933_v37 = vpop.f32.mrb[18].mxu0 }
 0x234   : > { %v5965_v29 = vadd.f32 %v4649_v55, %v2624_v38  ;;  %v5797_v26 = vpop.f32.mrb[18].mxu1  ;;  %v4652_v35 = vpop.f32.mrb[19].mxu0 }
 0x235   : > { %v4769_v34 = vadd.f32 %v5964_v59, %v8249_v2  ;;  %v5966_v6 = vadd.f32 %v5933_v37, %v5797_v26  ;;  %v2627_v49 = vpop.f32.mrb[19].mxu1 }
 0x236   : > { %v4767_v23 = vadd.f32 %v5965_v29, %v8249_v2  ;;  %v5967_v25 = vadd.f32 %v4652_v35, %v2627_v49 }
 0x237   : > { %v4801_v1 = vmax.f32 %v4769_v34, 0.0  ;;  %v4770_v7 = vadd.f32 %v5966_v6, %v8249_v2 }
 0x238   : > { %v4799_v61 = vmax.f32 %v4767_v23, 0.0  ;;  %v4768_v22 = vadd.f32 %v5967_v25, %v8249_v2 }
 0x239   : > { %4833 = vst [vmem:[%s8257_s19 + $0x90] sm:$0xff] %v4801_v1  ;;  %v4802_v44 = vmax.f32 %v4770_v7, 0.0  ;;  %v5936_v3 = vpop.f32.mrb[20].mxu0 }
 0x23a   : > { %4831 = vst [vmem:[%s8257_s19 + $0x80] sm:$0xff] %v4799_v61  ;;  %v4800_v51 = vmax.f32 %v4768_v22, 0.0  ;;  %v5800_v28 = vpop.f32.mrb[20].mxu1  ;;  %v4665_v45 = vpop.f32.mrb[21].mxu0 }
 0x23b   : > { %4834 = vst [vmem:[%s8257_s19 + $0x98] sm:$0xff] %v4802_v44  ;;  %v5968_v27 = vadd.f32 %v5936_v3, %v5800_v28  ;;  %v2640_v53 = vpop.f32.mrb[21].mxu1  ;;  %v5937_v21 = vpop.f32.mrb[22].mxu0 }
 0x23c   : > { %4832 = vst [vmem:[%s8257_s19 + $0x88] sm:$0xff] %v4800_v51  ;;  %v5969_v47 = vadd.f32 %v4665_v45, %v2640_v53  ;;  %v5801_v46 = vpop.f32.mrb[22].mxu1  ;;  %v4668_v15 = vpop.f32.mrb[23].mxu0 }
 0x23d   : > { %v4773_v60 = vadd.f32 %v5968_v27, %v8249_v2  ;;  %v5970_v20 = vadd.f32 %v5937_v21, %v5801_v46  ;;  %v2643_v42 = vpop.f32.mrb[23].mxu1 }
 0x23e   : > { %v4771_v33 = vadd.f32 %v5969_v47, %v8249_v2  ;;  %v5971_v12 = vadd.f32 %v4668_v15, %v2643_v42 }
 0x23f   : > { %v4805_v31 = vmax.f32 %v4773_v60, 0.0  ;;  %v4774_v57 = vadd.f32 %v5970_v20, %v8249_v2 }
 0x240   : > { %v4803_v8 = vmax.f32 %v4771_v33, 0.0  ;;  %v4772_v48 = vadd.f32 %v5971_v12, %v8249_v2 }
 0x241   : > { %4837 = vst [vmem:[%s8257_s19 + $0xb0] sm:$0xff] %v4805_v31  ;;  %v4806_v62 = vmax.f32 %v4774_v57, 0.0  ;;  %v5940_v56 = vpop.f32.mrb[24].mxu0 }
 0x242   : > { %4835 = vst [vmem:[%s8257_s19 + $0xa0] sm:$0xff] %v4803_v8  ;;  %v4804_v40 = vmax.f32 %v4772_v48, 0.0  ;;  %v5804_v13 = vpop.f32.mrb[24].mxu1  ;;  %v4681_v17 = vpop.f32.mrb[25].mxu0 }
 0x243   : > { %4838 = vst [vmem:[%s8257_s19 + $0xb8] sm:$0xff] %v4806_v62  ;;  %v5972_v30 = vadd.f32 %v5940_v56, %v5804_v13  ;;  %v2656_v9 = vpop.f32.mrb[25].mxu1  ;;  %v5941_v14 = vpop.f32.mrb[26].mxu0 }
 0x244   : > { %4836 = vst [vmem:[%s8257_s19 + $0xa8] sm:$0xff] %v4804_v40  ;;  %v5973_v63 = vadd.f32 %v4681_v17, %v2656_v9  ;;  %v5805_v4 = vpop.f32.mrb[26].mxu1  ;;  %v4684_v43 = vpop.f32.mrb[27].mxu0 }
 0x245   : > { %v4777_v16 = vadd.f32 %v5972_v30, %v8249_v2  ;;  %v5974_v58 = vadd.f32 %v5941_v14, %v5805_v4  ;;  %v2659_v50 = vpop.f32.mrb[27].mxu1 }
 0x246   : > { %v4775_v54 = vadd.f32 %v5973_v63, %v8249_v2  ;;  %v5975_v18 = vadd.f32 %v4684_v43, %v2659_v50 }
 0x247   : > { %v4809_v32 = vmax.f32 %v4777_v16, 0.0  ;;  %v4778_v11 = vadd.f32 %v5974_v58, %v8249_v2 }
 0x248   : > { %v4807_v24 = vmax.f32 %v4775_v54, 0.0  ;;  %v4776_v19 = vadd.f32 %v5975_v18, %v8249_v2 }
 0x249   : > { %4841 = vst [vmem:[%s8257_s19 + $0xd0] sm:$0xff] %v4809_v32  ;;  %v4810_v41 = vmax.f32 %v4778_v11, 0.0  ;;  %v5944_v52 = vpop.f32.mrb[28].mxu0 }
 0x24a   : > { %4839 = vst [vmem:[%s8257_s19 + $0xc0] sm:$0xff] %v4807_v24  ;;  %v4808_v39 = vmax.f32 %v4776_v19, 0.0  ;;  %v5808_v5 = vpop.f32.mrb[28].mxu1  ;;  %v4697_v0 = vpop.f32.mrb[29].mxu0 }
 0x24b   : > { %4842 = vst [vmem:[%s8257_s19 + $0xd8] sm:$0xff] %v4810_v41  ;;  %v5976_v36 = vadd.f32 %v5944_v52, %v5808_v5  ;;  %v2672_v10 = vpop.f32.mrb[29].mxu1  ;;  %v5945_v55 = vpop.f32.mrb[30].mxu0 }
 0x24c   : > { %4840 = vst [vmem:[%s8257_s19 + $0xc8] sm:$0xff] %v4808_v39  ;;  %v5977_v59 = vadd.f32 %v4697_v0, %v2672_v10  ;;  %v5809_v38 = vpop.f32.mrb[30].mxu1  ;;  %v4700_v37 = vpop.f32.mrb[31].mxu0 }
 0x24d   : > { %v4781_v29 = vadd.f32 %v5976_v36, %v8249_v2  ;;  %v5978_v26 = vadd.f32 %v5945_v55, %v5809_v38  ;;  %v2675_v35 = vpop.f32.mrb[31].mxu1 }
 0x24e   : > { %v4779_v34 = vadd.f32 %v5977_v59, %v8249_v2  ;;  %v5979_v6 = vadd.f32 %v4700_v37, %v2675_v35 }
 0x24f   : > { %v4813_v49 = vmax.f32 %v4781_v29, 0.0  ;;  %v4782_v23 = vadd.f32 %v5978_v26, %v8249_v2 }
 0x250   : > { %v4811_v25 = vmax.f32 %v4779_v34, 0.0  ;;  %v4780_v1 = vadd.f32 %v5979_v6, %v8249_v2 }
 0x251   : > { %4845 = vst [vmem:[%s8257_s19 + $0xf0] sm:$0xff] %v4813_v49  ;;  %v4814_v7 = vmax.f32 %v4782_v23, 0.0 }
 0x252   : > { %4843 = vst [vmem:[%s8257_s19 + $0xe0] sm:$0xff] %v4811_v25  ;;  %v4812_v61 = vmax.f32 %v4780_v1, 0.0 }
 0x253   : > { %4846 = vst [vmem:[%s8257_s19 + $0xf8] sm:$0xff] %v4814_v7 }
 0x254   : > { %4844 = vst [vmem:[%s8257_s19 + $0xe8] sm:$0xff] %v4812_v61 }
 0x255   : > { %6390 = shalt.err (!%p6387_p5)
}
 0x256   : > { %s6391_s6 = scalar_lea.hbm %s8325_s28, 4096  ;;  %s6395_s9 = scalar_lea.hbm %s8383_s3, 8192 }
 0x257   : > { %p6392_p6 = scmp.ne.s32.totalorder %s8325_s28, %s6391_s6  ;;  %p6396_p10 = scmp.lt.u32.totalorder %s8325_s28, %s8383_s3 }
 0x258   : > { %p6397_p11 = scmp.lt.u32.totalorder %s6395_s9, %s6391_s6  ;;  %p6399_p13 = scmp.lt.u32.totalorder %s6391_s6, %s8325_s28 }
 0x259   : > { %p6393_p7 = pnand %p6392_p6, %p6520_p4 }
 0x25a   : > { %p6398_p12 = por %p6397_p11, %p6396_p10 }
 0x25b   : > { %p6394_p9 = pneg %p6393_p7 }
 0x25c   : > { %p6400_p0 = por %p6399_p13, %p6398_p12 }
 0x25e   : > { %p6401_p1 = pnand %p6400_p0, %p6394_p9 }
 0x260   : > { %6404 = shalt.err (!%p6401_p1)
}
 0x261   : > { %s6458_s18 = smov 128   ;;  %s6459_s19 = smov 8  }
 0x262   : > { %6215 = dma.vmem_to_hbm [thread:$0]  (%p6520_p4), %s8327_s23, 4096, %s8325_s28, %s8334_s15, %s6458_s18, %s6458_s18, %s6459_s19  }
 0x263 PF: > { %p6221_p2 = scmp.ge.s32.totalorder %s6455_s17, 2  ;;  %s4879_s21 = sand.u32 1, %s6435_s12  }
 0x264   : > { %s4880_s26 = scalar_lea.sflag [#allocation3], %s4879_s21 }
 0x265   : > { %p6218_p3 = pnand %p6221_p2, %p6527_p8 }
 0x267   : > { %6430 = dma.done.wait (!%p6218_p3), %s4880_s26, 4096  }
 0x268   : > { %6432 = vsyncadd (!%p6218_p3), %s4880_s26, 4294963200  ;;  %s16_s17 = sadd.s32 1, %s6455_s17   ;;  %s8453_s12 = smov %s6439_s13 }
 0x269   : > { %p13_p5 = scmp.ge.s32.totalorder %s16_s17, 4   ;;  %s8454_s13 = smov %s6443_s14 }
 0x26a   : > { %s8455_s14 = smov %s6533_s25  ;;  %s8456_s15 = smov %s6451_s16 }
 0x26b   : > { %s8457_s16 = smov %s8459_s20  ;;  %15 = sbr.rel (!%p13_p5) target bundleno = 4 (0x4), region = 77 }
 0x272   :  { %4885 = vsyncpa [#allocation3], 1 }
 0x273   :  { %4887 = vsyncpa [#allocation3 + $0x1], 1 }

</bundles_post_ra>
